<compile_context>
chip_gen: v7x
topology: tpu7x:2x2x1
jax: 0.10.0
libtpu: 0.0.40
codegen_flags: <defaults>
</compile_context>

<pallas_src>
import functools

import jax
import jax.numpy as jnp
from jax.experimental import pallas as pl
from jax.experimental.pallas import tpu as pltpu

_NEG_MASK = -1e30  # padded logit columns -> exp() underflows to 0


def _round_up(n, m):
    return ((n + m - 1) // m) * m


def mlp_softmax_kernel(x_ref, w1_ref, b1_ref, w2_ref, b2_ref, w3_ref, b3_ref, o_ref):
    x = x_ref[...]  # bf16 (TB, Fp)

    # Layer 1: bf16 MXU, f32 accumulate; bias-add + ReLU in bf16 (VPU packs 16x128/vreg).
    h1 = jnp.dot(x, w1_ref[...], preferred_element_type=jnp.float32).astype(jnp.bfloat16)
    h1 = jnp.maximum(h1 + b1_ref[...], 0.0)

    # Layer 2: same pattern.
    h2 = jnp.dot(h1, w2_ref[...], preferred_element_type=jnp.float32).astype(jnp.bfloat16)
    h2 = jnp.maximum(h2 + b2_ref[...], 0.0)

    # Layer 3 + softmax stay in f32.  Padded columns carry -1e30 bias -> exp == 0.
    logits = jnp.dot(h2, w3_ref[...], preferred_element_type=jnp.float32) + b3_ref[...]
    m = jnp.max(logits, axis=-1, keepdims=True)
    e = jnp.exp(logits - m)
    denom = jnp.sum(e, axis=-1, keepdims=True)
    o_ref[...] = (e * pl.reciprocal(denom, approx=True)).astype(o_ref.dtype)


def prepare_params(params):
    """One-time conversion of f32 (in, out)-layout params to the padded bf16 kernel
    layout.  Call ONCE and reuse; keeps the hot path free of pad/cast HBM traffic."""
    F = params["w1"].shape[0]
    H = params["w2"].shape[1]
    O = params["w3"].shape[1]
    Fp, Hp, Op = _round_up(F, 128), _round_up(H, 128), _round_up(O, 128)
    return {
        "w1": jnp.pad(params["w1"], ((0, Fp - F), (0, Fp - F))).astype(jnp.bfloat16),
        "b1": jnp.pad(params["b1"], ((0, 0), (0, Fp - F))).astype(jnp.bfloat16),
        "w2": jnp.pad(params["w2"], ((0, Fp - F), (0, Hp - H))).astype(jnp.bfloat16),
        "b2": jnp.pad(params["b2"], ((0, 0), (0, Hp - H))).astype(jnp.bfloat16),
        "w3": jnp.pad(params["w3"], ((0, Hp - H), (0, Op - O))).astype(jnp.bfloat16),
        "b3": jnp.pad(params["b3"], ((0, 0), (0, Op - O)),
                      constant_values=_NEG_MASK).astype(jnp.float32),
    }


@functools.partial(jax.jit, static_argnames=("out_features", "tb"))
def finetuned_clip_forward(x, prepared, *, out_features, tb=128):
    """x: (B, input_size) f32.  prepared: output of prepare_params (padded bf16)."""
    B, F = x.shape
    Fp = prepared["w1"].shape[0]
    Hp = prepared["w2"].shape[1]
    Op = prepared["w3"].shape[1]

    # bf16 sublanes pack 16 rows/vreg -> round batch tile to a multiple of 16.
    TB = min(tb, _round_up(B, 16))
    Bp = _round_up(B, TB)

    # Only the activation is padded/cast per call (weights were prepared once).
    x_p = jnp.pad(x, ((0, Bp - B), (0, Fp - F))).astype(jnp.bfloat16)

    grid = (Bp // TB,)
    const = lambda shape: pl.BlockSpec(shape, lambda i: (0,) * len(shape))

    cost = pl.CostEstimate(
        flops=2 * Bp * (Fp * Fp + Fp * Hp + Hp * Op),
        transcendentals=Bp * Op,
        bytes_accessed=(Bp * Fp * 2 + Bp * Op * 4
                        + (Fp * Fp + Fp * Hp + Hp * Op) * 2
                        + (Fp + Hp) * 2 + Op * 4),
    )

    out_p = pl.pallas_call(
        mlp_softmax_kernel,
        out_shape=jax.ShapeDtypeStruct((Bp, Op), jnp.float32),
        grid=grid,
        in_specs=[
            pl.BlockSpec((TB, Fp), lambda i: (i, 0)),   # x: tiled over batch
            const((Fp, Fp)),                            # w1 (in, out), VMEM-resident
            const((1, Fp)),                             # b1 (bf16)
            const((Fp, Hp)),                            # w2
            const((1, Hp)),                             # b2 (bf16)
            const((Hp, Op)),                            # w3
            const((1, Op)),                             # b3 (f32, padded cols = -1e30)
        ],
        out_specs=pl.BlockSpec((TB, Op), lambda i: (i, 0)),
        compiler_params=pltpu.CompilerParams(
            dimension_semantics=("parallel",),   # batch axis shardable across cores
            vmem_limit_bytes=32 * 1024 * 1024,   # ~6 MiB footprint; safe on v5e-v7x
        ),
        cost_estimate=cost,
    )(x_p, prepared["w1"], prepared["b1"], prepared["w2"], prepared["b2"],
      prepared["w3"], prepared["b3"])

    return out_p[:B, :out_features]


def init_params(key, input_size, hidden_size, output_size):
    """PyTorch Linear stores weight as (out, in); here we build the transposed
    (in, out) layout the kernel consumes, with torch-style uniform init."""
    k1, k2, k3, k4, k5, k6 = jax.random.split(key, 6)
    s1 = 1.0 / jnp.sqrt(input_size)
    s2 = 1.0 / jnp.sqrt(input_size)
    s3 = 1.0 / jnp.sqrt(hidden_size)
    return {
        "w1": jax.random.uniform(k1, (input_size, input_size), jnp.float32, -s1, s1),
        "b1": jax.random.uniform(k2, (1, input_size), jnp.float32, -s1, s1),
        "w2": jax.random.uniform(k3, (input_size, hidden_size), jnp.float32, -s2, s2),
        "b2": jax.random.uniform(k4, (1, hidden_size), jnp.float32, -s2, s2),
        "w3": jax.random.uniform(k5, (hidden_size, output_size), jnp.float32, -s3, s3),
        "b3": jax.random.uniform(k6, (1, output_size), jnp.float32, -s3, s3),
    }


def reference_forward(x, p):
    h1 = jnp.maximum(x @ p["w1"] + p["b1"], 0.0)
    h2 = jnp.maximum(h1 @ p["w2"] + p["b2"], 0.0)
    logits = h2 @ p["w3"] + p["b3"]
    return jax.nn.softmax(logits, axis=1)


if __name__ == "__main__":
    # Module-default feature dims (723/723/211) with a small batch for the smoke test.
    B, INPUT, HIDDEN, OUTPUT = 16, 723, 723, 211

    key = jax.random.PRNGKey(0)
    kx, kp = jax.random.split(key)
    x = jax.random.normal(kx, (B, INPUT), dtype=jnp.float32)
    params = init_params(kp, INPUT, HIDDEN, OUTPUT)

    prepared = prepare_params(params)          # one-time pad + bf16 cast
    out = finetuned_clip_forward(x, prepared, out_features=OUTPUT)
    out = jax.block_until_ready(out)

    ref = reference_forward(x, params)
    assert out.shape == (B, OUTPUT), out.shape
    # bf16 MXU inputs / bf16 bias+ReLU + approx reciprocal -> relaxed tolerance vs f32.
    max_err = float(jnp.max(jnp.abs(out - ref)))
    assert max_err < 1e-2, f"max abs error {max_err}"
    # Softmax rows sum to ~1 (padded columns correctly masked out of the denominator).
    assert jnp.allclose(jnp.sum(out, axis=1), jnp.ones((B,)), atol=1e-2)

    print("KERNEL_OK")
</pallas_src>

<mosaic_0001>
module attributes {stable_mosaic.version = 11 : i64} {
  func.func @mlp_softmax_kernel(%arg0: i32, %arg1: memref<16x768xbf16, #tpu.memory_space<vmem>>, %arg2: memref<768x768xbf16, #tpu.memory_space<vmem>>, %arg3: memref<1x768xbf16, #tpu.memory_space<vmem>>, %arg4: memref<768x768xbf16, #tpu.memory_space<vmem>>, %arg5: memref<1x768xbf16, #tpu.memory_space<vmem>>, %arg6: memref<768x256xbf16, #tpu.memory_space<vmem>>, %arg7: memref<1x256xf32, #tpu.memory_space<vmem>>, %arg8: memref<16x256xf32, #tpu.memory_space<vmem>>) attributes {dimension_semantics = [#tpu.dimension_semantics<parallel>], iteration_bounds = array<i64: 1>, scalar_prefetch = 0 : i64, scratch_operands = 0 : i64, tpu.core_type = #tpu.core_type<tc>, window_params = [{transform_indices = @transform_0, window_bounds = array<i64: 16, 768>}, {pipeline_mode = #tpu.pipeline_mode<synchronous>, transform_indices = @transform_1, window_bounds = array<i64: 768, 768>}, {pipeline_mode = #tpu.pipeline_mode<synchronous>, transform_indices = @transform_2, window_bounds = array<i64: 1, 768>}, {pipeline_mode = #tpu.pipeline_mode<synchronous>, transform_indices = @transform_3, window_bounds = array<i64: 768, 768>}, {pipeline_mode = #tpu.pipeline_mode<synchronous>, transform_indices = @transform_4, window_bounds = array<i64: 1, 768>}, {pipeline_mode = #tpu.pipeline_mode<synchronous>, transform_indices = @transform_5, window_bounds = array<i64: 768, 256>}, {pipeline_mode = #tpu.pipeline_mode<synchronous>, transform_indices = @transform_6, window_bounds = array<i64: 1, 256>}, {transform_indices = @transform_7, window_bounds = array<i64: 16, 256>}]} {
    %c0 = arith.constant 0 : index
    %c0_0 = arith.constant 0 : index
    %0 = vector.load %arg1[%c0, %c0_0] : memref<16x768xbf16, #tpu.memory_space<vmem>>, vector<16x768xbf16>
    %c0_1 = arith.constant 0 : index
    %c0_2 = arith.constant 0 : index
    %1 = vector.load %arg2[%c0_1, %c0_2] : memref<768x768xbf16, #tpu.memory_space<vmem>>, vector<768x768xbf16>
    %cst = arith.constant dense<0.000000e+00> : vector<16x768xf32>
    %2 = tpu.matmul %0, %1, %cst {dimension_numbers = #tpu.dot_dimension_numbers<[1], [0], [0], [1], [0, 0, 1, 1], [], []>} : vector<16x768xbf16>, vector<768x768xbf16>, vector<16x768xf32> -> vector<16x768xf32>
    %3 = arith.truncf %2 : vector<16x768xf32> to vector<16x768xbf16>
    %c0_3 = arith.constant 0 : index
    %c0_4 = arith.constant 0 : index
    %4 = vector.load %arg3[%c0_3, %c0_4] : memref<1x768xbf16, #tpu.memory_space<vmem>>, vector<1x768xbf16>
    %5 = vector.broadcast %4 : vector<1x768xbf16> to vector<16x768xbf16>
    %6 = arith.addf %3, %5 : vector<16x768xbf16>
    %cst_5 = arith.constant 0.000000e+00 : bf16
    %7 = vector.broadcast %cst_5 : bf16 to vector<16x768xbf16>
    %8 = arith.maximumf %6, %7 : vector<16x768xbf16>
    %c0_6 = arith.constant 0 : index
    %c0_7 = arith.constant 0 : index
    %9 = vector.load %arg4[%c0_6, %c0_7] : memref<768x768xbf16, #tpu.memory_space<vmem>>, vector<768x768xbf16>
    %cst_8 = arith.constant dense<0.000000e+00> : vector<16x768xf32>
    %10 = tpu.matmul %8, %9, %cst_8 {dimension_numbers = #tpu.dot_dimension_numbers<[1], [0], [0], [1], [0, 0, 1, 1], [], []>} : vector<16x768xbf16>, vector<768x768xbf16>, vector<16x768xf32> -> vector<16x768xf32>
    %11 = arith.truncf %10 : vector<16x768xf32> to vector<16x768xbf16>
    %c0_9 = arith.constant 0 : index
    %c0_10 = arith.constant 0 : index
    %12 = vector.load %arg5[%c0_9, %c0_10] : memref<1x768xbf16, #tpu.memory_space<vmem>>, vector<1x768xbf16>
    %13 = vector.broadcast %12 : vector<1x768xbf16> to vector<16x768xbf16>
    %14 = arith.addf %11, %13 : vector<16x768xbf16>
    %cst_11 = arith.constant 0.000000e+00 : bf16
    %15 = vector.broadcast %cst_11 : bf16 to vector<16x768xbf16>
    %16 = arith.maximumf %14, %15 : vector<16x768xbf16>
    %c0_12 = arith.constant 0 : index
    %c0_13 = arith.constant 0 : index
    %17 = vector.load %arg6[%c0_12, %c0_13] : memref<768x256xbf16, #tpu.memory_space<vmem>>, vector<768x256xbf16>
    %cst_14 = arith.constant dense<0.000000e+00> : vector<16x256xf32>
    %18 = tpu.matmul %16, %17, %cst_14 {dimension_numbers = #tpu.dot_dimension_numbers<[1], [0], [0], [1], [0, 0, 1, 1], [], []>} : vector<16x768xbf16>, vector<768x256xbf16>, vector<16x256xf32> -> vector<16x256xf32>
    %c0_15 = arith.constant 0 : index
    %c0_16 = arith.constant 0 : index
    %19 = vector.load %arg7[%c0_15, %c0_16] : memref<1x256xf32, #tpu.memory_space<vmem>>, vector<1x256xf32>
    %20 = vector.broadcast %19 : vector<1x256xf32> to vector<16x256xf32>
    %21 = arith.addf %18, %20 : vector<16x256xf32>
    %cst_17 = arith.constant dense<0xFF800000> : vector<16xf32>
    %22 = vector.multi_reduction <maximumf>, %21, %cst_17 [1] : vector<16x256xf32> to vector<16xf32>
    %23 = vector.shape_cast %22 : vector<16xf32> to vector<16x1xf32>
    %24 = vector.broadcast %23 : vector<16x1xf32> to vector<16x256xf32>
    %25 = arith.subf %21, %24 : vector<16x256xf32>
    %26 = math.exp %25 : vector<16x256xf32>
    %cst_18 = arith.constant dense<0.000000e+00> : vector<16xf32>
    %27 = vector.multi_reduction <add>, %26, %cst_18 [1] : vector<16x256xf32> to vector<16xf32>
    %28 = vector.shape_cast %27 : vector<16xf32> to vector<16x1xf32>
    %29 = tpu.reciprocal %28 {approx = true} : vector<16x1xf32> -> vector<16x1xf32>
    %30 = vector.broadcast %29 : vector<16x1xf32> to vector<16x256xf32>
    %31 = arith.mulf %26, %30 : vector<16x256xf32>
    %c0_19 = arith.constant 0 : index
    %c0_20 = arith.constant 0 : index
    %32 = vector.load %arg8[%c0_19, %c0_20] : memref<16x256xf32, #tpu.memory_space<vmem>>, vector<16x256xf32>
    tpu.vector_store %arg8[%c0_19, %c0_20], %31 {strides = array<i32>} : memref<16x256xf32, #tpu.memory_space<vmem>>, vector<16x256xf32>,
    return
  }
  func.func @transform_0(%arg0: i32) -> (i32, i32) {
    %c0_i32 = arith.constant 0 : i32
    %c0_i32_0 = arith.constant 0 : i32
    return %arg0, %c0_i32 : i32, i32
  }
  func.func @transform_1(%arg0: i32) -> (i32, i32) {
    %c0_i32 = arith.constant 0 : i32
    %c0_i32_0 = arith.constant 0 : i32
    %c0_i32_1 = arith.constant 0 : i32
    return %c0_i32, %c0_i32_0 : i32, i32
  }
  func.func @transform_2(%arg0: i32) -> (i32, i32) {
    %c0_i32 = arith.constant 0 : i32
    %c0_i32_0 = arith.constant 0 : i32
    %c0_i32_1 = arith.constant 0 : i32
    return %c0_i32, %c0_i32_0 : i32, i32
  }
  func.func @transform_3(%arg0: i32) -> (i32, i32) {
    %c0_i32 = arith.constant 0 : i32
    %c0_i32_0 = arith.constant 0 : i32
    %c0_i32_1 = arith.constant 0 : i32
    return %c0_i32, %c0_i32_0 : i32, i32
  }
  func.func @transform_4(%arg0: i32) -> (i32, i32) {
    %c0_i32 = arith.constant 0 : i32
    %c0_i32_0 = arith.constant 0 : i32
    %c0_i32_1 = arith.constant 0 : i32
    return %c0_i32, %c0_i32_0 : i32, i32
  }
  func.func @transform_5(%arg0: i32) -> (i32, i32) {
    %c0_i32 = arith.constant 0 : i32
    %c0_i32_0 = arith.constant 0 : i32
    %c0_i32_1 = arith.constant 0 : i32
    return %c0_i32, %c0_i32_0 : i32, i32
  }
  func.func @transform_6(%arg0: i32) -> (i32, i32) {
    %c0_i32 = arith.constant 0 : i32
    %c0_i32_0 = arith.constant 0 : i32
    %c0_i32_1 = arith.constant 0 : i32
    return %c0_i32, %c0_i32_0 : i32, i32
  }
  func.func @transform_7(%arg0: i32) -> (i32, i32) {
    %c0_i32 = arith.constant 0 : i32
    %c0_i32_0 = arith.constant 0 : i32
    return %arg0, %c0_i32 : i32, i32
  }
}

</mosaic_0001>

<bundles_post_ra>
// kernel: finetuned_clip_forward.1
= control target key start
LH: loop header
LB: loop body
LE: loop exit
PB: predicated region body
PF: predicated region fallthrough
CT: control target
= control target key end

     0   :  { %12 = vsyncpa [#allocation3], 0  ;;  %s7631_s0 = inlined_call_operand.vmem [shape: bf16[16,768], index: 0, kind: input, shape index: {}]   ;;  %s7632_s1 = inlined_call_operand.hbm [shape: bf16[768,768], index: 1, kind: input, shape index: {}]   ;;  %s7633_s2 = inlined_call_operand.hbm [shape: bf16[1,768], index: 2, kind: input, shape index: {}]   ;;  %s7634_s3 = inlined_call_operand.hbm [shape: bf16[768,768], index: 3, kind: input, shape index: {}]   ;;  %s7635_s4 = inlined_call_operand.hbm [shape: bf16[1,768], index: 4, kind: input, shape index: {}]   ;;  %s7636_s5 = inlined_call_operand.hbm [shape: bf16[768,256], index: 5, kind: input, shape index: {}]   ;;  %s7637_s6 = inlined_call_operand.hbm [shape: f32[1,256], index: 6, kind: input, shape index: {}]   ;;  %s7638_s7 = inlined_call_operand.hbm [shape: f32[16,256], index: 7, kind: output, shape index: {}]  }
   0x1   :  { %13 = vsyncpa [#allocation6], 0 }
   0x2   :  { %14 = vsyncpa [#allocation9], 0 }
   0x3   :  { %15 = vsyncpa [#allocation12], 0 }
   0x4   :  { %16 = vsyncpa [#allocation4], 0  ;;  %s7311_s24 = smov [#allocation5]   ;;  %s7312_s26 = smov [#allocation8]  }
   0x5   :  { %s37_s25 = sshll.u32 %s7311_s24, 4  ;;  %s59_s27 = sshll.u32 %s7312_s26, 4  ;;  %s38_s25 = int_to_ptr.vmem [resolvable:$true] %s37_s25  ;;  %s60_s27 = int_to_ptr.vmem [resolvable:$true] %s59_s27 }
   0x6   :  { %s7147_s30 = scalar_lea.hbm %s7633_s2, 96 }
   0x7   :  { %p7148_p0 = scmp.ne.s32.totalorder %s7633_s2, %s7147_s30  ;;  %p7151_p1 = scmp.lt.u32.totalorder %s7147_s30, %s7633_s2 }
   0x9   :  { %p7153_p2 = pnand %p7151_p1, %p7148_p0 }
   0xb   :  { %7156 = shalt.err (!%p7153_p2)
}
   0xc   :  { %s7157_s12 = scalar_lea.vmem %s38_s25, 96  ;;  %p7162_p4 = scmp.lt.s32.totalorder %s38_s25, %s38_s25 }
   0xd   :  { %p7158_p3 = scmp.ne.s32.totalorder %s38_s25, %s7157_s12  ;;  %p7163_p5 = scmp.lt.s32.totalorder %s7157_s12, %s7157_s12 }
   0xf   :  { %p7164_p6 = por %p7163_p5, %p7162_p4 }
  0x11   :  { %p7165_p7 = pnand %p7164_p6, %p7158_p3 }
  0x13   :  { %7168 = shalt.err (!%p7165_p7)
}
  0x14   :  { %40 = dma.hbm_to_vmem [thread:$0]  %s7633_s2, 96, %s38_s25, [#allocation6]  }
  0x15   :  { %s7169_s17 = scalar_lea.hbm %s7635_s4, 96 }
  0x16   :  { %p7170_p8 = scmp.ne.s32.totalorder %s7635_s4, %s7169_s17  ;;  %p7173_p9 = scmp.lt.u32.totalorder %s7169_s17, %s7635_s4 }
  0x18   :  { %p7175_p10 = pnand %p7173_p9, %p7170_p8 }
  0x1a   :  { %7178 = shalt.err (!%p7175_p10)
}
  0x1b   :  { %s7179_s22 = scalar_lea.vmem %s60_s27, 96  ;;  %p7184_p12 = scmp.lt.s32.totalorder %s60_s27, %s60_s27 }
  0x1c   :  { %p7180_p11 = scmp.ne.s32.totalorder %s60_s27, %s7179_s22  ;;  %p7185_p13 = scmp.lt.s32.totalorder %s7179_s22, %s7179_s22 }
  0x1e   :  { %p7186_p0 = por %p7185_p13, %p7184_p12 }
  0x20   :  { %p7187_p1 = pnand %p7186_p0, %p7180_p11 }
  0x22   :  { %7190 = shalt.err (!%p7187_p1)
}
  0x23   :  { %62 = dma.hbm_to_vmem [thread:$0]  %s7635_s4, 96, %s60_s27, [#allocation9]  }
  0x24   :  { %s7313_s24 = smov [#allocation2]   ;;  %s7191_s29 = scalar_lea.hbm %s7632_s1, 36864 }
  0x25   :  { %s24_s25 = sshll.u32 %s7313_s24, 4  ;;  %p7192_p2 = scmp.ne.s32.totalorder %s7632_s1, %s7191_s29  ;;  %s25_s25 = int_to_ptr.vmem [resolvable:$true] %s24_s25 }
  0x26   :  { %p7195_p3 = scmp.lt.u32.totalorder %s7191_s29, %s7632_s1 }
  0x28   :  { %p7197_p4 = pnand %p7195_p3, %p7192_p2 }
  0x2a   :  { %7200 = shalt.err (!%p7197_p4)
}
  0x2b   :  { %s7201_s11 = scalar_lea.vmem %s25_s25, 36864  ;;  %p7206_p6 = scmp.lt.s32.totalorder %s25_s25, %s25_s25 }
  0x2c   :  { %p7202_p5 = scmp.ne.s32.totalorder %s25_s25, %s7201_s11  ;;  %p7207_p7 = scmp.lt.s32.totalorder %s7201_s11, %s7201_s11 }
  0x2e   :  { %p7208_p8 = por %p7207_p7, %p7206_p6 }
  0x30   :  { %p7209_p9 = pnand %p7208_p8, %p7202_p5 }
  0x32   :  { %7212 = shalt.err (!%p7209_p9)
}
  0x33   :  { %s7314_s4 = smov 384   ;;  %s7315_s27 = smov 24  }
  0x34   :  { %30 = dma.hbm_to_vmem [thread:$0]  %s7632_s1, 36864, %s25_s25, [#allocation3], %s7314_s4, %s7314_s4, %s7315_s27  }
  0x35   :  { %s7316_s14 = smov [#allocation7]   ;;  %s7317_s16 = smov [#allocation10]  }
  0x36   :  { %s46_s15 = sshll.u32 %s7316_s14, 4  ;;  %s68_s17 = sshll.u32 %s7317_s16, 4  ;;  %s47_s15 = int_to_ptr.vmem [resolvable:$true] %s46_s15  ;;  %s69_s17 = int_to_ptr.vmem [resolvable:$true] %s68_s17 }
  0x37   :  { %s7213_s20 = scalar_lea.hbm %s7634_s3, 36864 }
  0x38   :  { %p7214_p10 = scmp.ne.s32.totalorder %s7634_s3, %s7213_s20  ;;  %p7217_p11 = scmp.lt.u32.totalorder %s7213_s20, %s7634_s3 }
  0x3a   :  { %p7219_p12 = pnand %p7217_p11, %p7214_p10 }
  0x3c   :  { %7222 = shalt.err (!%p7219_p12)
}
  0x3d   :  { %s7223_s1 = scalar_lea.vmem %s47_s15, 36864  ;;  %p7228_p0 = scmp.lt.s32.totalorder %s47_s15, %s47_s15 }
  0x3e   :  { %p7224_p13 = scmp.ne.s32.totalorder %s47_s15, %s7223_s1  ;;  %p7229_p1 = scmp.lt.s32.totalorder %s7223_s1, %s7223_s1 }
  0x40   :  { %p7230_p2 = por %p7229_p1, %p7228_p0 }
  0x42   :  { %p7231_p3 = pnand %p7230_p2, %p7224_p13 }
  0x44   :  { %7234 = shalt.err (!%p7231_p3)
}
  0x45   :  { %52 = dma.hbm_to_vmem [thread:$0]  %s7634_s3, 36864, %s47_s15, [#allocation6], %s7314_s4, %s7314_s4, %s7315_s27  }
  0x46   :  { %s7235_s29 = scalar_lea.hbm %s7636_s5, 12288 }
  0x47   :  { %p7236_p4 = scmp.ne.s32.totalorder %s7636_s5, %s7235_s29  ;;  %p7239_p5 = scmp.lt.u32.totalorder %s7235_s29, %s7636_s5 }
  0x49   :  { %p7241_p6 = pnand %p7239_p5, %p7236_p4 }
  0x4b   :  { %7244 = shalt.err (!%p7241_p6)
}
  0x4c   :  { %s7245_s11 = scalar_lea.vmem %s69_s17, 12288  ;;  %p7250_p8 = scmp.lt.s32.totalorder %s69_s17, %s69_s17 }
  0x4d   :  { %p7246_p7 = scmp.ne.s32.totalorder %s69_s17, %s7245_s11  ;;  %p7251_p9 = scmp.lt.s32.totalorder %s7245_s11, %s7245_s11 }
  0x4f   :  { %p7252_p10 = por %p7251_p9, %p7250_p8 }
  0x51   :  { %p7253_p11 = pnand %p7252_p10, %p7246_p7 }
  0x53   :  { %7256 = shalt.err (!%p7253_p11)
}
  0x54   :  { %s7318_s3 = smov 128   ;;  %s7319_s4 = smov 8  }
  0x55   :  { %74 = dma.hbm_to_vmem [thread:$0]  %s7636_s5, 12288, %s69_s17, [#allocation9], %s7318_s3, %s7318_s3, %s7319_s4  }
  0x56   :  { %s7320_s13 = smov [#allocation11]   ;;  %s7257_s18 = scalar_lea.hbm %s7637_s6, 32 }
  0x57   :  { %s81_s14 = sshll.u32 %s7320_s13, 4  ;;  %p7258_p12 = scmp.ne.s32.totalorder %s7637_s6, %s7257_s18  ;;  %s82_s14 = int_to_ptr.vmem [resolvable:$true] %s81_s14 }
  0x58   :  { %p7261_p13 = scmp.lt.u32.totalorder %s7257_s18, %s7637_s6 }
  0x5a   :  { %p7263_p0 = pnand %p7261_p13, %p7258_p12 }
  0x5c   :  { %7266 = shalt.err (!%p7263_p0)
}
  0x5d   :  { %s7267_s2 = scalar_lea.vmem %s82_s14, 32  ;;  %p7272_p2 = scmp.lt.s32.totalorder %s82_s14, %s82_s14 }
  0x5e   :  { %p7268_p1 = scmp.ne.s32.totalorder %s82_s14, %s7267_s2  ;;  %p7273_p3 = scmp.lt.s32.totalorder %s7267_s2, %s7267_s2 }
  0x60   :  { %p7274_p4 = por %p7273_p3, %p7272_p2 }
  0x62   :  { %p7275_p5 = pnand %p7274_p4, %p7268_p1 }
  0x64   :  { %7278 = shalt.err (!%p7275_p5)
}
  0x65   :  { %84 = dma.hbm_to_vmem [thread:$0]  %s7637_s6, 32, %s82_s14, [#allocation12]  }
  0x66   :  { %7301 = dma.done.wait [#allocation3], 36864  }
  0x67   :  { %7302 = vsyncadd [#allocation3], 4294930432 }
  0x68   :  { %7303 = dma.done.wait [#allocation6], 36960  }
  0x69   :  { %7304 = vsyncadd [#allocation6], 4294930336 }
  0x6a   :  { %7305 = dma.done.wait [#allocation9], 12384  }
  0x6b   :  { %7306 = vsyncadd [#allocation9], 4294954912 }
  0x6c   :  { %7307 = dma.done.wait [#allocation12], 32  }
  0x6d   :  { %7308 = vsyncadd [#allocation12], 4294967264  ;;  %v6112_v0 = vld [vmem:[#allocation2 + $0x4] ss:$24 sps:$4 sm:$0xff]   ;;  %v6116_v2 = vld [vmem:[#allocation2] ss:$24 sps:$4 sm:$0xff]  }
  0x6e   :  { %v6114_v1 = vld [vmem:[#allocation2 + $0x304] ss:$24 sps:$4 sm:$0xff]   ;;  %1868 = vmatprep.subr.bf16.mxu1 %v6112_v0  ;;  %v6117_v3 = vld [vmem:[#allocation2 + $0x300] ss:$24 sps:$4 sm:$0xff]   ;;  %v6118_v4 = vld [vmem:[#allocation2 + $0x34] ss:$24 sps:$4 sm:$0xff]  }
  0x6f   :  { %1911 = vmatprep.subr.bf16.mxu0 %v6114_v1  ;;  %1869 = vmatpush1.bf16.msra.mxu1 %v6116_v2  ;;  %v6120_v5 = vld [vmem:[#allocation2 + $0x334] ss:$24 sps:$4 sm:$0xff]   ;;  %v6122_v6 = vld [vmem:[#allocation2 + $0x30] ss:$24 sps:$4 sm:$0xff]   ;;  %v6124_v8 = vld [vmem:[#allocation2 + $0x64] ss:$24 sps:$4 sm:$0xff]  }
  0x70   :  { %1912 = vmatpush1.bf16.msra.mxu0 %v6117_v3  ;;  %1870 = vmatprep.subr.bf16.mxu1 %v6118_v4  ;;  %v6123_v7 = vld [vmem:[#allocation2 + $0x330] ss:$24 sps:$4 sm:$0xff]   ;;  %v6126_v9 = vld [vmem:[#allocation2 + $0x364] ss:$24 sps:$4 sm:$0xff]   ;;  %v6128_v10 = vld [vmem:[#allocation2 + $0x60] ss:$24 sps:$4 sm:$0xff]  }
  0x71   :  { %1913 = vmatprep.subr.bf16.mxu0 %v6120_v5  ;;  %v6129_v11 = vld [vmem:[#allocation2 + $0x360] ss:$24 sps:$4 sm:$0xff]   ;;  %v6130_v12 = vld [vmem:[#allocation2 + $0x94] ss:$24 sps:$4 sm:$0xff]   ;;  %v6134_v14 = vld [vmem:[#allocation2 + $0x90] ss:$24 sps:$4 sm:$0xff]  }
  0x72   :  { %v6132_v13 = vld [vmem:[#allocation2 + $0x394] ss:$24 sps:$4 sm:$0xff]   ;;  %v6135_v15 = vld [vmem:[#allocation2 + $0x390] ss:$24 sps:$4 sm:$0xff]   ;;  %v6136_v16 = vld [vmem:[#allocation2 + $0xc4] ss:$24 sps:$4 sm:$0xff]  }
  0x73   :  { %1871 = vmatpush1.bf16.msra.mxu1 %v6122_v6  ;;  %v6138_v17 = vld [vmem:[#allocation2 + $0x3c4] ss:$24 sps:$4 sm:$0xff]   ;;  %v6140_v18 = vld [vmem:[#allocation2 + $0xc0] ss:$24 sps:$4 sm:$0xff]   ;;  %v6142_v20 = vld [vmem:[#allocation2 + $0xf4] ss:$24 sps:$4 sm:$0xff]  }
  0x74   :  { %1914 = vmatpush1.bf16.msra.mxu0 %v6123_v7  ;;  %1872 = vmatprep.subr.bf16.mxu1 %v6124_v8  ;;  %v6141_v19 = vld [vmem:[#allocation2 + $0x3c0] ss:$24 sps:$4 sm:$0xff]   ;;  %v6144_v21 = vld [vmem:[#allocation2 + $0x3f4] ss:$24 sps:$4 sm:$0xff]   ;;  %v6146_v22 = vld [vmem:[#allocation2 + $0xf0] ss:$24 sps:$4 sm:$0xff]  }
  0x75   :  { %1915 = vmatprep.subr.bf16.mxu0 %v6126_v9  ;;  %v6147_v23 = vld [vmem:[#allocation2 + $0x3f0] ss:$24 sps:$4 sm:$0xff]   ;;  %v6148_v24 = vld [vmem:[#allocation2 + $0x124] ss:$24 sps:$4 sm:$0xff]   ;;  %v6152_v26 = vld [vmem:[#allocation2 + $0x120] ss:$24 sps:$4 sm:$0xff]  }
  0x76   :  { %v6150_v25 = vld [vmem:[#allocation2 + $0x424] ss:$24 sps:$4 sm:$0xff]   ;;  %v6153_v27 = vld [vmem:[#allocation2 + $0x420] ss:$24 sps:$4 sm:$0xff]   ;;  %v6154_v28 = vld [vmem:[#allocation2 + $0x154] ss:$24 sps:$4 sm:$0xff]  }
  0x77   :  { %1873 = vmatpush1.bf16.msra.mxu1 %v6128_v10  ;;  %v6156_v29 = vld [vmem:[#allocation2 + $0x454] ss:$24 sps:$4 sm:$0xff]   ;;  %v6158_v30 = vld [vmem:[#allocation2 + $0x150] ss:$24 sps:$4 sm:$0xff]   ;;  %v6160_v32 = vld [vmem:[#allocation2 + $0x184] ss:$24 sps:$4 sm:$0xff]  }
  0x78   :  { %1916 = vmatpush1.bf16.msra.mxu0 %v6129_v11  ;;  %1874 = vmatprep.subr.bf16.mxu1 %v6130_v12  ;;  %v6159_v31 = vld [vmem:[#allocation2 + $0x450] ss:$24 sps:$4 sm:$0xff]   ;;  %v6162_v33 = vld [vmem:[#allocation2 + $0x484] ss:$24 sps:$4 sm:$0xff]   ;;  %v6164_v34 = vld [vmem:[#allocation2 + $0x180] ss:$24 sps:$4 sm:$0xff]  }
  0x79   :  { %1917 = vmatprep.subr.bf16.mxu0 %v6132_v13  ;;  %v6165_v35 = vld [vmem:[#allocation2 + $0x480] ss:$24 sps:$4 sm:$0xff]   ;;  %v6166_v36 = vld [vmem:[#allocation2 + $0x1b4] ss:$24 sps:$4 sm:$0xff]   ;;  %v6170_v38 = vld [vmem:[#allocation2 + $0x1b0] ss:$24 sps:$4 sm:$0xff]  }
  0x7a   :  { %v6168_v37 = vld [vmem:[#allocation2 + $0x4b4] ss:$24 sps:$4 sm:$0xff]   ;;  %v6171_v39 = vld [vmem:[#allocation2 + $0x4b0] ss:$24 sps:$4 sm:$0xff]   ;;  %v6172_v40 = vld [vmem:[#allocation2 + $0x1e4] ss:$24 sps:$4 sm:$0xff]  }
  0x7b   :  { %1875 = vmatpush1.bf16.msra.mxu1 %v6134_v14  ;;  %v6174_v41 = vld [vmem:[#allocation2 + $0x4e4] ss:$24 sps:$4 sm:$0xff]   ;;  %v6176_v42 = vld [vmem:[#allocation2 + $0x1e0] ss:$24 sps:$4 sm:$0xff]   ;;  %v6178_v44 = vld [vmem:[#allocation2 + $0x214] ss:$24 sps:$4 sm:$0xff]  }
  0x7c   :  { %1918 = vmatpush1.bf16.msra.mxu0 %v6135_v15  ;;  %1876 = vmatprep.subr.bf16.mxu1 %v6136_v16  ;;  %v6177_v43 = vld [vmem:[#allocation2 + $0x4e0] ss:$24 sps:$4 sm:$0xff]   ;;  %v6180_v45 = vld [vmem:[#allocation2 + $0x514] ss:$24 sps:$4 sm:$0xff]   ;;  %v6182_v46 = vld [vmem:[#allocation2 + $0x210] ss:$24 sps:$4 sm:$0xff]  }
  0x7d   :  { %1919 = vmatprep.subr.bf16.mxu0 %v6138_v17  ;;  %v6183_v47 = vld [vmem:[#allocation2 + $0x510] ss:$24 sps:$4 sm:$0xff]   ;;  %v6184_v48 = vld [vmem:[#allocation2 + $0x244] ss:$24 sps:$4 sm:$0xff]   ;;  %v6188_v52 = vld [vmem:[#allocation2 + $0x240] ss:$24 sps:$4 sm:$0xff]  }
  0x7e   :  { %v7441_v49 = vld [vmem:[%s7631_s0 + $0x4] ss:$24 sps:$4 sm:$0xff]   ;;  %v6189_v53 = vld [vmem:[#allocation2 + $0x540] ss:$24 sps:$4 sm:$0xff]   ;;  %v6190_v54 = vld [vmem:[#allocation2 + $0x274] ss:$24 sps:$4 sm:$0xff]  }
  0x7f   :  { %1877 = vmatpush1.bf16.msra.mxu1 %v6140_v18  ;;  %v7446_v50 = vld [vmem:[%s7631_s0 + $0xc] ss:$24 sps:$4 sm:$0xff]   ;;  %1900 = vmatprep.mubr.bf16.mxu1 %v7441_v49  ;;  %v6194_v56 = vld [vmem:[#allocation2 + $0x270] ss:$24 sps:$4 sm:$0xff]   ;;  %v6200_v60 = vld [vmem:[#allocation2 + $0x2a0] ss:$24 sps:$4 sm:$0xff]  }
  0x80   :  { %1920 = vmatpush1.bf16.msra.mxu0 %v6141_v19  ;;  %1878 = vmatprep.subr.bf16.mxu1 %v6142_v20  ;;  %v6186_v51 = vld [vmem:[#allocation2 + $0x544] ss:$24 sps:$4 sm:$0xff]   ;;  %v6192_v55 = vld [vmem:[#allocation2 + $0x574] ss:$24 sps:$4 sm:$0xff]   ;;  %v6195_v57 = vld [vmem:[#allocation2 + $0x570] ss:$24 sps:$4 sm:$0xff]  }
  0x81   :  { %1921 = vmatprep.subr.bf16.mxu0 %v6144_v21  ;;  %1943 = vmatprep.mubr.bf16.mxu0 %v7446_v50  ;;  %v6196_v58 = vld [vmem:[#allocation2 + $0x2a4] ss:$24 sps:$4 sm:$0xff]   ;;  %v6201_v61 = vld [vmem:[#allocation2 + $0x5a0] ss:$24 sps:$4 sm:$0xff]   ;;  %v6202_v62 = vld [vmem:[#allocation2 + $0x2d4] ss:$24 sps:$4 sm:$0xff]  }
  0x82   :  { %v6198_v59 = vld [vmem:[#allocation2 + $0x5a4] ss:$24 sps:$4 sm:$0xff]   ;;  %v6204_v63 = vld [vmem:[#allocation2 + $0x5d4] ss:$24 sps:$4 sm:$0xff]   ;;  %v6206_v0 = vld [vmem:[#allocation2 + $0x2d0] ss:$24 sps:$4 sm:$0xff]  }
  0x83   :  { %1879 = vmatpush1.bf16.msra.mxu1 %v6146_v22  ;;  %v6207_v1 = vld [vmem:[#allocation2 + $0x5d0] ss:$24 sps:$4 sm:$0xff]   ;;  %v6215_v2 = vld [vmem:[#allocation2 + $0x604] ss:$24 sps:$4 sm:$0xff]   ;;  %v7453_v4 = vld [vmem:[%s7631_s0] ss:$24 sps:$4 sm:$0xff]  }
  0x84   :  { %1922 = vmatpush1.bf16.msra.mxu0 %v6147_v23  ;;  %1880 = vmatprep.subr.bf16.mxu1 %v6148_v24  ;;  %v6218_v3 = vld [vmem:[#allocation2 + $0xc] ss:$24 sps:$4 sm:$0xff]   ;;  %v6213_v5 = vld [vmem:[#allocation2 + $0x600] ss:$24 sps:$4 sm:$0xff]   ;;  %v6225_v9 = vld [vmem:[#allocation2 + $0x3c] ss:$24 sps:$4 sm:$0xff]  }
  0x85   :  { %1923 = vmatprep.subr.bf16.mxu0 %v6150_v25  ;;  %v6216_v6 = vld [vmem:[#allocation2 + $0x8] ss:$24 sps:$4 sm:$0xff]   ;;  %v6222_v8 = vld [vmem:[#allocation2 + $0x634] ss:$24 sps:$4 sm:$0xff]   ;;  %v6223_v11 = vld [vmem:[#allocation2 + $0x38] ss:$24 sps:$4 sm:$0xff]  }
  0x86   :  { %v7458_v7 = vld [vmem:[%s7631_s0 + $0x8] ss:$24 sps:$4 sm:$0xff]   ;;  %v6228_v12 = vld [vmem:[#allocation2 + $0x664] ss:$24 sps:$4 sm:$0xff]   ;;  %v6234_v16 = vld [vmem:[#allocation2 + $0x694] ss:$24 sps:$4 sm:$0xff]  }
  0x87   :  { %1881 = vmatpush1.bf16.msra.mxu1 %v6152_v26  ;;  %v6220_v10 = vld [vmem:[#allocation2 + $0x630] ss:$24 sps:$4 sm:$0xff]   ;;  %v6231_v13 = vld [vmem:[#allocation2 + $0x6c] ss:$24 sps:$4 sm:$0xff]   ;;  %v6226_v14 = vld [vmem:[#allocation2 + $0x660] ss:$24 sps:$4 sm:$0xff]  }
  0x88   :  { %1924 = vmatpush1.bf16.msra.mxu0 %v6153_v27  ;;  %1882 = vmatprep.subr.bf16.mxu1 %v6154_v28  ;;  %v6229_v15 = vld [vmem:[#allocation2 + $0x68] ss:$24 sps:$4 sm:$0xff]   ;;  %v6237_v17 = vld [vmem:[#allocation2 + $0x9c] ss:$24 sps:$4 sm:$0xff]   ;;  %v6235_v19 = vld [vmem:[#allocation2 + $0x98] ss:$24 sps:$4 sm:$0xff]  }
  0x89   :  { %1925 = vmatprep.subr.bf16.mxu0 %v6156_v29  ;;  %v6232_v18 = vld [vmem:[#allocation2 + $0x690] ss:$24 sps:$4 sm:$0xff]   ;;  %v6240_v20 = vld [vmem:[#allocation2 + $0x6c4] ss:$24 sps:$4 sm:$0xff]   ;;  %v6238_v22 = vld [vmem:[#allocation2 + $0x6c0] ss:$24 sps:$4 sm:$0xff]  }
  0x8a   :  { %v6243_v21 = vld [vmem:[#allocation2 + $0xcc] ss:$24 sps:$4 sm:$0xff]   ;;  %v6241_v23 = vld [vmem:[#allocation2 + $0xc8] ss:$24 sps:$4 sm:$0xff]   ;;  %v6249_v25 = vld [vmem:[#allocation2 + $0xfc] ss:$24 sps:$4 sm:$0xff]  }
  0x8b   :  { %1883 = vmatpush1.bf16.msra.mxu1 %v6158_v30  ;;  %v6246_v24 = vld [vmem:[#allocation2 + $0x6f4] ss:$24 sps:$4 sm:$0xff]   ;;  %v6244_v26 = vld [vmem:[#allocation2 + $0x6f0] ss:$24 sps:$4 sm:$0xff]   ;;  %v6252_v28 = vld [vmem:[#allocation2 + $0x724] ss:$24 sps:$4 sm:$0xff]  }
  0x8c   :  { %1926 = vmatpush1.bf16.msra.mxu0 %v6159_v31  ;;  %1884 = vmatprep.subr.bf16.mxu1 %v6160_v32  ;;  %v6247_v27 = vld [vmem:[#allocation2 + $0xf8] ss:$24 sps:$4 sm:$0xff]   ;;  %v6255_v29 = vld [vmem:[#allocation2 + $0x12c] ss:$24 sps:$4 sm:$0xff]   ;;  %v6253_v31 = vld [vmem:[#allocation2 + $0x128] ss:$24 sps:$4 sm:$0xff]  }
  0x8d   :  { %1927 = vmatprep.subr.bf16.mxu0 %v6162_v33  ;;  %v6250_v30 = vld [vmem:[#allocation2 + $0x720] ss:$24 sps:$4 sm:$0xff]   ;;  %v6258_v32 = vld [vmem:[#allocation2 + $0x754] ss:$24 sps:$4 sm:$0xff]  }
  0x8e   :  { %v6261_v33 = vld [vmem:[#allocation2 + $0x15c] ss:$24 sps:$4 sm:$0xff]  }
  0x8f   :  { %1885 = vmatpush1.bf16.msra.mxu1 %v6164_v34  ;;  %v7466_v34 = vld [vmem:[%s7631_s0 + $0x14] ss:$24 sps:$4 sm:$0xff]  }
  0x90   :  { %1928 = vmatpush1.bf16.msra.mxu0 %v6165_v35  ;;  %1886 = vmatprep.subr.bf16.mxu1 %v6166_v36  ;;  %v6256_v35 = vld [vmem:[#allocation2 + $0x750] ss:$24 sps:$4 sm:$0xff]  }
  0x91   :  { %1929 = vmatprep.subr.bf16.mxu0 %v6168_v37  ;;  %v6259_v36 = vld [vmem:[#allocation2 + $0x158] ss:$24 sps:$4 sm:$0xff]   ;;  %v6264_v37 = vld [vmem:[#allocation2 + $0x784] ss:$24 sps:$4 sm:$0xff]  }
  0x93   :  { %1887 = vmatpush1.bf16.msra.mxu1 %v6170_v38  ;;  %v6267_v38 = vld [vmem:[#allocation2 + $0x18c] ss:$24 sps:$4 sm:$0xff]  }
  0x94   :  { %1930 = vmatpush1.bf16.msra.mxu0 %v6171_v39  ;;  %1888 = vmatprep.subr.bf16.mxu1 %v6172_v40  ;;  %v6262_v39 = vld [vmem:[#allocation2 + $0x780] ss:$24 sps:$4 sm:$0xff]  }
  0x95   :  { %1931 = vmatprep.subr.bf16.mxu0 %v6174_v41  ;;  %v6265_v40 = vld [vmem:[#allocation2 + $0x188] ss:$24 sps:$4 sm:$0xff]   ;;  %v6270_v41 = vld [vmem:[#allocation2 + $0x7b4] ss:$24 sps:$4 sm:$0xff]  }
  0x97   :  { %1889 = vmatpush1.bf16.msra.mxu1 %v6176_v42  ;;  %v6273_v42 = vld [vmem:[#allocation2 + $0x1bc] ss:$24 sps:$4 sm:$0xff]  }
  0x98   :  { %1932 = vmatpush1.bf16.msra.mxu0 %v6177_v43  ;;  %1890 = vmatprep.subr.bf16.mxu1 %v6178_v44  ;;  %v6268_v43 = vld [vmem:[#allocation2 + $0x7b0] ss:$24 sps:$4 sm:$0xff]  }
  0x99   :  { %1933 = vmatprep.subr.bf16.mxu0 %v6180_v45  ;;  %v6271_v44 = vld [vmem:[#allocation2 + $0x1b8] ss:$24 sps:$4 sm:$0xff]   ;;  %v6276_v45 = vld [vmem:[#allocation2 + $0x7e4] ss:$24 sps:$4 sm:$0xff]  }
  0x9b   :  { %1891 = vmatpush1.bf16.msra.mxu1 %v6182_v46  ;;  %v6279_v46 = vld [vmem:[#allocation2 + $0x1ec] ss:$24 sps:$4 sm:$0xff]  }
  0x9c   :  { %1934 = vmatpush1.bf16.msra.mxu0 %v6183_v47  ;;  %1892 = vmatprep.subr.bf16.mxu1 %v6184_v48  ;;  %v6274_v47 = vld [vmem:[#allocation2 + $0x7e0] ss:$24 sps:$4 sm:$0xff]  }
  0x9d   :  { %1935 = vmatprep.subr.bf16.mxu0 %v6186_v51  ;;  %v6277_v48 = vld [vmem:[#allocation2 + $0x1e8] ss:$24 sps:$4 sm:$0xff]   ;;  %v6282_v51 = vld [vmem:[#allocation2 + $0x814] ss:$24 sps:$4 sm:$0xff]  }
  0x9f   :  { %1893 = vmatpush1.bf16.msra.mxu1 %v6188_v52  ;;  %v6285_v52 = vld [vmem:[#allocation2 + $0x21c] ss:$24 sps:$4 sm:$0xff]  }
  0xa0   :  { %1936 = vmatpush1.bf16.msra.mxu0 %v6189_v53  ;;  %1894 = vmatprep.subr.bf16.mxu1 %v6190_v54  ;;  %v6280_v53 = vld [vmem:[#allocation2 + $0x810] ss:$24 sps:$4 sm:$0xff]  }
  0xa1   :  { %1937 = vmatprep.subr.bf16.mxu0 %v6192_v55  ;;  %v6283_v54 = vld [vmem:[#allocation2 + $0x218] ss:$24 sps:$4 sm:$0xff]   ;;  %v6288_v55 = vld [vmem:[#allocation2 + $0x844] ss:$24 sps:$4 sm:$0xff]  }
  0xa3   :  { %1895 = vmatpush1.bf16.msra.mxu1 %v6194_v56  ;;  %v6291_v56 = vld [vmem:[#allocation2 + $0x24c] ss:$24 sps:$4 sm:$0xff]  }
  0xa4   :  { %1938 = vmatpush1.bf16.msra.mxu0 %v6195_v57  ;;  %1896 = vmatprep.subr.bf16.mxu1 %v6196_v58  ;;  %v6286_v57 = vld [vmem:[#allocation2 + $0x840] ss:$24 sps:$4 sm:$0xff]  }
  0xa5   :  { %1939 = vmatprep.subr.bf16.mxu0 %v6198_v59  ;;  %v6289_v58 = vld [vmem:[#allocation2 + $0x248] ss:$24 sps:$4 sm:$0xff]   ;;  %v6294_v59 = vld [vmem:[#allocation2 + $0x874] ss:$24 sps:$4 sm:$0xff]  }
  0xa7   :  { %1897 = vmatpush1.bf16.msra.mxu1 %v6200_v60  ;;  %v6297_v60 = vld [vmem:[#allocation2 + $0x27c] ss:$24 sps:$4 sm:$0xff]  }
  0xa8   :  { %1940 = vmatpush1.bf16.msra.mxu0 %v6201_v61  ;;  %1898 = vmatprep.subr.bf16.mxu1 %v6202_v62  ;;  %v6292_v61 = vld [vmem:[#allocation2 + $0x870] ss:$24 sps:$4 sm:$0xff]  }
  0xa9   :  { %1941 = vmatprep.subr.bf16.mxu0 %v6204_v63  ;;  %v6295_v62 = vld [vmem:[#allocation2 + $0x278] ss:$24 sps:$4 sm:$0xff]   ;;  %v6300_v63 = vld [vmem:[#allocation2 + $0x8a4] ss:$24 sps:$4 sm:$0xff]  }
  0xab   :  { %1899 = vmatpush1.bf16.msra.mxu1 %v6206_v0  ;;  %v6303_v0 = vld [vmem:[#allocation2 + $0x2ac] ss:$24 sps:$4 sm:$0xff]  }
  0xac   :  { %1942 = vmatpush1.bf16.msra.mxu0 %v6207_v1  ;;  %1997 = vmatprep.subr.bf16.mxu1 %v6218_v3  ;;  %v6298_v1 = vld [vmem:[#allocation2 + $0x8a0] ss:$24 sps:$4 sm:$0xff]   ;;  %v6306_v3 = vld [vmem:[#allocation2 + $0x8d4] ss:$24 sps:$4 sm:$0xff]  }
  0xad   :  { %1954 = vmatprep.subr.bf16.mxu0 %v6215_v2  ;;  %v6301_v2 = vld [vmem:[#allocation2 + $0x2a8] ss:$24 sps:$4 sm:$0xff]  }
  0xae   :  { %1901 = vmatmul.mubr.bf16.vlgmr.msra.gmra.mrb[0].mxu1 %v7453_v4 }
  0xaf   :  { %1944 = vmatmul.mubr.bf16.vlgmr.msra.gmra.mrb[0].mxu0 %v7458_v7  ;;  %1998 = vmatpush1.bf16.msra.mxu1 %v6216_v6  ;;  %v6304_v6 = vld [vmem:[#allocation2 + $0x8d0] ss:$24 sps:$4 sm:$0xff]  }
  0xb0   :  { %1955 = vmatpush1.bf16.msra.mxu0 %v6213_v5  ;;  %1999 = vmatprep.subr.bf16.mxu1 %v6225_v9  ;;  %v6309_v5 = vld [vmem:[#allocation2 + $0x2dc] ss:$24 sps:$4 sm:$0xff]   ;;  %v6315_v9 = vld [vmem:[#allocation2 + $0x30c] ss:$24 sps:$4 sm:$0xff]  }
  0xb1   :  { %1956 = vmatprep.subr.bf16.mxu0 %v6222_v8  ;;  %2029 = vmatprep.mubr.bf16.mxu1 %v7441_v49  ;;  %v6307_v8 = vld [vmem:[#allocation2 + $0x2d8] ss:$24 sps:$4 sm:$0xff]  }
  0xb2   :  { %1986 = vmatprep.mubr.bf16.mxu0 %v7466_v34 }
  0xb3   :  { %2000 = vmatpush1.bf16.msra.mxu1 %v6223_v11  ;;  %v7472_v11 = vld [vmem:[%s7631_s0 + $0x10] ss:$24 sps:$4 sm:$0xff]  }
  0xb4   :  { %1957 = vmatpush1.bf16.msra.mxu0 %v6220_v10  ;;  %2001 = vmatprep.subr.bf16.mxu1 %v6231_v13  ;;  %v6318_v10 = vld [vmem:[#allocation2 + $0x14] ss:$24 sps:$4 sm:$0xff]   ;;  %v6316_v13 = vld [vmem:[#allocation2 + $0x10] ss:$24 sps:$4 sm:$0xff]  }
  0xb5   :  { %1958 = vmatprep.subr.bf16.mxu0 %v6228_v12  ;;  %v6313_v12 = vld [vmem:[#allocation2 + $0x308] ss:$24 sps:$4 sm:$0xff]  }
  0xb7   :  { %2002 = vmatpush1.bf16.msra.mxu1 %v6229_v15  ;;  %v6324_v15 = vld [vmem:[#allocation2 + $0x44] ss:$24 sps:$4 sm:$0xff]  }
  0xb8   :  { %1959 = vmatpush1.bf16.msra.mxu0 %v6226_v14  ;;  %2003 = vmatprep.subr.bf16.mxu1 %v6237_v17  ;;  %v6321_v14 = vld [vmem:[#allocation2 + $0x33c] ss:$24 sps:$4 sm:$0xff]   ;;  %v6322_v17 = vld [vmem:[#allocation2 + $0x40] ss:$24 sps:$4 sm:$0xff]  }
  0xb9   :  { %1960 = vmatprep.subr.bf16.mxu0 %v6234_v16  ;;  %v6319_v16 = vld [vmem:[#allocation2 + $0x338] ss:$24 sps:$4 sm:$0xff]  }
  0xbb   :  { %2004 = vmatpush1.bf16.msra.mxu1 %v6235_v19  ;;  %v6330_v19 = vld [vmem:[#allocation2 + $0x74] ss:$24 sps:$4 sm:$0xff]  }
  0xbc   :  { %1961 = vmatpush1.bf16.msra.mxu0 %v6232_v18  ;;  %2005 = vmatprep.subr.bf16.mxu1 %v6243_v21  ;;  %v6327_v18 = vld [vmem:[#allocation2 + $0x36c] ss:$24 sps:$4 sm:$0xff]   ;;  %v6328_v21 = vld [vmem:[#allocation2 + $0x70] ss:$24 sps:$4 sm:$0xff]  }
  0xbd   :  { %1962 = vmatprep.subr.bf16.mxu0 %v6240_v20  ;;  %v6325_v20 = vld [vmem:[#allocation2 + $0x368] ss:$24 sps:$4 sm:$0xff]  }
  0xbf   :  { %2006 = vmatpush1.bf16.msra.mxu1 %v6241_v23  ;;  %v6336_v23 = vld [vmem:[#allocation2 + $0xa4] ss:$24 sps:$4 sm:$0xff]  }
  0xc0   :  { %1963 = vmatpush1.bf16.msra.mxu0 %v6238_v22  ;;  %2007 = vmatprep.subr.bf16.mxu1 %v6249_v25  ;;  %v6333_v22 = vld [vmem:[#allocation2 + $0x39c] ss:$24 sps:$4 sm:$0xff]   ;;  %v6334_v25 = vld [vmem:[#allocation2 + $0xa0] ss:$24 sps:$4 sm:$0xff]  }
  0xc1   :  { %1964 = vmatprep.subr.bf16.mxu0 %v6246_v24  ;;  %v6331_v24 = vld [vmem:[#allocation2 + $0x398] ss:$24 sps:$4 sm:$0xff]  }
  0xc3   :  { %2008 = vmatpush1.bf16.msra.mxu1 %v6247_v27  ;;  %v6342_v27 = vld [vmem:[#allocation2 + $0xd4] ss:$24 sps:$4 sm:$0xff]  }
  0xc4   :  { %1965 = vmatpush1.bf16.msra.mxu0 %v6244_v26  ;;  %2009 = vmatprep.subr.bf16.mxu1 %v6255_v29  ;;  %v6339_v26 = vld [vmem:[#allocation2 + $0x3cc] ss:$24 sps:$4 sm:$0xff]  }
  0xc5   :  { %1966 = vmatprep.subr.bf16.mxu0 %v6252_v28  ;;  %v6337_v28 = vld [vmem:[#allocation2 + $0x3c8] ss:$24 sps:$4 sm:$0xff]   ;;  %v6348_v29 = vld [vmem:[#allocation2 + $0x104] ss:$24 sps:$4 sm:$0xff]  }
  0xc7   :  { %2010 = vmatpush1.bf16.msra.mxu1 %v6253_v31  ;;  %v6346_v31 = vld [vmem:[#allocation2 + $0x100] ss:$24 sps:$4 sm:$0xff]  }
  0xc8   :  { %1967 = vmatpush1.bf16.msra.mxu0 %v6250_v30  ;;  %2011 = vmatprep.subr.bf16.mxu1 %v6261_v33  ;;  %v6343_v30 = vld [vmem:[#allocation2 + $0x3f8] ss:$24 sps:$4 sm:$0xff]   ;;  %v6354_v33 = vld [vmem:[#allocation2 + $0x134] ss:$24 sps:$4 sm:$0xff]  }
  0xc9   :  { %1968 = vmatprep.subr.bf16.mxu0 %v6258_v32  ;;  %v6351_v32 = vld [vmem:[#allocation2 + $0x42c] ss:$24 sps:$4 sm:$0xff]  }
  0xcb   :  { %2012 = vmatpush1.bf16.msra.mxu1 %v6259_v36  ;;  %v6352_v36 = vld [vmem:[#allocation2 + $0x130] ss:$24 sps:$4 sm:$0xff]  }
  0xcc   :  { %1969 = vmatpush1.bf16.msra.mxu0 %v6256_v35  ;;  %2013 = vmatprep.subr.bf16.mxu1 %v6267_v38  ;;  %v6349_v35 = vld [vmem:[#allocation2 + $0x428] ss:$24 sps:$4 sm:$0xff]   ;;  %v6360_v38 = vld [vmem:[#allocation2 + $0x164] ss:$24 sps:$4 sm:$0xff]  }
  0xcd   :  { %1970 = vmatprep.subr.bf16.mxu0 %v6264_v37  ;;  %v6357_v37 = vld [vmem:[#allocation2 + $0x45c] ss:$24 sps:$4 sm:$0xff]  }
  0xcf   :  { %2014 = vmatpush1.bf16.msra.mxu1 %v6265_v40  ;;  %v6358_v40 = vld [vmem:[#allocation2 + $0x160] ss:$24 sps:$4 sm:$0xff]  }
  0xd0   :  { %1971 = vmatpush1.bf16.msra.mxu0 %v6262_v39  ;;  %2015 = vmatprep.subr.bf16.mxu1 %v6273_v42  ;;  %v6355_v39 = vld [vmem:[#allocation2 + $0x458] ss:$24 sps:$4 sm:$0xff]   ;;  %v6366_v42 = vld [vmem:[#allocation2 + $0x194] ss:$24 sps:$4 sm:$0xff]  }
  0xd1   :  { %1972 = vmatprep.subr.bf16.mxu0 %v6270_v41  ;;  %v6363_v41 = vld [vmem:[#allocation2 + $0x48c] ss:$24 sps:$4 sm:$0xff]  }
  0xd3   :  { %2016 = vmatpush1.bf16.msra.mxu1 %v6271_v44  ;;  %v6364_v44 = vld [vmem:[#allocation2 + $0x190] ss:$24 sps:$4 sm:$0xff]  }
  0xd4   :  { %1973 = vmatpush1.bf16.msra.mxu0 %v6268_v43  ;;  %2017 = vmatprep.subr.bf16.mxu1 %v6279_v46  ;;  %v6361_v43 = vld [vmem:[#allocation2 + $0x488] ss:$24 sps:$4 sm:$0xff]   ;;  %v6372_v46 = vld [vmem:[#allocation2 + $0x1c4] ss:$24 sps:$4 sm:$0xff]  }
  0xd5   :  { %1974 = vmatprep.subr.bf16.mxu0 %v6276_v45  ;;  %v6369_v45 = vld [vmem:[#allocation2 + $0x4bc] ss:$24 sps:$4 sm:$0xff]  }
  0xd7   :  { %2018 = vmatpush1.bf16.msra.mxu1 %v6277_v48  ;;  %v6370_v48 = vld [vmem:[#allocation2 + $0x1c0] ss:$24 sps:$4 sm:$0xff]  }
  0xd8   :  { %1975 = vmatpush1.bf16.msra.mxu0 %v6274_v47  ;;  %2019 = vmatprep.subr.bf16.mxu1 %v6285_v52  ;;  %v6367_v47 = vld [vmem:[#allocation2 + $0x4b8] ss:$24 sps:$4 sm:$0xff]   ;;  %v6378_v52 = vld [vmem:[#allocation2 + $0x1f4] ss:$24 sps:$4 sm:$0xff]  }
  0xd9   :  { %1976 = vmatprep.subr.bf16.mxu0 %v6282_v51  ;;  %v6375_v51 = vld [vmem:[#allocation2 + $0x4ec] ss:$24 sps:$4 sm:$0xff]  }
  0xdb   :  { %2020 = vmatpush1.bf16.msra.mxu1 %v6283_v54  ;;  %v6376_v54 = vld [vmem:[#allocation2 + $0x1f0] ss:$24 sps:$4 sm:$0xff]  }
  0xdc   :  { %1977 = vmatpush1.bf16.msra.mxu0 %v6280_v53  ;;  %2021 = vmatprep.subr.bf16.mxu1 %v6291_v56  ;;  %v6373_v53 = vld [vmem:[#allocation2 + $0x4e8] ss:$24 sps:$4 sm:$0xff]   ;;  %v6384_v56 = vld [vmem:[#allocation2 + $0x224] ss:$24 sps:$4 sm:$0xff]  }
  0xdd   :  { %1978 = vmatprep.subr.bf16.mxu0 %v6288_v55  ;;  %v6381_v55 = vld [vmem:[#allocation2 + $0x51c] ss:$24 sps:$4 sm:$0xff]  }
  0xdf   :  { %2022 = vmatpush1.bf16.msra.mxu1 %v6289_v58  ;;  %v6382_v58 = vld [vmem:[#allocation2 + $0x220] ss:$24 sps:$4 sm:$0xff]  }
  0xe0   :  { %1979 = vmatpush1.bf16.msra.mxu0 %v6286_v57  ;;  %2023 = vmatprep.subr.bf16.mxu1 %v6297_v60  ;;  %v6379_v57 = vld [vmem:[#allocation2 + $0x518] ss:$24 sps:$4 sm:$0xff]   ;;  %v6390_v60 = vld [vmem:[#allocation2 + $0x254] ss:$24 sps:$4 sm:$0xff]  }
  0xe1   :  { %1980 = vmatprep.subr.bf16.mxu0 %v6294_v59  ;;  %v6387_v59 = vld [vmem:[#allocation2 + $0x54c] ss:$24 sps:$4 sm:$0xff]  }
  0xe3   :  { %2024 = vmatpush1.bf16.msra.mxu1 %v6295_v62  ;;  %v6388_v62 = vld [vmem:[#allocation2 + $0x250] ss:$24 sps:$4 sm:$0xff]  }
  0xe4   :  { %1981 = vmatpush1.bf16.msra.mxu0 %v6292_v61  ;;  %2025 = vmatprep.subr.bf16.mxu1 %v6303_v0  ;;  %v6385_v61 = vld [vmem:[#allocation2 + $0x548] ss:$24 sps:$4 sm:$0xff]   ;;  %v6396_v0 = vld [vmem:[#allocation2 + $0x284] ss:$24 sps:$4 sm:$0xff]  }
  0xe5   :  { %1982 = vmatprep.subr.bf16.mxu0 %v6300_v63  ;;  %v6393_v63 = vld [vmem:[#allocation2 + $0x57c] ss:$24 sps:$4 sm:$0xff]  }
  0xe7   :  { %2026 = vmatpush1.bf16.msra.mxu1 %v6301_v2  ;;  %v6394_v2 = vld [vmem:[#allocation2 + $0x280] ss:$24 sps:$4 sm:$0xff]  }
  0xe8   :  { %1983 = vmatpush1.bf16.msra.mxu0 %v6298_v1  ;;  %2027 = vmatprep.subr.bf16.mxu1 %v6309_v5  ;;  %v6391_v1 = vld [vmem:[#allocation2 + $0x578] ss:$24 sps:$4 sm:$0xff]   ;;  %v6402_v5 = vld [vmem:[#allocation2 + $0x2b4] ss:$24 sps:$4 sm:$0xff]  }
  0xe9   :  { %1984 = vmatprep.subr.bf16.mxu0 %v6306_v3  ;;  %v6399_v3 = vld [vmem:[#allocation2 + $0x5ac] ss:$24 sps:$4 sm:$0xff]  }
  0xeb   :  { %2028 = vmatpush1.bf16.msra.mxu1 %v6307_v8  ;;  %v6400_v8 = vld [vmem:[#allocation2 + $0x2b0] ss:$24 sps:$4 sm:$0xff]  }
  0xec   :  { %1985 = vmatpush1.bf16.msra.mxu0 %v6304_v6  ;;  %2040 = vmatprep.subr.bf16.mxu1 %v6315_v9  ;;  %v6397_v6 = vld [vmem:[#allocation2 + $0x5a8] ss:$24 sps:$4 sm:$0xff]   ;;  %v6405_v9 = vld [vmem:[#allocation2 + $0x5dc] ss:$24 sps:$4 sm:$0xff]  }
  0xed   :  { %2126 = vmatprep.subr.bf16.mxu0 %v6318_v10  ;;  %v6408_v10 = vld [vmem:[#allocation2 + $0x2e4] ss:$24 sps:$4 sm:$0xff]  }
  0xee   :  { %2030 = vmatmul.mubr.bf16.vlgmr.msra.gmra.mrb[4].mxu1 %v7453_v4 }
  0xef   :  { %1987 = vmatmul.mubr.bf16.vlgmr.msra.gmra.mrb[0].mxu0 %v7472_v11  ;;  %2041 = vmatpush1.bf16.msra.mxu1 %v6313_v12  ;;  %v6403_v12 = vld [vmem:[#allocation2 + $0x5d8] ss:$24 sps:$4 sm:$0xff]  }
  0xf0   :  { %2127 = vmatpush1.bf16.msra.mxu0 %v6316_v13  ;;  %2042 = vmatprep.subr.bf16.mxu1 %v6321_v14  ;;  %v6406_v13 = vld [vmem:[#allocation2 + $0x2e0] ss:$24 sps:$4 sm:$0xff]   ;;  %v6411_v14 = vld [vmem:[#allocation2 + $0x60c] ss:$24 sps:$4 sm:$0xff]  }
  0xf1   :  { %2128 = vmatprep.subr.bf16.mxu0 %v6324_v15  ;;  %2072 = vmatprep.mubr.bf16.mxu1 %v7446_v50  ;;  %v6340_v50 = vld [vmem:[#allocation2 + $0xd0] ss:$24 sps:$4 sm:$0xff]   ;;  %v6414_v15 = vld [vmem:[#allocation2 + $0x314] ss:$24 sps:$4 sm:$0xff]  }
  0xf2   :  { %2158 = vmatprep.mubr.bf16.mxu0 %v7441_v49  ;;  %v6345_v49 = vld [vmem:[#allocation2 + $0x3fc] ss:$24 sps:$4 sm:$0xff]  }
  0xf3   :  { %2043 = vmatpush1.bf16.msra.mxu1 %v6319_v16  ;;  %v6409_v16 = vld [vmem:[#allocation2 + $0x608] ss:$24 sps:$4 sm:$0xff]  }
  0xf4   :  { %2129 = vmatpush1.bf16.msra.mxu0 %v6322_v17  ;;  %2044 = vmatprep.subr.bf16.mxu1 %v6327_v18  ;;  %v6412_v17 = vld [vmem:[#allocation2 + $0x310] ss:$24 sps:$4 sm:$0xff]   ;;  %v6417_v18 = vld [vmem:[#allocation2 + $0x63c] ss:$24 sps:$4 sm:$0xff]  }
  0xf5   :  { %2130 = vmatprep.subr.bf16.mxu0 %v6330_v19  ;;  %v6420_v19 = vld [vmem:[#allocation2 + $0x344] ss:$24 sps:$4 sm:$0xff]  }
  0xf7   :  { %2045 = vmatpush1.bf16.msra.mxu1 %v6325_v20  ;;  %v6415_v20 = vld [vmem:[#allocation2 + $0x638] ss:$24 sps:$4 sm:$0xff]  }
  0xf8   :  { %2131 = vmatpush1.bf16.msra.mxu0 %v6328_v21  ;;  %2046 = vmatprep.subr.bf16.mxu1 %v6333_v22  ;;  %v6418_v21 = vld [vmem:[#allocation2 + $0x340] ss:$24 sps:$4 sm:$0xff]   ;;  %v6423_v22 = vld [vmem:[#allocation2 + $0x66c] ss:$24 sps:$4 sm:$0xff]  }
  0xf9   :  { %2132 = vmatprep.subr.bf16.mxu0 %v6336_v23  ;;  %v6426_v23 = vld [vmem:[#allocation2 + $0x374] ss:$24 sps:$4 sm:$0xff]  }
  0xfb   :  { %2047 = vmatpush1.bf16.msra.mxu1 %v6331_v24  ;;  %v7143_v24 = vld [vmem:[%s7631_s0 + $0xc] ss:$24 sps:$4 sm:$0xff]  }
  0xfc   :  { %2133 = vmatpush1.bf16.msra.mxu0 %v6334_v25  ;;  %2048 = vmatprep.subr.bf16.mxu1 %v6339_v26  ;;  %v6421_v25 = vld [vmem:[#allocation2 + $0x668] ss:$24 sps:$4 sm:$0xff]  }
  0xfd   :  { %2134 = vmatprep.subr.bf16.mxu0 %v6342_v27  ;;  %v6424_v26 = vld [vmem:[#allocation2 + $0x370] ss:$24 sps:$4 sm:$0xff]  }
  0xfe   :  { %v6427_v27 = vld [vmem:[#allocation2 + $0x698] ss:$24 sps:$4 sm:$0xff]  }
  0xff   :  { %2049 = vmatpush1.bf16.msra.mxu1 %v6337_v28  ;;  %v6430_v28 = vld [vmem:[#allocation2 + $0x3a0] ss:$24 sps:$4 sm:$0xff]  }
 0x100   :  { %2135 = vmatpush1.bf16.msra.mxu0 %v6340_v50  ;;  %2050 = vmatprep.subr.bf16.mxu1 %v6345_v49  ;;  %v6435_v50 = vld [vmem:[#allocation2 + $0x6cc] ss:$24 sps:$4 sm:$0xff]   ;;  %v6433_v49 = vld [vmem:[#allocation2 + $0x6c8] ss:$24 sps:$4 sm:$0xff]  }
 0x101   :  { %2136 = vmatprep.subr.bf16.mxu0 %v6348_v29  ;;  %v6436_v29 = vld [vmem:[#allocation2 + $0x3d0] ss:$24 sps:$4 sm:$0xff]  }
 0x103   :  { %2051 = vmatpush1.bf16.msra.mxu1 %v6343_v30  ;;  %v6441_v30 = vld [vmem:[#allocation2 + $0x6fc] ss:$24 sps:$4 sm:$0xff]  }
 0x104   :  { %2137 = vmatpush1.bf16.msra.mxu0 %v6346_v31  ;;  %2052 = vmatprep.subr.bf16.mxu1 %v6351_v32  ;;  %v6444_v31 = vld [vmem:[#allocation2 + $0x404] ss:$24 sps:$4 sm:$0xff]   ;;  %v6439_v32 = vld [vmem:[#allocation2 + $0x6f8] ss:$24 sps:$4 sm:$0xff]  }
 0x105   :  { %2138 = vmatprep.subr.bf16.mxu0 %v6354_v33  ;;  %v6442_v33 = vld [vmem:[#allocation2 + $0x400] ss:$24 sps:$4 sm:$0xff]  }
 0x107   :  { %2053 = vmatpush1.bf16.msra.mxu1 %v6349_v35  ;;  %v6447_v35 = vld [vmem:[#allocation2 + $0x72c] ss:$24 sps:$4 sm:$0xff]  }
 0x108   :  { %2139 = vmatpush1.bf16.msra.mxu0 %v6352_v36  ;;  %2054 = vmatprep.subr.bf16.mxu1 %v6357_v37  ;;  %v6450_v36 = vld [vmem:[#allocation2 + $0x434] ss:$24 sps:$4 sm:$0xff]   ;;  %v6445_v37 = vld [vmem:[#allocation2 + $0x728] ss:$24 sps:$4 sm:$0xff]  }
 0x109   :  { %2140 = vmatprep.subr.bf16.mxu0 %v6360_v38  ;;  %v6448_v38 = vld [vmem:[#allocation2 + $0x430] ss:$24 sps:$4 sm:$0xff]  }
 0x10b   :  { %2055 = vmatpush1.bf16.msra.mxu1 %v6355_v39  ;;  %v6453_v39 = vld [vmem:[#allocation2 + $0x75c] ss:$24 sps:$4 sm:$0xff]  }
 0x10c   :  { %2141 = vmatpush1.bf16.msra.mxu0 %v6358_v40  ;;  %2056 = vmatprep.subr.bf16.mxu1 %v6363_v41  ;;  %v6456_v40 = vld [vmem:[#allocation2 + $0x464] ss:$24 sps:$4 sm:$0xff]   ;;  %v6451_v41 = vld [vmem:[#allocation2 + $0x758] ss:$24 sps:$4 sm:$0xff]  }
 0x10d   :  { %2142 = vmatprep.subr.bf16.mxu0 %v6366_v42  ;;  %v6454_v42 = vld [vmem:[#allocation2 + $0x460] ss:$24 sps:$4 sm:$0xff]  }
 0x10f   :  { %2057 = vmatpush1.bf16.msra.mxu1 %v6361_v43  ;;  %v6459_v43 = vld [vmem:[#allocation2 + $0x78c] ss:$24 sps:$4 sm:$0xff]  }
 0x110   :  { %2143 = vmatpush1.bf16.msra.mxu0 %v6364_v44  ;;  %2058 = vmatprep.subr.bf16.mxu1 %v6369_v45  ;;  %v6462_v44 = vld [vmem:[#allocation2 + $0x494] ss:$24 sps:$4 sm:$0xff]   ;;  %v6457_v45 = vld [vmem:[#allocation2 + $0x788] ss:$24 sps:$4 sm:$0xff]  }
 0x111   :  { %2144 = vmatprep.subr.bf16.mxu0 %v6372_v46  ;;  %v6460_v46 = vld [vmem:[#allocation2 + $0x490] ss:$24 sps:$4 sm:$0xff]  }
 0x113   :  { %2059 = vmatpush1.bf16.msra.mxu1 %v6367_v47  ;;  %v6465_v47 = vld [vmem:[#allocation2 + $0x7bc] ss:$24 sps:$4 sm:$0xff]  }
 0x114   :  { %2145 = vmatpush1.bf16.msra.mxu0 %v6370_v48  ;;  %2060 = vmatprep.subr.bf16.mxu1 %v6375_v51  ;;  %v6468_v48 = vld [vmem:[#allocation2 + $0x4c4] ss:$24 sps:$4 sm:$0xff]   ;;  %v6463_v51 = vld [vmem:[#allocation2 + $0x7b8] ss:$24 sps:$4 sm:$0xff]  }
 0x115   :  { %2146 = vmatprep.subr.bf16.mxu0 %v6378_v52  ;;  %v6466_v52 = vld [vmem:[#allocation2 + $0x4c0] ss:$24 sps:$4 sm:$0xff]  }
 0x117   :  { %2061 = vmatpush1.bf16.msra.mxu1 %v6373_v53  ;;  %v6471_v53 = vld [vmem:[#allocation2 + $0x7ec] ss:$24 sps:$4 sm:$0xff]  }
 0x118   :  { %2147 = vmatpush1.bf16.msra.mxu0 %v6376_v54  ;;  %2062 = vmatprep.subr.bf16.mxu1 %v6381_v55  ;;  %v6474_v54 = vld [vmem:[#allocation2 + $0x4f4] ss:$24 sps:$4 sm:$0xff]   ;;  %v6469_v55 = vld [vmem:[#allocation2 + $0x7e8] ss:$24 sps:$4 sm:$0xff]  }
 0x119   :  { %2148 = vmatprep.subr.bf16.mxu0 %v6384_v56  ;;  %v6472_v56 = vld [vmem:[#allocation2 + $0x4f0] ss:$24 sps:$4 sm:$0xff]  }
 0x11b   :  { %2063 = vmatpush1.bf16.msra.mxu1 %v6379_v57  ;;  %v6477_v57 = vld [vmem:[#allocation2 + $0x81c] ss:$24 sps:$4 sm:$0xff]  }
 0x11c   :  { %2149 = vmatpush1.bf16.msra.mxu0 %v6382_v58  ;;  %2064 = vmatprep.subr.bf16.mxu1 %v6387_v59  ;;  %v6480_v58 = vld [vmem:[#allocation2 + $0x524] ss:$24 sps:$4 sm:$0xff]   ;;  %v6475_v59 = vld [vmem:[#allocation2 + $0x818] ss:$24 sps:$4 sm:$0xff]  }
 0x11d   :  { %2150 = vmatprep.subr.bf16.mxu0 %v6390_v60  ;;  %v6478_v60 = vld [vmem:[#allocation2 + $0x520] ss:$24 sps:$4 sm:$0xff]  }
 0x11f   :  { %2065 = vmatpush1.bf16.msra.mxu1 %v6385_v61  ;;  %v6483_v61 = vld [vmem:[#allocation2 + $0x84c] ss:$24 sps:$4 sm:$0xff]  }
 0x120   :  { %2151 = vmatpush1.bf16.msra.mxu0 %v6388_v62  ;;  %2066 = vmatprep.subr.bf16.mxu1 %v6393_v63  ;;  %v6486_v62 = vld [vmem:[#allocation2 + $0x554] ss:$24 sps:$4 sm:$0xff]   ;;  %v6481_v63 = vld [vmem:[#allocation2 + $0x848] ss:$24 sps:$4 sm:$0xff]  }
 0x121   :  { %2152 = vmatprep.subr.bf16.mxu0 %v6396_v0  ;;  %v6484_v0 = vld [vmem:[#allocation2 + $0x550] ss:$24 sps:$4 sm:$0xff]  }
 0x123   :  { %2067 = vmatpush1.bf16.msra.mxu1 %v6391_v1  ;;  %v6489_v1 = vld [vmem:[#allocation2 + $0x87c] ss:$24 sps:$4 sm:$0xff]  }
 0x124   :  { %2153 = vmatpush1.bf16.msra.mxu0 %v6394_v2  ;;  %2068 = vmatprep.subr.bf16.mxu1 %v6399_v3  ;;  %v6492_v2 = vld [vmem:[#allocation2 + $0x584] ss:$24 sps:$4 sm:$0xff]   ;;  %v6487_v3 = vld [vmem:[#allocation2 + $0x878] ss:$24 sps:$4 sm:$0xff]  }
 0x125   :  { %2154 = vmatprep.subr.bf16.mxu0 %v6402_v5  ;;  %v6490_v5 = vld [vmem:[#allocation2 + $0x580] ss:$24 sps:$4 sm:$0xff]  }
 0x127   :  { %2069 = vmatpush1.bf16.msra.mxu1 %v6397_v6  ;;  %v6495_v6 = vld [vmem:[#allocation2 + $0x8ac] ss:$24 sps:$4 sm:$0xff]  }
 0x128   :  { %2155 = vmatpush1.bf16.msra.mxu0 %v6400_v8  ;;  %2070 = vmatprep.subr.bf16.mxu1 %v6405_v9  ;;  %v6498_v8 = vld [vmem:[#allocation2 + $0x5b4] ss:$24 sps:$4 sm:$0xff]   ;;  %v6493_v9 = vld [vmem:[#allocation2 + $0x8a8] ss:$24 sps:$4 sm:$0xff]  }
 0x129   :  { %2156 = vmatprep.subr.bf16.mxu0 %v6408_v10  ;;  %v6496_v10 = vld [vmem:[#allocation2 + $0x5b0] ss:$24 sps:$4 sm:$0xff]  }
 0x12b   :  { %2071 = vmatpush1.bf16.msra.mxu1 %v6403_v12  ;;  %v6501_v12 = vld [vmem:[#allocation2 + $0x8dc] ss:$24 sps:$4 sm:$0xff]  }
 0x12c   :  { %2157 = vmatpush1.bf16.msra.mxu0 %v6406_v13  ;;  %2083 = vmatprep.subr.bf16.mxu1 %v6411_v14  ;;  %v6504_v13 = vld [vmem:[#allocation2 + $0x5e4] ss:$24 sps:$4 sm:$0xff]   ;;  %v6499_v14 = vld [vmem:[#allocation2 + $0x8d8] ss:$24 sps:$4 sm:$0xff]  }
 0x12d   :  { %2169 = vmatprep.subr.bf16.mxu0 %v6414_v15  ;;  %v6502_v15 = vld [vmem:[#allocation2 + $0x5e0] ss:$24 sps:$4 sm:$0xff]  }
 0x12e   :  { %2073 = vmatmul.mubr.bf16.vlgmr.msra.gmra.mrb[4].mxu1 %v7458_v7  ;;  %v6432_v7 = vld [vmem:[#allocation2 + $0x3a4] ss:$24 sps:$4 sm:$0xff]  }
 0x12f   :  { %2159 = vmatmul.mubr.bf16.vlgmr.msra.gmra.mrb[4].mxu0 %v7453_v4  ;;  %2084 = vmatpush1.bf16.msra.mxu1 %v6409_v16  ;;  %v6429_v4 = vld [vmem:[#allocation2 + $0x69c] ss:$24 sps:$4 sm:$0xff]  }
 0x130   :  { %2170 = vmatpush1.bf16.msra.mxu0 %v6412_v17  ;;  %2085 = vmatprep.subr.bf16.mxu1 %v6417_v18  ;;  %v6507_v16 = vld [vmem:[#allocation2 + $0x614] ss:$24 sps:$4 sm:$0xff]   ;;  %v6505_v18 = vld [vmem:[#allocation2 + $0x610] ss:$24 sps:$4 sm:$0xff]  }
 0x131   :  { %2171 = vmatprep.subr.bf16.mxu0 %v6420_v19  ;;  %2115 = vmatprep.mubr.bf16.mxu1 %v7466_v34  ;;  %v6438_v34 = vld [vmem:[#allocation2 + $0x3d4] ss:$24 sps:$4 sm:$0xff]   ;;  %v6532_v19 = vld [vmem:[#allocation7] ss:$24 sps:$4 sm:$0xff]  }
 0x132   :  { %2201 = vmatprep.mubr.bf16.mxu0 %v7143_v24  ;;  %v6534_v17 = vld [vmem:[#allocation7 + $0x4] ss:$24 sps:$4 sm:$0xff]   ;;  %v6538_v24 = vld [vmem:[#allocation7 + $0x30] ss:$24 sps:$4 sm:$0xff]  }
 0x133   :  { %2086 = vmatpush1.bf16.msra.mxu1 %v6415_v20  ;;  %v6510_v20 = vld [vmem:[#allocation2 + $0x644] ss:$24 sps:$4 sm:$0xff]  }
 0x134   :  { %2172 = vmatpush1.bf16.msra.mxu0 %v6418_v21  ;;  %2087 = vmatprep.subr.bf16.mxu1 %v6423_v22  ;;  %v6540_v21 = vld [vmem:[#allocation7 + $0x34] ss:$24 sps:$4 sm:$0xff]   ;;  %v7144_v22 = vld [vmem:[%s7631_s0 + $0x8] ss:$24 sps:$4 sm:$0xff]  }
 0x135   :  { %2173 = vmatprep.subr.bf16.mxu0 %v6426_v23  ;;  %v6508_v23 = vld [vmem:[#allocation2 + $0x640] ss:$24 sps:$4 sm:$0xff]  }
 0x137   :  { %2088 = vmatpush1.bf16.msra.mxu1 %v6421_v25  ;;  %v6513_v25 = vld [vmem:[#allocation2 + $0x674] ss:$24 sps:$4 sm:$0xff]  }
 0x138   :  { %2174 = vmatpush1.bf16.msra.mxu0 %v6424_v26  ;;  %2089 = vmatprep.subr.bf16.mxu1 %v6429_v4  ;;  %v6546_v26 = vld [vmem:[#allocation7 + $0x64] ss:$24 sps:$4 sm:$0xff]  }
 0x139   :  { %2175 = vmatprep.subr.bf16.mxu0 %v6432_v7  ;;  %v7145_v4 = vld [vmem:[%s7631_s0 + $0x14] ss:$24 sps:$4 sm:$0xff]   ;;  %v6516_v7 = vld [vmem:[#allocation2 + $0x6a4] ss:$24 sps:$4 sm:$0xff]  }
 0x13b   :  { %2090 = vmatpush1.bf16.msra.mxu1 %v6427_v27  ;;  %v6544_v27 = vld [vmem:[#allocation7 + $0x60] ss:$24 sps:$4 sm:$0xff]  }
 0x13c   :  { %2176 = vmatpush1.bf16.msra.mxu0 %v6430_v28  ;;  %2091 = vmatprep.subr.bf16.mxu1 %v6435_v50  ;;  %v6552_v28 = vld [vmem:[#allocation7 + $0x94] ss:$24 sps:$4 sm:$0xff]  }
 0x13d   :  { %2177 = vmatprep.subr.bf16.mxu0 %v6438_v34  ;;  %v6514_v50 = vld [vmem:[#allocation2 + $0x6a0] ss:$24 sps:$4 sm:$0xff]   ;;  %v6519_v34 = vld [vmem:[#allocation2 + $0x6d4] ss:$24 sps:$4 sm:$0xff]  }
 0x13f   :  { %2092 = vmatpush1.bf16.msra.mxu1 %v6433_v49  ;;  %v6550_v49 = vld [vmem:[#allocation7 + $0x90] ss:$24 sps:$4 sm:$0xff]  }
 0x140   :  { %2178 = vmatpush1.bf16.msra.mxu0 %v6436_v29  ;;  %2093 = vmatprep.subr.bf16.mxu1 %v6441_v30  ;;  %v6558_v29 = vld [vmem:[#allocation7 + $0xc4] ss:$24 sps:$4 sm:$0xff]  }
 0x141   :  { %2179 = vmatprep.subr.bf16.mxu0 %v6444_v31  ;;  %v6517_v30 = vld [vmem:[#allocation2 + $0x6d0] ss:$24 sps:$4 sm:$0xff]   ;;  %v6522_v31 = vld [vmem:[#allocation2 + $0x704] ss:$24 sps:$4 sm:$0xff]  }
 0x143   :  { %2094 = vmatpush1.bf16.msra.mxu1 %v6439_v32  ;;  %v6556_v32 = vld [vmem:[#allocation7 + $0xc0] ss:$24 sps:$4 sm:$0xff]  }
 0x144   :  { %2180 = vmatpush1.bf16.msra.mxu0 %v6442_v33  ;;  %2095 = vmatprep.subr.bf16.mxu1 %v6447_v35  ;;  %v6564_v33 = vld [vmem:[#allocation7 + $0xf4] ss:$24 sps:$4 sm:$0xff]  }
 0x145   :  { %2181 = vmatprep.subr.bf16.mxu0 %v6450_v36  ;;  %v6520_v35 = vld [vmem:[#allocation2 + $0x700] ss:$24 sps:$4 sm:$0xff]   ;;  %v6525_v36 = vld [vmem:[#allocation2 + $0x734] ss:$24 sps:$4 sm:$0xff]  }
 0x147   :  { %2096 = vmatpush1.bf16.msra.mxu1 %v6445_v37  ;;  %v6562_v37 = vld [vmem:[#allocation7 + $0xf0] ss:$24 sps:$4 sm:$0xff]  }
 0x148   :  { %2182 = vmatpush1.bf16.msra.mxu0 %v6448_v38  ;;  %2097 = vmatprep.subr.bf16.mxu1 %v6453_v39  ;;  %v6570_v38 = vld [vmem:[#allocation7 + $0x124] ss:$24 sps:$4 sm:$0xff]  }
 0x149   :  { %2183 = vmatprep.subr.bf16.mxu0 %v6456_v40 }
 0x14b   :  { %2098 = vmatpush1.bf16.msra.mxu1 %v6451_v41 }
 0x14c   :  { %2184 = vmatpush1.bf16.msra.mxu0 %v6454_v42  ;;  %2099 = vmatprep.subr.bf16.mxu1 %v6459_v43  ;;  %v6523_v42 = vld [vmem:[#allocation2 + $0x730] ss:$24 sps:$4 sm:$0xff]  }
 0x14d   :  { %2185 = vmatprep.subr.bf16.mxu0 %v6462_v44  ;;  %v6568_v43 = vld [vmem:[#allocation7 + $0x120] ss:$24 sps:$4 sm:$0xff]  }
 0x14f   :  { %2100 = vmatpush1.bf16.msra.mxu1 %v6457_v45  ;;  %v6528_v45 = vld [vmem:[#allocation2 + $0x764] ss:$24 sps:$4 sm:$0xff]  }
 0x150   :  { %2186 = vmatpush1.bf16.msra.mxu0 %v6460_v46  ;;  %2101 = vmatprep.subr.bf16.mxu1 %v6465_v47  ;;  %v6576_v46 = vld [vmem:[#allocation7 + $0x154] ss:$24 sps:$4 sm:$0xff]  }
 0x151   :  { %2187 = vmatprep.subr.bf16.mxu0 %v6468_v48  ;;  %v6526_v47 = vld [vmem:[#allocation2 + $0x760] ss:$24 sps:$4 sm:$0xff]   ;;  %v6531_v48 = vld [vmem:[#allocation2 + $0x794] ss:$24 sps:$4 sm:$0xff]  }
 0x153   :  { %2102 = vmatpush1.bf16.msra.mxu1 %v6463_v51  ;;  %v6574_v51 = vld [vmem:[#allocation7 + $0x150] ss:$24 sps:$4 sm:$0xff]  }
 0x154   :  { %2188 = vmatpush1.bf16.msra.mxu0 %v6466_v52  ;;  %2103 = vmatprep.subr.bf16.mxu1 %v6471_v53  ;;  %v6579_v52 = vld [vmem:[#allocation7 + $0x184] ss:$24 sps:$4 sm:$0xff]  }
 0x155   :  { %2189 = vmatprep.subr.bf16.mxu0 %v6474_v54  ;;  %v6529_v53 = vld [vmem:[#allocation2 + $0x790] ss:$24 sps:$4 sm:$0xff]   ;;  %v6537_v54 = vld [vmem:[#allocation2 + $0x7c4] ss:$24 sps:$4 sm:$0xff]  }
 0x157   :  { %2104 = vmatpush1.bf16.msra.mxu1 %v6469_v55  ;;  %v6577_v55 = vld [vmem:[#allocation7 + $0x180] ss:$24 sps:$4 sm:$0xff]  }
 0x158   :  { %2190 = vmatpush1.bf16.msra.mxu0 %v6472_v56  ;;  %2105 = vmatprep.subr.bf16.mxu1 %v6477_v57  ;;  %v6585_v56 = vld [vmem:[#allocation7 + $0x1b4] ss:$24 sps:$4 sm:$0xff]  }
 0x159   :  { %2191 = vmatprep.subr.bf16.mxu0 %v6480_v58  ;;  %v6535_v57 = vld [vmem:[#allocation2 + $0x7c0] ss:$24 sps:$4 sm:$0xff]   ;;  %v6543_v58 = vld [vmem:[#allocation2 + $0x7f4] ss:$24 sps:$4 sm:$0xff]  }
 0x15b   :  { %2106 = vmatpush1.bf16.msra.mxu1 %v6475_v59  ;;  %v6583_v59 = vld [vmem:[#allocation7 + $0x1b0] ss:$24 sps:$4 sm:$0xff]  }
 0x15c   :  { %2192 = vmatpush1.bf16.msra.mxu0 %v6478_v60  ;;  %2107 = vmatprep.subr.bf16.mxu1 %v6483_v61  ;;  %v6591_v60 = vld [vmem:[#allocation7 + $0x1e4] ss:$24 sps:$4 sm:$0xff]  }
 0x15d   :  { %2193 = vmatprep.subr.bf16.mxu0 %v6486_v62  ;;  %v6541_v61 = vld [vmem:[#allocation2 + $0x7f0] ss:$24 sps:$4 sm:$0xff]   ;;  %v6549_v62 = vld [vmem:[#allocation2 + $0x824] ss:$24 sps:$4 sm:$0xff]  }
 0x15f   :  { %2108 = vmatpush1.bf16.msra.mxu1 %v6481_v63  ;;  %v6589_v63 = vld [vmem:[#allocation7 + $0x1e0] ss:$24 sps:$4 sm:$0xff]  }
 0x160   :  { %2194 = vmatpush1.bf16.msra.mxu0 %v6484_v0  ;;  %2109 = vmatprep.subr.bf16.mxu1 %v6489_v1  ;;  %v6597_v0 = vld [vmem:[#allocation7 + $0x214] ss:$24 sps:$4 sm:$0xff]  }
 0x161   :  { %2195 = vmatprep.subr.bf16.mxu0 %v6492_v2  ;;  %v6547_v1 = vld [vmem:[#allocation2 + $0x820] ss:$24 sps:$4 sm:$0xff]   ;;  %v6555_v2 = vld [vmem:[#allocation2 + $0x854] ss:$24 sps:$4 sm:$0xff]  }
 0x163   :  { %2110 = vmatpush1.bf16.msra.mxu1 %v6487_v3  ;;  %v6595_v3 = vld [vmem:[#allocation7 + $0x210] ss:$24 sps:$4 sm:$0xff]  }
 0x164   :  { %2196 = vmatpush1.bf16.msra.mxu0 %v6490_v5  ;;  %2111 = vmatprep.subr.bf16.mxu1 %v6495_v6  ;;  %v6603_v5 = vld [vmem:[#allocation7 + $0x244] ss:$24 sps:$4 sm:$0xff]  }
 0x165   :  { %2197 = vmatprep.subr.bf16.mxu0 %v6498_v8  ;;  %v6553_v6 = vld [vmem:[#allocation2 + $0x850] ss:$24 sps:$4 sm:$0xff]   ;;  %v6561_v8 = vld [vmem:[#allocation2 + $0x884] ss:$24 sps:$4 sm:$0xff]  }
 0x167   :  { %2112 = vmatpush1.bf16.msra.mxu1 %v6493_v9  ;;  %v6601_v9 = vld [vmem:[#allocation7 + $0x240] ss:$24 sps:$4 sm:$0xff]  }
 0x168   :  { %2198 = vmatpush1.bf16.msra.mxu0 %v6496_v10  ;;  %2113 = vmatprep.subr.bf16.mxu1 %v6501_v12  ;;  %v6609_v10 = vld [vmem:[#allocation7 + $0x274] ss:$24 sps:$4 sm:$0xff]  }
 0x169   :  { %2199 = vmatprep.subr.bf16.mxu0 %v6504_v13  ;;  %v6559_v12 = vld [vmem:[#allocation2 + $0x880] ss:$24 sps:$4 sm:$0xff]   ;;  %v6567_v13 = vld [vmem:[#allocation2 + $0x8b4] ss:$24 sps:$4 sm:$0xff]  }
 0x16b   :  { %2114 = vmatpush1.bf16.msra.mxu1 %v6499_v14  ;;  %v6607_v14 = vld [vmem:[#allocation7 + $0x270] ss:$24 sps:$4 sm:$0xff]  }
 0x16c   :  { %2200 = vmatpush1.bf16.msra.mxu0 %v6502_v15  ;;  %4092 = vmatprep.subr.bf16.mxu1 %v6534_v17  ;;  %v6615_v15 = vld [vmem:[#allocation7 + $0x2a4] ss:$24 sps:$4 sm:$0xff]   ;;  %v6613_v17 = vld [vmem:[#allocation7 + $0x2a0] ss:$24 sps:$4 sm:$0xff]  }
 0x16d   :  { %2212 = vmatprep.subr.bf16.mxu0 %v6507_v16  ;;  %v6565_v16 = vld [vmem:[#allocation2 + $0x8b0] ss:$24 sps:$4 sm:$0xff]  }
 0x16e   :  { %2116 = vmatmul.mubr.bf16.vlgmr.msra.gmra.mrb[4].mxu1 %v7472_v11  ;;  %v6511_v11 = vld [vmem:[#allocation2 + $0x670] ss:$24 sps:$4 sm:$0xff]  }
 0x16f   :  { %2202 = vmatmul.mubr.bf16.vlgmr.msra.gmra.mrb[4].mxu0 %v7144_v22  ;;  %4093 = vmatpush1.bf16.msra.mxu1 %v6532_v19  ;;  %v6621_v19 = vld [vmem:[#allocation7 + $0x2d4] ss:$24 sps:$4 sm:$0xff]  }
 0x170   :  { %2213 = vmatpush1.bf16.msra.mxu0 %v6505_v18  ;;  %4094 = vmatprep.subr.bf16.mxu1 %v6540_v21  ;;  %v6573_v18 = vld [vmem:[#allocation2 + $0x8e4] ss:$24 sps:$4 sm:$0xff]   ;;  %v6619_v21 = vld [vmem:[#allocation7 + $0x2d0] ss:$24 sps:$4 sm:$0xff]   ;;  %v6582_v22 = vld [vmem:[#allocation7 + $0xc] ss:$24 sps:$4 sm:$0xff]  }
 0x171   :  { %2214 = vmatprep.subr.bf16.mxu0 %v6510_v20  ;;  %2244 = vmatprep.mubr.bf16.mxu0 %v7145_v4  ;;  %v6571_v20 = vld [vmem:[#allocation2 + $0x8e0] ss:$24 sps:$4 sm:$0xff]   ;;  %v2267_v4 = vlaneseq }
 0x173   :  { %4095 = vmatpush1.bf16.msra.mxu1 %v6538_v24  ;;  %v6580_v24 = vld [vmem:[#allocation7 + $0x8] ss:$24 sps:$4 sm:$0xff]  }
 0x174   :  { %2215 = vmatpush1.bf16.msra.mxu0 %v6508_v23  ;;  %4096 = vmatprep.subr.bf16.mxu1 %v6546_v26  ;;  %v6651_v23 = vld [vmem:[#allocation7 + $0x304] ss:$24 sps:$4 sm:$0xff]  }
 0x175   :  { %2216 = vmatprep.subr.bf16.mxu0 %v6513_v25  ;;  %v7321_v25 = vmov 1966171168  }
 0x176   :  { %v2265_v26 = vunpack.c.l.s4 %v7321_v25  ;;  %v6642_v25 = vld [vmem:[#allocation7 + $0x27c] ss:$24 sps:$4 sm:$0xff]  }
 0x177   :  { %4097 = vmatpush1.bf16.msra.mxu1 %v6544_v27 }
 0x178   :  { %2217 = vmatpush1.bf16.msra.mxu0 %v6511_v11  ;;  %4098 = vmatprep.subr.bf16.mxu1 %v6552_v28  ;;  %v6588_v11 = vld [vmem:[#allocation7 + $0x3c] ss:$24 sps:$4 sm:$0xff]   ;;  %v2266_v27 = vunpack.c.0.s8 %v2265_v26  ;;  %v7499_v28 = vshrl.u32 %v2267_v4, 7  ;;  %v6673_v26 = vld [vmem:[#allocation7 + $0x3c0] ss:$24 sps:$4 sm:$0xff]  }
 0x179   :  { %2218 = vmatprep.subr.bf16.mxu0 %v6516_v7  ;;  %v6586_v7 = vld [vmem:[#allocation7 + $0x38] ss:$24 sps:$4 sm:$0xff]   ;;  %v6681_v4 = vld [vmem:[#allocation7 + $0x3f4] ss:$24 sps:$4 sm:$0xff]  }
 0x17b   :  { %4099 = vmatpush1.bf16.msra.mxu1 %v6550_v49  ;;  %v7504_v49 = vld [vmem:[#allocation5] sm:$0x3f] }
 0x17c   :  { %2219 = vmatpush1.bf16.msra.mxu0 %v6514_v50  ;;  %4100 = vmatprep.subr.bf16.mxu1 %v6558_v29  ;;  %v7146_v50 = vld [vmem:[%s7631_s0 + $0x10] ss:$24 sps:$4 sm:$0xff]   ;;  %s7323_s0 = smov [#allocation13]  }
 0x17d   :  { %2220 = vmatprep.subr.bf16.mxu0 %v6519_v34  ;;  %v6594_v34 = vld [vmem:[#allocation7 + $0x6c] ss:$24 sps:$4 sm:$0xff]   ;;  %v6592_v29 = vld [vmem:[#allocation7 + $0x68] ss:$24 sps:$4 sm:$0xff]   ;;  %s5344_s16 = sshll.u32 %s7323_s0, 4  ;;  %s5345_s16 = int_to_ptr.vmem [resolvable:$true] %s5344_s16 }
 0x17e   :  { %s7279_s18 = scalar_lea.vmem %s5345_s16, 512  ;;  %p7284_p7 = scmp.lt.s32.totalorder %s5345_s16, %s5345_s16 }
 0x17f   :  { %4101 = vmatpush1.bf16.msra.mxu1 %v6556_v32  ;;  %v6598_v32 = vld [vmem:[#allocation7 + $0x98] ss:$24 sps:$4 sm:$0xff]   ;;  %p7280_p6 = scmp.ne.s32.totalorder %s5345_s16, %s7279_s18  ;;  %p7285_p8 = scmp.lt.s32.totalorder %s7279_s18, %s7279_s18 }
 0x180   :  { %2221 = vmatpush1.bf16.msra.mxu0 %v6517_v30  ;;  %4102 = vmatprep.subr.bf16.mxu1 %v6564_v33  ;;  %v7507_v30 = vsub.s32 %v2266_v27, %v7499_v28  ;;  %v6679_v27 = vld [vmem:[#allocation7 + $0x3f0] ss:$24 sps:$4 sm:$0xff]  }
 0x181   :  { %2222 = vmatprep.subr.bf16.mxu0 %v6522_v31  ;;  %v7491_v39 = vpop.f32.mrb[0].mxu1  ;;  %v6600_v31 = vld [vmem:[#allocation7 + $0x9c] ss:$24 sps:$4 sm:$0xff]   ;;  %p7286_p9 = por %p7285_p8, %p7284_p7 }
 0x182   :  { %v7493_v40 = vpop.f32.mrb[1].mxu1  ;;  %v2270_v33 = vrot.slane %v7504_v49, %v7507_v30 }
 0x183   :  { %v7495_v41 = vpop.f32.mrb[2].mxu1  ;;  %4103 = vmatpush1.bf16.msra.mxu1 %v6562_v37  ;;  %p7287_p10 = pnand %p7286_p9, %p7280_p6 }
 0x184   :  { %2223 = vmatpush1.bf16.msra.mxu0 %v6520_v35  ;;  %v7497_v44 = vpop.f32.mrb[3].mxu1  ;;  %4104 = vmatprep.subr.bf16.mxu1 %v6570_v38  ;;  %v6606_v35 = vld [vmem:[#allocation7 + $0xcc] ss:$24 sps:$4 sm:$0xff]   ;;  %v2278_v37 = vcombine.high %v2270_v33, %v2270_v33  ;;  %v6612_v38 = vld [vmem:[#allocation7 + $0xfc] ss:$24 sps:$4 sm:$0xff]  }
 0x185   :  { %2224 = vmatprep.subr.bf16.mxu0 %v6525_v36  ;;  %v6604_v36 = vld [vmem:[#allocation7 + $0xc8] ss:$24 sps:$4 sm:$0xff]  }
 0x187   :  { %4105 = vmatpush1.bf16.msra.mxu1 %v6568_v43  ;;  %v6610_v43 = vld [vmem:[#allocation7 + $0xf8] ss:$24 sps:$4 sm:$0xff]  }
 0x188   :  { %2225 = vmatpush1.bf16.msra.mxu0 %v6523_v42  ;;  %4106 = vmatprep.subr.bf16.mxu1 %v6576_v46  ;;  %v7512_v42 = vrot.slane %v2270_v33, %v7507_v30  ;;  %v6618_v46 = vld [vmem:[#allocation7 + $0x12c] ss:$24 sps:$4 sm:$0xff]   ;;  %v6646_v33 = vld [vmem:[#allocation7 + $0x2d8] ss:$24 sps:$4 sm:$0xff]  }
 0x189   :  { %2226 = vmatprep.subr.bf16.mxu0 %v6528_v45  ;;  %v7515_v45 = vrot.slane %v2278_v37, %v7507_v30  ;;  %v6699_v37 = vld [vmem:[#allocation7 + $0x484] ss:$24 sps:$4 sm:$0xff]  }
 0x18b   :  { %4107 = vmatpush1.bf16.msra.mxu1 %v6574_v51 }
 0x18c   :  { %2227 = vmatpush1.bf16.msra.mxu0 %v6526_v47  ;;  %4108 = vmatprep.subr.bf16.mxu1 %v6579_v52  ;;  %v2311_v47 = vpack.i.b16 %v7512_v42, %v7512_v42  ;;  %v2318_v52 = vpack.i.b16 %v7515_v45, %v7515_v45 }
 0x18d   :  { %2228 = vmatprep.subr.bf16.mxu0 %v6531_v48  ;;  %v7520_v48 = vsub.s32 0, %v7499_v28 }
 0x18f   :  { %4109 = vmatpush1.bf16.msra.mxu1 %v6577_v55  ;;  %v6616_v55 = vld [vmem:[#allocation7 + $0x128] ss:$24 sps:$4 sm:$0xff]  }
 0x190   :  { %2229 = vmatpush1.bf16.msra.mxu0 %v6529_v53  ;;  %4110 = vmatprep.subr.bf16.mxu1 %v6585_v56 }
 0x191   :  { %2230 = vmatprep.subr.bf16.mxu0 %v6537_v54 }
 0x193   :  { %4111 = vmatpush1.bf16.msra.mxu1 %v6583_v59 }
 0x194   :  { %2231 = vmatpush1.bf16.msra.mxu0 %v6535_v57  ;;  %4112 = vmatprep.subr.bf16.mxu1 %v6591_v60  ;;  %v2316_v60 = vrot.slane %v2311_v47, %v7520_v48  ;;  %v6705_v47 = vld [vmem:[#allocation7 + $0x4b4] ss:$24 sps:$4 sm:$0xff]  }
 0x195   :  { %2232 = vmatprep.subr.bf16.mxu0 %v6543_v58  ;;  %v6624_v58 = vld [vmem:[#allocation7 + $0x15c] ss:$24 sps:$4 sm:$0xff]  }
 0x197   :  { %4113 = vmatpush1.bf16.msra.mxu1 %v6589_v63  ;;  %v2323_v63 = vrot.slane %v2318_v52, %v7520_v48  ;;  %v6703_v52 = vld [vmem:[#allocation7 + $0x4b0] ss:$24 sps:$4 sm:$0xff]  }
 0x198   :  { %2233 = vmatpush1.bf16.msra.mxu0 %v6541_v61  ;;  %4114 = vmatprep.subr.bf16.mxu1 %v6597_v0 }
 0x199   :  { %2234 = vmatprep.subr.bf16.mxu0 %v6549_v62 }
 0x19b   :  { %4115 = vmatpush1.bf16.msra.mxu1 %v6595_v3 }
 0x19c   :  { %2235 = vmatpush1.bf16.msra.mxu0 %v6547_v1  ;;  %4116 = vmatprep.subr.bf16.mxu1 %v6603_v5  ;;  %v6622_v1 = vld [vmem:[#allocation7 + $0x158] ss:$24 sps:$4 sm:$0xff]   ;;  %v6625_v5 = vld [vmem:[#allocation7 + $0x188] ss:$24 sps:$4 sm:$0xff]  }
 0x19d   :  { %2236 = vmatprep.subr.bf16.mxu0 %v6555_v2  ;;  %v6627_v2 = vld [vmem:[#allocation7 + $0x18c] ss:$24 sps:$4 sm:$0xff]  }
 0x19f   :  { %4117 = vmatpush1.bf16.msra.mxu1 %v6601_v9  ;;  %v6649_v9 = vld [vmem:[#allocation7 + $0x300] ss:$24 sps:$4 sm:$0xff]  }
 0x1a0   :  { %2237 = vmatpush1.bf16.msra.mxu0 %v6553_v6  ;;  %4118 = vmatprep.subr.bf16.mxu1 %v6609_v10  ;;  %v6630_v6 = vld [vmem:[#allocation7 + $0x1bc] ss:$24 sps:$4 sm:$0xff]  }
 0x1a1   :  { %2238 = vmatprep.subr.bf16.mxu0 %v6561_v8  ;;  %v6657_v10 = vld [vmem:[#allocation7 + $0x334] ss:$24 sps:$4 sm:$0xff]  }
 0x1a3   :  { %4119 = vmatpush1.bf16.msra.mxu1 %v6607_v14  ;;  %v6655_v14 = vld [vmem:[#allocation7 + $0x330] ss:$24 sps:$4 sm:$0xff]  }
 0x1a4   :  { %2239 = vmatpush1.bf16.msra.mxu0 %v6559_v12  ;;  %4120 = vmatprep.subr.bf16.mxu1 %v6615_v15  ;;  %v6628_v12 = vld [vmem:[#allocation7 + $0x1b8] ss:$24 sps:$4 sm:$0xff]   ;;  %v6663_v15 = vld [vmem:[#allocation7 + $0x364] ss:$24 sps:$4 sm:$0xff]  }
 0x1a5   :  { %2240 = vmatprep.subr.bf16.mxu0 %v6567_v13  ;;  %v6633_v13 = vld [vmem:[#allocation7 + $0x1ec] ss:$24 sps:$4 sm:$0xff]  }
 0x1a7   :  { %4121 = vmatpush1.bf16.msra.mxu1 %v6613_v17  ;;  %v6636_v17 = vld [vmem:[#allocation7 + $0x21c] ss:$24 sps:$4 sm:$0xff]  }
 0x1a8   :  { %2241 = vmatpush1.bf16.msra.mxu0 %v6565_v16  ;;  %4122 = vmatprep.subr.bf16.mxu1 %v6621_v19  ;;  %v6631_v16 = vld [vmem:[#allocation7 + $0x1e8] ss:$24 sps:$4 sm:$0xff]   ;;  %v6669_v19 = vld [vmem:[#allocation7 + $0x394] ss:$24 sps:$4 sm:$0xff]  }
 0x1a9   :  { %2242 = vmatprep.subr.bf16.mxu0 %v6573_v18  ;;  %v6661_v18 = vld [vmem:[#allocation7 + $0x360] ss:$24 sps:$4 sm:$0xff]  }
 0x1ab   :  { %4123 = vmatpush1.bf16.msra.mxu1 %v6619_v21  ;;  %v6639_v21 = vld [vmem:[#allocation7 + $0x24c] ss:$24 sps:$4 sm:$0xff]  }
 0x1ac   :  { %2243 = vmatpush1.bf16.msra.mxu0 %v6571_v20  ;;  %4135 = vmatprep.subr.bf16.mxu1 %v6651_v23  ;;  %v6634_v20 = vld [vmem:[#allocation7 + $0x218] ss:$24 sps:$4 sm:$0xff]   ;;  %v6675_v23 = vld [vmem:[#allocation7 + $0x3c4] ss:$24 sps:$4 sm:$0xff]  }
 0x1ad   :  { %4221 = vmatprep.subr.bf16.mxu0 %v6582_v22  ;;  %v6667_v22 = vld [vmem:[#allocation7 + $0x390] ss:$24 sps:$4 sm:$0xff]  }
 0x1af   :  { %2245 = vmatmul.mubr.bf16.vlgmr.msra.gmra.mrb[4].mxu0 %v7146_v50  ;;  %v6687_v50 = vld [vmem:[#allocation7 + $0x424] ss:$24 sps:$4 sm:$0xff]  }
 0x1b0   :  { %4222 = vmatpush1.bf16.msra.mxu0 %v6580_v24  ;;  %v6637_v24 = vld [vmem:[#allocation7 + $0x248] ss:$24 sps:$4 sm:$0xff]  }
 0x1b1   :  { %4223 = vmatprep.subr.bf16.mxu0 %v6588_v11  ;;  %v6640_v11 = vld [vmem:[#allocation7 + $0x278] ss:$24 sps:$4 sm:$0xff]  }
 0x1b4   :  { %4224 = vmatpush1.bf16.msra.mxu0 %v6586_v7  ;;  %v6645_v7 = vld [vmem:[#allocation7 + $0x2ac] ss:$24 sps:$4 sm:$0xff]  }
 0x1b5   :  { %4225 = vmatprep.subr.bf16.mxu0 %v6594_v34  ;;  %v6643_v34 = vld [vmem:[#allocation7 + $0x2a8] ss:$24 sps:$4 sm:$0xff]  }
 0x1b8   :  { %4226 = vmatpush1.bf16.msra.mxu0 %v6592_v29  ;;  %v6685_v29 = vld [vmem:[#allocation7 + $0x420] ss:$24 sps:$4 sm:$0xff]  }
 0x1b9   :  { %4227 = vmatprep.subr.bf16.mxu0 %v6600_v31  ;;  %v6648_v31 = vld [vmem:[#allocation7 + $0x2dc] ss:$24 sps:$4 sm:$0xff]  }
 0x1bc   :  { %4228 = vmatpush1.bf16.msra.mxu0 %v6598_v32  ;;  %v6693_v32 = vld [vmem:[#allocation7 + $0x454] ss:$24 sps:$4 sm:$0xff]  }
 0x1bd   :  { %4229 = vmatprep.subr.bf16.mxu0 %v6606_v35  ;;  %v6691_v35 = vld [vmem:[#allocation7 + $0x450] ss:$24 sps:$4 sm:$0xff]  }
 0x1c0   :  { %4230 = vmatpush1.bf16.msra.mxu0 %v6604_v36  ;;  %v6654_v36 = vld [vmem:[#allocation7 + $0x30c] ss:$24 sps:$4 sm:$0xff]  }
 0x1c1   :  { %4231 = vmatprep.subr.bf16.mxu0 %v6612_v38  ;;  %v6652_v38 = vld [vmem:[#allocation7 + $0x308] ss:$24 sps:$4 sm:$0xff]  }
 0x1c2   :  { %v1988_v51 = vpop.f32.mrb[0].mxu0 }
 0x1c3   :  { %v6037_v53 = vadd.f32 %v1988_v51, %v7491_v39  ;;  %v1990_v54 = vpop.f32.mrb[1].mxu0  ;;  %v6658_v51 = vld [vmem:[#allocation7 + $0x338] ss:$24 sps:$4 sm:$0xff]  }
 0x1c4   :  { %v6038_v56 = vadd.f32 %v1990_v54, %v7493_v40  ;;  %v1992_v57 = vpop.f32.mrb[2].mxu0  ;;  %4232 = vmatpush1.bf16.msra.mxu0 %v6610_v43  ;;  %v6697_v43 = vld [vmem:[#allocation7 + $0x480] ss:$24 sps:$4 sm:$0xff]   ;;  %v6711_v54 = vld [vmem:[#allocation7 + $0x4e4] ss:$24 sps:$4 sm:$0xff]  }
 0x1c5   :  { %v6039_v59 = vadd.f32 %v1992_v57, %v7495_v41  ;;  %v1994_v61 = vpop.f32.mrb[3].mxu0  ;;  %4233 = vmatprep.subr.bf16.mxu0 %v6618_v46  ;;  %v7322_v41 = vmov 0   ;;  %v6660_v46 = vld [vmem:[#allocation7 + $0x33c] ss:$24 sps:$4 sm:$0xff]  }
 0x1c6   :  { %v6040_v62 = vadd.f32 %v1994_v61, %v7497_v44  ;;  %v6672_v57 = vld [vmem:[#allocation7 + $0x39c] ss:$24 sps:$4 sm:$0xff]   ;;  %v6678_v61 = vld [vmem:[#allocation7 + $0x3cc] ss:$24 sps:$4 sm:$0xff]  }
 0x1c7   :  { %v2255_v0 = vpack.c.bf16 %v6039_v59, %v6037_v53  ;;  %v6666_v53 = vld [vmem:[#allocation7 + $0x36c] ss:$24 sps:$4 sm:$0xff]   ;;  %v6670_v59 = vld [vmem:[#allocation7 + $0x398] ss:$24 sps:$4 sm:$0xff]  }
 0x1c8   :  { %v2256_v39 = vpack.c.bf16 %v6040_v62, %v6038_v56  ;;  %4234 = vmatpush1.bf16.msra.mxu0 %v6616_v55  ;;  %v6664_v55 = vld [vmem:[#allocation7 + $0x368] ss:$24 sps:$4 sm:$0xff]   ;;  %v6723_v62 = vld [vmem:[#allocation7 + $0x544] ss:$24 sps:$4 sm:$0xff]  }
 0x1c9   :  { %v2352_v3 = vadd.bf16 %v2316_v60, %v2255_v0  ;;  %4235 = vmatprep.subr.bf16.mxu0 %v6624_v58  ;;  %v6709_v56 = vld [vmem:[#allocation7 + $0x4e0] ss:$24 sps:$4 sm:$0xff]   ;;  %v6717_v58 = vld [vmem:[#allocation7 + $0x514] ss:$24 sps:$4 sm:$0xff]   ;;  %v6715_v60 = vld [vmem:[#allocation7 + $0x510] ss:$24 sps:$4 sm:$0xff]  }
 0x1ca   :  { %v2353_v40 = vadd.bf16 %v2323_v63, %v2256_v39  ;;  %v6676_v63 = vld [vmem:[#allocation7 + $0x3c8] ss:$24 sps:$4 sm:$0xff]   ;;  %v6729_v39 = vld [vmem:[#allocation7 + $0x574] ss:$24 sps:$4 sm:$0xff]  }
 0x1cb   :  { %v7534_v44 = vmax.bf16 %v7322_v41, %v2352_v3  ;;  %v6721_v0 = vld [vmem:[#allocation7 + $0x540] ss:$24 sps:$4 sm:$0xff]   ;;  %v6727_v3 = vld [vmem:[#allocation7 + $0x570] ss:$24 sps:$4 sm:$0xff]  }
 0x1cc   :  { %4236 = vmatpush1.bf16.msra.mxu0 %v6622_v1  ;;  %v7531_v8 = vmax.bf16 %v7322_v41, %v2353_v40  ;;  %v6684_v1 = vld [vmem:[#allocation7 + $0x3fc] ss:$24 sps:$4 sm:$0xff]   ;;  %v6690_v40 = vld [vmem:[#allocation7 + $0x42c] ss:$24 sps:$4 sm:$0xff]  }
 0x1cd   :  { %4237 = vmatprep.subr.bf16.mxu0 %v6627_v2  ;;  %v6682_v2 = vld [vmem:[#allocation7 + $0x3f8] ss:$24 sps:$4 sm:$0xff]  }
 0x1ce   :  { %4124 = vmatprep.mubr.bf16.mxu1 %v7531_v8  ;;  %4253 = vmatprep.mubr.bf16.mxu0 %v7531_v8 }
 0x1cf   :  { %4125 = vmatmul.mubr.bf16.vlgmr.msra.gmra.mrb[8].mxu1 %v7534_v44 }
 0x1d0   :  { %4238 = vmatpush1.bf16.msra.mxu0 %v6625_v5  ;;  %4136 = vmatpush1.bf16.msra.mxu1 %v6649_v9  ;;  %v6735_v5 = vld [vmem:[#allocation7 + $0x5a4] ss:$24 sps:$4 sm:$0xff]   ;;  %v6733_v9 = vld [vmem:[#allocation7 + $0x5a0] ss:$24 sps:$4 sm:$0xff]  }
 0x1d1   :  { %4239 = vmatprep.subr.bf16.mxu0 %v6630_v6  ;;  %4137 = vmatprep.subr.bf16.mxu1 %v6657_v10  ;;  %v6688_v6 = vld [vmem:[#allocation7 + $0x428] ss:$24 sps:$4 sm:$0xff]   ;;  %v6696_v10 = vld [vmem:[#allocation7 + $0x45c] ss:$24 sps:$4 sm:$0xff]  }
 0x1d4   :  { %4240 = vmatpush1.bf16.msra.mxu0 %v6628_v12  ;;  %4138 = vmatpush1.bf16.msra.mxu1 %v6655_v14  ;;  %v6741_v12 = vld [vmem:[#allocation7 + $0x5d4] ss:$24 sps:$4 sm:$0xff]   ;;  %v6739_v14 = vld [vmem:[#allocation7 + $0x5d0] ss:$24 sps:$4 sm:$0xff]  }
 0x1d5   :  { %4241 = vmatprep.subr.bf16.mxu0 %v6633_v13  ;;  %4139 = vmatprep.subr.bf16.mxu1 %v6663_v15  ;;  %v6694_v13 = vld [vmem:[#allocation7 + $0x458] ss:$24 sps:$4 sm:$0xff]   ;;  %v6702_v15 = vld [vmem:[#allocation7 + $0x48c] ss:$24 sps:$4 sm:$0xff]  }
 0x1d8   :  { %4242 = vmatpush1.bf16.msra.mxu0 %v6631_v16  ;;  %4140 = vmatpush1.bf16.msra.mxu1 %v6661_v18  ;;  %v6747_v16 = vld [vmem:[#allocation7 + $0x604] ss:$24 sps:$4 sm:$0xff]  }
 0x1d9   :  { %4243 = vmatprep.subr.bf16.mxu0 %v6636_v17  ;;  %4141 = vmatprep.subr.bf16.mxu1 %v6669_v19  ;;  %v6700_v17 = vld [vmem:[#allocation7 + $0x488] ss:$24 sps:$4 sm:$0xff]   ;;  %v6708_v18 = vld [vmem:[#allocation7 + $0x4bc] ss:$24 sps:$4 sm:$0xff]   ;;  %v6706_v19 = vld [vmem:[#allocation7 + $0x4b8] ss:$24 sps:$4 sm:$0xff]  }
 0x1dc   :  { %4244 = vmatpush1.bf16.msra.mxu0 %v6634_v20  ;;  %4142 = vmatpush1.bf16.msra.mxu1 %v6667_v22  ;;  %v6714_v20 = vld [vmem:[#allocation7 + $0x4ec] ss:$24 sps:$4 sm:$0xff]   ;;  %v6720_v22 = vld [vmem:[#allocation7 + $0x51c] ss:$24 sps:$4 sm:$0xff]  }
 0x1dd   :  { %4245 = vmatprep.subr.bf16.mxu0 %v6639_v21  ;;  %4143 = vmatprep.subr.bf16.mxu1 %v6675_v23  ;;  %v6712_v21 = vld [vmem:[#allocation7 + $0x4e8] ss:$24 sps:$4 sm:$0xff]   ;;  %v6718_v23 = vld [vmem:[#allocation7 + $0x518] ss:$24 sps:$4 sm:$0xff]  }
 0x1e0   :  { %4246 = vmatpush1.bf16.msra.mxu0 %v6637_v24  ;;  %4144 = vmatpush1.bf16.msra.mxu1 %v6673_v26  ;;  %v6726_v24 = vld [vmem:[#allocation7 + $0x54c] ss:$24 sps:$4 sm:$0xff]   ;;  %v6732_v26 = vld [vmem:[#allocation7 + $0x57c] ss:$24 sps:$4 sm:$0xff]  }
 0x1e1   :  { %4247 = vmatprep.subr.bf16.mxu0 %v6642_v25  ;;  %4145 = vmatprep.subr.bf16.mxu1 %v6681_v4  ;;  %v6724_v25 = vld [vmem:[#allocation7 + $0x548] ss:$24 sps:$4 sm:$0xff]   ;;  %v6730_v4 = vld [vmem:[#allocation7 + $0x578] ss:$24 sps:$4 sm:$0xff]  }
 0x1e4   :  { %4248 = vmatpush1.bf16.msra.mxu0 %v6640_v11  ;;  %4146 = vmatpush1.bf16.msra.mxu1 %v6679_v27  ;;  %v6738_v11 = vld [vmem:[#allocation7 + $0x5ac] ss:$24 sps:$4 sm:$0xff]   ;;  %v6744_v27 = vld [vmem:[#allocation7 + $0x5dc] ss:$24 sps:$4 sm:$0xff]  }
 0x1e5   :  { %4249 = vmatprep.subr.bf16.mxu0 %v6645_v7  ;;  %4147 = vmatprep.subr.bf16.mxu1 %v6687_v50  ;;  %v6736_v7 = vld [vmem:[#allocation7 + $0x5a8] ss:$24 sps:$4 sm:$0xff]   ;;  %v6742_v50 = vld [vmem:[#allocation7 + $0x5d8] ss:$24 sps:$4 sm:$0xff]  }
 0x1e8   :  { %4250 = vmatpush1.bf16.msra.mxu0 %v6643_v34  ;;  %4148 = vmatpush1.bf16.msra.mxu1 %v6685_v29  ;;  %v6750_v34 = vld [vmem:[#allocation7 + $0x60c] ss:$24 sps:$4 sm:$0xff]   ;;  %v2308_v29 = vcombine.high %v7512_v42, %v7512_v42  ;;  %v6745_v42 = vld [vmem:[#allocation7 + $0x600] ss:$24 sps:$4 sm:$0xff]  }
 0x1e9   :  { %4251 = vmatprep.subr.bf16.mxu0 %v6648_v31  ;;  %4149 = vmatprep.subr.bf16.mxu1 %v6693_v32  ;;  %v2309_v31 = vcombine.high %v7515_v45, %v7515_v45 }
 0x1ea   :  { %v2325_v32 = vpack.i.b16 %v2308_v29, %v2308_v29  ;;  %v6805_v29 = vld [vmem:[#allocation7 + $0x7e0] ss:$24 sps:$4 sm:$0xff]  }
 0x1ec   :  { %4252 = vmatpush1.bf16.msra.mxu0 %v6646_v33  ;;  %4150 = vmatpush1.bf16.msra.mxu1 %v6691_v35  ;;  %v2332_v33 = vpack.i.b16 %v2309_v31, %v2309_v31  ;;  %v6808_v31 = vld [vmem:[#allocation7 + $0x7e8] ss:$24 sps:$4 sm:$0xff]  }
 0x1ed   :  { %4264 = vmatprep.subr.bf16.mxu0 %v6654_v36  ;;  %4151 = vmatprep.subr.bf16.mxu1 %v6699_v37  ;;  %v2330_v37 = vrot.slane %v2325_v32, %v7520_v48  ;;  %v6813_v32 = vld [vmem:[#allocation7 + $0x814] ss:$24 sps:$4 sm:$0xff]  }
 0x1ef   :  { %4254 = vmatmul.mubr.bf16.vlgmr.msra.gmra.mrb[8].mxu0 %v7534_v44 }
 0x1f0   :  { %4265 = vmatpush1.bf16.msra.mxu0 %v6652_v38  ;;  %4152 = vmatpush1.bf16.msra.mxu1 %v6697_v43  ;;  %v2337_v43 = vrot.slane %v2332_v33, %v7520_v48  ;;  %v6816_v33 = vld [vmem:[#allocation7 + $0x81c] ss:$24 sps:$4 sm:$0xff]  }
 0x1f1   :  { %4266 = vmatprep.subr.bf16.mxu0 %v6660_v46  ;;  %4153 = vmatprep.subr.bf16.mxu1 %v6705_v47 }
 0x1f4   :  { %4267 = vmatpush1.bf16.msra.mxu0 %v6658_v51  ;;  %4154 = vmatpush1.bf16.msra.mxu1 %v6703_v52 }
 0x1f5   :  { %4268 = vmatprep.subr.bf16.mxu0 %v6666_v53  ;;  %4155 = vmatprep.subr.bf16.mxu1 %v6711_v54 }
 0x1f8   :  { %4269 = vmatpush1.bf16.msra.mxu0 %v6664_v55  ;;  %4156 = vmatpush1.bf16.msra.mxu1 %v6709_v56  ;;  %v6748_v55 = vld [vmem:[#allocation7 + $0x608] ss:$24 sps:$4 sm:$0xff]   ;;  %v6753_v56 = vld [vmem:[#allocation7 + $0x634] ss:$24 sps:$4 sm:$0xff]  }
 0x1f9   :  { %4270 = vmatprep.subr.bf16.mxu0 %v6672_v57  ;;  %4157 = vmatprep.subr.bf16.mxu1 %v6717_v58  ;;  %v6756_v57 = vld [vmem:[#allocation7 + $0x63c] ss:$24 sps:$4 sm:$0xff]   ;;  %v6751_v58 = vld [vmem:[#allocation7 + $0x630] ss:$24 sps:$4 sm:$0xff]  }
 0x1fc   :  { %4271 = vmatpush1.bf16.msra.mxu0 %v6670_v59  ;;  %4158 = vmatpush1.bf16.msra.mxu1 %v6715_v60  ;;  %v6754_v59 = vld [vmem:[#allocation7 + $0x638] ss:$24 sps:$4 sm:$0xff]   ;;  %v6759_v60 = vld [vmem:[#allocation7 + $0x664] ss:$24 sps:$4 sm:$0xff]  }
 0x1fd   :  { %4272 = vmatprep.subr.bf16.mxu0 %v6678_v61  ;;  %4159 = vmatprep.subr.bf16.mxu1 %v6723_v62  ;;  %v6762_v61 = vld [vmem:[#allocation7 + $0x66c] ss:$24 sps:$4 sm:$0xff]   ;;  %v6757_v62 = vld [vmem:[#allocation7 + $0x660] ss:$24 sps:$4 sm:$0xff]  }
 0x200   :  { %4273 = vmatpush1.bf16.msra.mxu0 %v6676_v63  ;;  %4160 = vmatpush1.bf16.msra.mxu1 %v6721_v0  ;;  %v6760_v63 = vld [vmem:[#allocation7 + $0x668] ss:$24 sps:$4 sm:$0xff]   ;;  %v6765_v0 = vld [vmem:[#allocation7 + $0x694] ss:$24 sps:$4 sm:$0xff]  }
 0x201   :  { %4274 = vmatprep.subr.bf16.mxu0 %v6684_v1  ;;  %4161 = vmatprep.subr.bf16.mxu1 %v6729_v39  ;;  %v6768_v1 = vld [vmem:[#allocation7 + $0x69c] ss:$24 sps:$4 sm:$0xff]   ;;  %v6763_v39 = vld [vmem:[#allocation7 + $0x690] ss:$24 sps:$4 sm:$0xff]  }
 0x204   :  { %4275 = vmatpush1.bf16.msra.mxu0 %v6682_v2  ;;  %4162 = vmatpush1.bf16.msra.mxu1 %v6727_v3  ;;  %v6766_v2 = vld [vmem:[#allocation7 + $0x698] ss:$24 sps:$4 sm:$0xff]   ;;  %v6771_v3 = vld [vmem:[#allocation7 + $0x6c4] ss:$24 sps:$4 sm:$0xff]  }
 0x205   :  { %4276 = vmatprep.subr.bf16.mxu0 %v6690_v40  ;;  %4163 = vmatprep.subr.bf16.mxu1 %v6735_v5  ;;  %v6774_v40 = vld [vmem:[#allocation7 + $0x6cc] ss:$24 sps:$4 sm:$0xff]   ;;  %v6769_v5 = vld [vmem:[#allocation7 + $0x6c0] ss:$24 sps:$4 sm:$0xff]  }
 0x208   :  { %4277 = vmatpush1.bf16.msra.mxu0 %v6688_v6  ;;  %4164 = vmatpush1.bf16.msra.mxu1 %v6733_v9  ;;  %v6772_v6 = vld [vmem:[#allocation7 + $0x6c8] ss:$24 sps:$4 sm:$0xff]   ;;  %v6777_v9 = vld [vmem:[#allocation7 + $0x6f4] ss:$24 sps:$4 sm:$0xff]  }
 0x209   :  { %4278 = vmatprep.subr.bf16.mxu0 %v6696_v10  ;;  %4165 = vmatprep.subr.bf16.mxu1 %v6741_v12  ;;  %v6780_v10 = vld [vmem:[#allocation7 + $0x6fc] ss:$24 sps:$4 sm:$0xff]   ;;  %v6775_v12 = vld [vmem:[#allocation7 + $0x6f0] ss:$24 sps:$4 sm:$0xff]  }
 0x20c   :  { %4279 = vmatpush1.bf16.msra.mxu0 %v6694_v13  ;;  %4166 = vmatpush1.bf16.msra.mxu1 %v6739_v14  ;;  %v6778_v13 = vld [vmem:[#allocation7 + $0x6f8] ss:$24 sps:$4 sm:$0xff]   ;;  %v6783_v14 = vld [vmem:[#allocation7 + $0x724] ss:$24 sps:$4 sm:$0xff]  }
 0x20d   :  { %4280 = vmatprep.subr.bf16.mxu0 %v6702_v15  ;;  %4178 = vmatprep.subr.bf16.mxu1 %v6747_v16  ;;  %v6786_v15 = vld [vmem:[#allocation7 + $0x72c] ss:$24 sps:$4 sm:$0xff]   ;;  %v6781_v16 = vld [vmem:[#allocation7 + $0x720] ss:$24 sps:$4 sm:$0xff]  }
 0x210   :  { %4281 = vmatpush1.bf16.msra.mxu0 %v6700_v17  ;;  %v6784_v17 = vld [vmem:[#allocation7 + $0x728] ss:$24 sps:$4 sm:$0xff]  }
 0x211   :  { %4282 = vmatprep.subr.bf16.mxu0 %v6708_v18  ;;  %v6789_v18 = vld [vmem:[#allocation7 + $0x754] ss:$24 sps:$4 sm:$0xff]  }
 0x214   :  { %4283 = vmatpush1.bf16.msra.mxu0 %v6706_v19  ;;  %v6792_v19 = vld [vmem:[#allocation7 + $0x75c] ss:$24 sps:$4 sm:$0xff]  }
 0x215   :  { %4284 = vmatprep.subr.bf16.mxu0 %v6714_v20  ;;  %v6787_v20 = vld [vmem:[#allocation7 + $0x750] ss:$24 sps:$4 sm:$0xff]  }
 0x218   :  { %4285 = vmatpush1.bf16.msra.mxu0 %v6712_v21  ;;  %v6790_v21 = vld [vmem:[#allocation7 + $0x758] ss:$24 sps:$4 sm:$0xff]  }
 0x219   :  { %4286 = vmatprep.subr.bf16.mxu0 %v6720_v22  ;;  %v6795_v22 = vld [vmem:[#allocation7 + $0x784] ss:$24 sps:$4 sm:$0xff]  }
 0x21c   :  { %4287 = vmatpush1.bf16.msra.mxu0 %v6718_v23  ;;  %v6798_v23 = vld [vmem:[#allocation7 + $0x78c] ss:$24 sps:$4 sm:$0xff]  }
 0x21d   :  { %4288 = vmatprep.subr.bf16.mxu0 %v6726_v24  ;;  %v6793_v24 = vld [vmem:[#allocation7 + $0x780] ss:$24 sps:$4 sm:$0xff]  }
 0x220   :  { %4289 = vmatpush1.bf16.msra.mxu0 %v6724_v25  ;;  %v6796_v25 = vld [vmem:[#allocation7 + $0x788] ss:$24 sps:$4 sm:$0xff]  }
 0x221   :  { %4290 = vmatprep.subr.bf16.mxu0 %v6732_v26  ;;  %v6801_v26 = vld [vmem:[#allocation7 + $0x7b4] ss:$24 sps:$4 sm:$0xff]  }
 0x224   :  { %4291 = vmatpush1.bf16.msra.mxu0 %v6730_v4  ;;  %v6804_v4 = vld [vmem:[#allocation7 + $0x7bc] ss:$24 sps:$4 sm:$0xff]  }
 0x225   :  { %4292 = vmatprep.subr.bf16.mxu0 %v6738_v11  ;;  %v6799_v11 = vld [vmem:[#allocation7 + $0x7b0] ss:$24 sps:$4 sm:$0xff]  }
 0x228   :  { %4293 = vmatpush1.bf16.msra.mxu0 %v6736_v7  ;;  %v6802_v7 = vld [vmem:[#allocation7 + $0x7b8] ss:$24 sps:$4 sm:$0xff]  }
 0x229   :  { %4294 = vmatprep.subr.bf16.mxu0 %v6744_v27  ;;  %v6807_v27 = vld [vmem:[#allocation7 + $0x7e4] ss:$24 sps:$4 sm:$0xff]  }
 0x22c   :  { %4295 = vmatpush1.bf16.msra.mxu0 %v6742_v50  ;;  %v6810_v50 = vld [vmem:[#allocation7 + $0x7ec] ss:$24 sps:$4 sm:$0xff]  }
 0x22d   :  { %4307 = vmatprep.subr.bf16.mxu0 %v6750_v34  ;;  %v2263_v34 = vcombine.high %v7504_v49, %v7504_v49  ;;  %v6817_v49 = vld [vmem:[#allocation7 + $0x840] ss:$24 sps:$4 sm:$0xff]  }
 0x241   :  { %v2117_v35 = vpop.f32.mrb[4].mxu1 }
 0x242   :  { %v2119_v36 = vpop.f32.mrb[5].mxu1 }
 0x243   :  { %v2121_v38 = vpop.f32.mrb[6].mxu1 }
 0x244   :  { %v2257_v46 = vpack.c.bf16 %v2121_v38, %v2117_v35  ;;  %v2123_v47 = vpop.f32.mrb[7].mxu1  ;;  %v2277_v35 = vrot.slane %v2263_v34, %v7507_v30  ;;  %v6819_v38 = vld [vmem:[#allocation7 + $0x844] ss:$24 sps:$4 sm:$0xff]   ;;  %v6868_v34 = vld [vmem:[#allocation7 + $0x194] ss:$24 sps:$4 sm:$0xff]  }
 0x245   :  { %v2258_v51 = vpack.c.bf16 %v2123_v47, %v2119_v36  ;;  %v6811_v36 = vld [vmem:[#allocation7 + $0x810] ss:$24 sps:$4 sm:$0xff]  }
 0x246   :  { %v2354_v52 = vadd.bf16 %v2330_v37, %v2257_v46  ;;  %v6814_v37 = vld [vmem:[#allocation7 + $0x818] ss:$24 sps:$4 sm:$0xff]   ;;  %v2279_v46 = vcombine.high %v2277_v35, %v2277_v35  ;;  %v6820_v47 = vld [vmem:[#allocation7 + $0x848] ss:$24 sps:$4 sm:$0xff]  }
 0x247   :  { %v2355_v53 = vadd.bf16 %v2337_v43, %v2258_v51  ;;  %v6822_v43 = vld [vmem:[#allocation7 + $0x84c] ss:$24 sps:$4 sm:$0xff]  }
 0x248   :  { %v7550_v45 = vmax.bf16 %v7322_v41, %v2354_v52  ;;  %v6825_v51 = vld [vmem:[#allocation7 + $0x874] ss:$24 sps:$4 sm:$0xff]  }
 0x249   :  { %v7547_v54 = vmax.bf16 %v7322_v41, %v2355_v53  ;;  %v6828_v52 = vld [vmem:[#allocation7 + $0x87c] ss:$24 sps:$4 sm:$0xff]   ;;  %v2293_v53 = vrot.slane %v2277_v35, %v7507_v30 }
 0x24a   :  { %v6970_v35 = vld [vmem:[#allocation10 + $0x14] ss:$8 sps:$4 sm:$0xff]  }
 0x24b   :  { %4167 = vmatprep.mubr.bf16.mxu1 %v7547_v54  ;;  %4296 = vmatprep.mubr.bf16.mxu0 %v7547_v54 }
 0x24c   :  { %4168 = vmatmul.mubr.bf16.vlgmr.msra.gmra.mrb[8].mxu1 %v7550_v45  ;;  %4297 = vmatmul.mubr.bf16.vlgmr.msra.gmra.mrb[8].mxu0 %v7550_v45 }
 0x24d   :  { %4179 = vmatpush1.bf16.msra.mxu1 %v6745_v42  ;;  %4308 = vmatpush1.bf16.msra.mxu0 %v6748_v55  ;;  %v2307_v42 = vrot.slane %v2279_v46, %v7507_v30  ;;  %v6823_v55 = vld [vmem:[#allocation7 + $0x870] ss:$24 sps:$4 sm:$0xff]  }
 0x24e   :  { %4180 = vmatprep.subr.bf16.mxu1 %v6753_v56  ;;  %4309 = vmatprep.subr.bf16.mxu0 %v6756_v57  ;;  %v6826_v56 = vld [vmem:[#allocation7 + $0x878] ss:$24 sps:$4 sm:$0xff]   ;;  %v2339_v57 = vpack.i.b16 %v2293_v53, %v2293_v53 }
 0x24f   :  { %v6872_v46 = vld [vmem:[#allocation7 + $0x1f0] ss:$24 sps:$4 sm:$0xff]   ;;  %v6980_v53 = vld [vmem:[#allocation10 + $0x30] ss:$8 sps:$4 sm:$0xff]  }
 0x251   :  { %4181 = vmatpush1.bf16.msra.mxu1 %v6751_v58  ;;  %4310 = vmatpush1.bf16.msra.mxu0 %v6754_v59  ;;  %v6832_v58 = vld [vmem:[#allocation7 + $0x8a4] ss:$24 sps:$4 sm:$0xff]  }
 0x252   :  { %4182 = vmatprep.subr.bf16.mxu1 %v6759_v60  ;;  %4311 = vmatprep.subr.bf16.mxu0 %v6762_v61  ;;  %v6835_v59 = vld [vmem:[#allocation7 + $0x8ac] ss:$24 sps:$4 sm:$0xff]   ;;  %v2346_v60 = vpack.i.b16 %v2307_v42, %v2307_v42 }
 0x253   :  { %v6880_v42 = vld [vmem:[#allocation7 + $0x254] ss:$24 sps:$4 sm:$0xff]  }
 0x255   :  { %4183 = vmatpush1.bf16.msra.mxu1 %v6757_v62  ;;  %4312 = vmatpush1.bf16.msra.mxu0 %v6760_v63  ;;  %v6830_v62 = vld [vmem:[#allocation7 + $0x8a0] ss:$24 sps:$4 sm:$0xff]  }
 0x256   :  { %4184 = vmatprep.subr.bf16.mxu1 %v6765_v0  ;;  %4313 = vmatprep.subr.bf16.mxu0 %v6768_v1  ;;  %v6833_v63 = vld [vmem:[#allocation7 + $0x8a8] ss:$24 sps:$4 sm:$0xff]   ;;  %v2344_v1 = vrot.slane %v2339_v57, %v7520_v48 }
 0x257   :  { %v6986_v57 = vld [vmem:[#allocation10 + $0x40] ss:$8 sps:$4 sm:$0xff]  }
 0x259   :  { %4185 = vmatpush1.bf16.msra.mxu1 %v6763_v39  ;;  %4314 = vmatpush1.bf16.msra.mxu0 %v6766_v2  ;;  %v6838_v39 = vld [vmem:[#allocation7 + $0x8d4] ss:$24 sps:$4 sm:$0xff]  }
 0x25a   :  { %4186 = vmatprep.subr.bf16.mxu1 %v6771_v3  ;;  %4315 = vmatprep.subr.bf16.mxu0 %v6774_v40  ;;  %v6841_v2 = vld [vmem:[#allocation7 + $0x8dc] ss:$24 sps:$4 sm:$0xff]   ;;  %v2351_v40 = vrot.slane %v2346_v60, %v7520_v48  ;;  %v6881_v60 = vld [vmem:[#allocation7 + $0x280] ss:$24 sps:$4 sm:$0xff]  }
 0x25d   :  { %4187 = vmatpush1.bf16.msra.mxu1 %v6769_v5  ;;  %4316 = vmatpush1.bf16.msra.mxu0 %v6772_v6 }
 0x25e   :  { %4188 = vmatprep.subr.bf16.mxu1 %v6777_v9  ;;  %4317 = vmatprep.subr.bf16.mxu0 %v6780_v10  ;;  %v6836_v10 = vld [vmem:[#allocation7 + $0x8d0] ss:$24 sps:$4 sm:$0xff]  }
 0x261   :  { %4189 = vmatpush1.bf16.msra.mxu1 %v6775_v12  ;;  %4318 = vmatpush1.bf16.msra.mxu0 %v6778_v13  ;;  %v6839_v12 = vld [vmem:[#allocation7 + $0x8d8] ss:$24 sps:$4 sm:$0xff]  }
 0x262   :  { %4190 = vmatprep.subr.bf16.mxu1 %v6783_v14  ;;  %4319 = vmatprep.subr.bf16.mxu0 %v6786_v15  ;;  %v6844_v14 = vld [vmem:[#allocation7 + $0x14] ss:$24 sps:$4 sm:$0xff]  }
 0x265   :  { %4191 = vmatpush1.bf16.msra.mxu1 %v6781_v16  ;;  %4320 = vmatpush1.bf16.msra.mxu0 %v6784_v17  ;;  %v6842_v17 = vld [vmem:[#allocation7 + $0x10] ss:$24 sps:$4 sm:$0xff]  }
 0x266   :  { %4192 = vmatprep.subr.bf16.mxu1 %v6789_v18  ;;  %4321 = vmatprep.subr.bf16.mxu0 %v6792_v19  ;;  %v6847_v19 = vld [vmem:[#allocation7 + $0x44] ss:$24 sps:$4 sm:$0xff]  }
 0x269   :  { %4193 = vmatpush1.bf16.msra.mxu1 %v6787_v20  ;;  %4322 = vmatpush1.bf16.msra.mxu0 %v6790_v21  ;;  %v6845_v20 = vld [vmem:[#allocation7 + $0x40] ss:$24 sps:$4 sm:$0xff]   ;;  %v6850_v21 = vld [vmem:[#allocation7 + $0x74] ss:$24 sps:$4 sm:$0xff]  }
 0x26a   :  { %4194 = vmatprep.subr.bf16.mxu1 %v6795_v22  ;;  %4323 = vmatprep.subr.bf16.mxu0 %v6798_v23  ;;  %v6848_v22 = vld [vmem:[#allocation7 + $0x70] ss:$24 sps:$4 sm:$0xff]   ;;  %v6853_v23 = vld [vmem:[#allocation7 + $0xa4] ss:$24 sps:$4 sm:$0xff]  }
 0x26d   :  { %4195 = vmatpush1.bf16.msra.mxu1 %v6793_v24  ;;  %4324 = vmatpush1.bf16.msra.mxu0 %v6796_v25  ;;  %v6851_v24 = vld [vmem:[#allocation7 + $0xa0] ss:$24 sps:$4 sm:$0xff]   ;;  %v6856_v25 = vld [vmem:[#allocation7 + $0xd4] ss:$24 sps:$4 sm:$0xff]  }
 0x26e   :  { %4196 = vmatprep.subr.bf16.mxu1 %v6801_v26  ;;  %4325 = vmatprep.subr.bf16.mxu0 %v6804_v4  ;;  %v6854_v26 = vld [vmem:[#allocation7 + $0xd0] ss:$24 sps:$4 sm:$0xff]   ;;  %v6859_v4 = vld [vmem:[#allocation7 + $0x104] ss:$24 sps:$4 sm:$0xff]  }
 0x271   :  { %4197 = vmatpush1.bf16.msra.mxu1 %v6799_v11  ;;  %4326 = vmatpush1.bf16.msra.mxu0 %v6802_v7  ;;  %v6857_v11 = vld [vmem:[#allocation7 + $0x100] ss:$24 sps:$4 sm:$0xff]   ;;  %v6862_v7 = vld [vmem:[#allocation7 + $0x134] ss:$24 sps:$4 sm:$0xff]  }
 0x272   :  { %4198 = vmatprep.subr.bf16.mxu1 %v6807_v27  ;;  %4327 = vmatprep.subr.bf16.mxu0 %v6810_v50  ;;  %v6865_v27 = vld [vmem:[#allocation7 + $0x164] ss:$24 sps:$4 sm:$0xff]   ;;  %v6863_v50 = vld [vmem:[#allocation7 + $0x160] ss:$24 sps:$4 sm:$0xff]  }
 0x275   :  { %4199 = vmatpush1.bf16.msra.mxu1 %v6805_v29  ;;  %4328 = vmatpush1.bf16.msra.mxu0 %v6808_v31  ;;  %v6964_v29 = vld [vmem:[#allocation10 + $0x4] ss:$8 sps:$4 sm:$0xff]  }
 0x276   :  { %4200 = vmatprep.subr.bf16.mxu1 %v6813_v32  ;;  %4329 = vmatprep.subr.bf16.mxu0 %v6816_v33  ;;  %v6866_v31 = vld [vmem:[#allocation7 + $0x190] ss:$24 sps:$4 sm:$0xff]   ;;  %v6871_v33 = vld [vmem:[#allocation7 + $0x1c4] ss:$24 sps:$4 sm:$0xff]  }
 0x277   :  { %v6962_v32 = vld [vmem:[#allocation10] ss:$8 sps:$4 sm:$0xff]  }
 0x279   :  { %4201 = vmatpush1.bf16.msra.mxu1 %v6811_v36  ;;  %4330 = vmatpush1.bf16.msra.mxu0 %v6814_v37  ;;  %v6869_v36 = vld [vmem:[#allocation7 + $0x1c0] ss:$24 sps:$4 sm:$0xff]  }
 0x27a   :  { %4202 = vmatprep.subr.bf16.mxu1 %v6819_v38  ;;  %4331 = vmatprep.subr.bf16.mxu0 %v6822_v43  ;;  %v6968_v37 = vld [vmem:[#allocation10 + $0x10] ss:$8 sps:$4 sm:$0xff]   ;;  %v6976_v43 = vld [vmem:[#allocation10 + $0x24] ss:$8 sps:$4 sm:$0xff]  }
 0x27b   :  { %v6874_v38 = vld [vmem:[#allocation7 + $0x1f4] ss:$24 sps:$4 sm:$0xff]  }
 0x27d   :  { %4203 = vmatpush1.bf16.msra.mxu1 %v6817_v49  ;;  %4332 = vmatpush1.bf16.msra.mxu0 %v6820_v47  ;;  %v6974_v49 = vld [vmem:[#allocation10 + $0x20] ss:$8 sps:$4 sm:$0xff]  }
 0x27e   :  { %4204 = vmatprep.subr.bf16.mxu1 %v6825_v51  ;;  %4333 = vmatprep.subr.bf16.mxu0 %v6828_v52  ;;  %v6877_v47 = vld [vmem:[#allocation7 + $0x224] ss:$24 sps:$4 sm:$0xff]   ;;  %v6875_v52 = vld [vmem:[#allocation7 + $0x220] ss:$24 sps:$4 sm:$0xff]  }
 0x27f   :  { %v6982_v51 = vld [vmem:[#allocation10 + $0x34] ss:$8 sps:$4 sm:$0xff]  }
 0x281   :  { %4205 = vmatpush1.bf16.msra.mxu1 %v6823_v55  ;;  %4334 = vmatpush1.bf16.msra.mxu0 %v6826_v56  ;;  %v6988_v55 = vld [vmem:[#allocation10 + $0x44] ss:$8 sps:$4 sm:$0xff]  }
 0x282   :  { %v2246_v61 = vpop.f32.mrb[4].mxu0  ;;  %4206 = vmatprep.subr.bf16.mxu1 %v6832_v58  ;;  %4335 = vmatprep.subr.bf16.mxu0 %v6835_v59  ;;  %v6878_v56 = vld [vmem:[#allocation7 + $0x250] ss:$24 sps:$4 sm:$0xff]   ;;  %v6883_v58 = vld [vmem:[#allocation7 + $0x284] ss:$24 sps:$4 sm:$0xff]  }
 0x283   :  { %v2248_v0 = vpop.f32.mrb[5].mxu0  ;;  %v6994_v59 = vld [vmem:[#allocation10 + $0x54] ss:$8 sps:$4 sm:$0xff]  }
 0x284   :  { %v2250_v3 = vpop.f32.mrb[6].mxu0 }
 0x285   :  { %v2259_v5 = vpack.c.bf16 %v2250_v3, %v2246_v61  ;;  %v2252_v6 = vpop.f32.mrb[7].mxu0  ;;  %4207 = vmatpush1.bf16.msra.mxu1 %v6830_v62  ;;  %4336 = vmatpush1.bf16.msra.mxu0 %v6833_v63  ;;  %v6992_v61 = vld [vmem:[#allocation10 + $0x50] ss:$8 sps:$4 sm:$0xff]   ;;  %v7000_v63 = vld [vmem:[#allocation10 + $0x64] ss:$8 sps:$4 sm:$0xff]  }
 0x286   :  { %v2260_v9 = vpack.c.bf16 %v2252_v6, %v2248_v0  ;;  %4208 = vmatprep.subr.bf16.mxu1 %v6838_v39  ;;  %4337 = vmatprep.subr.bf16.mxu0 %v6841_v2  ;;  %v6886_v62 = vld [vmem:[#allocation7 + $0x2b4] ss:$24 sps:$4 sm:$0xff]   ;;  %v6884_v0 = vld [vmem:[#allocation7 + $0x2b0] ss:$24 sps:$4 sm:$0xff]   ;;  %v6889_v39 = vld [vmem:[#allocation7 + $0x2e4] ss:$24 sps:$4 sm:$0xff]  }
 0x287   :  { %v2356_v13 = vadd.bf16 %v2344_v1, %v2259_v5  ;;  %v6998_v1 = vld [vmem:[#allocation10 + $0x60] ss:$8 sps:$4 sm:$0xff]   ;;  %v7006_v2 = vld [vmem:[#allocation10 + $0x74] ss:$8 sps:$4 sm:$0xff]   ;;  %v7012_v6 = vld [vmem:[#allocation10 + $0x84] ss:$8 sps:$4 sm:$0xff]  }
 0x288   :  { %v2357_v15 = vadd.bf16 %v2351_v40, %v2260_v9  ;;  %v6887_v3 = vld [vmem:[#allocation7 + $0x2e0] ss:$24 sps:$4 sm:$0xff]   ;;  %v6892_v5 = vld [vmem:[#allocation7 + $0x314] ss:$24 sps:$4 sm:$0xff]   ;;  %v6890_v9 = vld [vmem:[#allocation7 + $0x310] ss:$24 sps:$4 sm:$0xff]  }
 0x289   :  { %4209 = vmatpush1.bf16.msra.mxu1 %v6836_v10  ;;  %4338 = vmatpush1.bf16.msra.mxu0 %v6839_v12  ;;  %v7567_v18 = vmax.bf16 %v7322_v41, %v2356_v13  ;;  %v7004_v40 = vld [vmem:[#allocation10 + $0x70] ss:$8 sps:$4 sm:$0xff]   ;;  %v7010_v10 = vld [vmem:[#allocation10 + $0x80] ss:$8 sps:$4 sm:$0xff]  }
 0x28a   :  { %v7564_v16 = vmax.bf16 %v7322_v41, %v2357_v15  ;;  %4350 = vmatprep.subr.bf16.mxu1 %v6844_v14  ;;  %5176 = vmatprep.subr.bf16.mxu0 %v6964_v29  ;;  %v6895_v12 = vld [vmem:[#allocation7 + $0x344] ss:$24 sps:$4 sm:$0xff]   ;;  %v6893_v15 = vld [vmem:[#allocation7 + $0x340] ss:$24 sps:$4 sm:$0xff]   ;;  %v6908_v29 = vld [vmem:[#allocation7 + $0x430] ss:$24 sps:$4 sm:$0xff]  }
 0x28b   :  { %v7013_v13 = vld [vmem:[#allocation10 + $0x90] ss:$8 sps:$4 sm:$0xff]   ;;  %v7015_v14 = vld [vmem:[#allocation10 + $0x94] ss:$8 sps:$4 sm:$0xff]  }
 0x28c   :  { %4210 = vmatprep.mubr.bf16.mxu1 %v7564_v16  ;;  %4339 = vmatprep.mubr.bf16.mxu0 %v7564_v16 }
 0x28d   :  { %4211 = vmatmul.mubr.bf16.vlgmr.msra.gmra.mrb[8].mxu1 %v7567_v18  ;;  %4340 = vmatmul.mubr.bf16.vlgmr.msra.gmra.mrb[8].mxu0 %v7567_v18 }
 0x28e   :  { %4351 = vmatpush1.bf16.msra.mxu1 %v6842_v17  ;;  %4382 = vmatprep.mubr.bf16.mxu1 %v7531_v8  ;;  %v6860_v8 = vld [vmem:[#allocation7 + $0x130] ss:$24 sps:$4 sm:$0xff]  }
 0x28f   :  { %4352 = vmatprep.subr.bf16.mxu1 %v6847_v19  ;;  %5177 = vmatpush1.bf16.msra.mxu0 %v6962_v32  ;;  %v7018_v17 = vld [vmem:[#allocation10 + $0xa4] ss:$8 sps:$4 sm:$0xff]   ;;  %v6913_v32 = vld [vmem:[#allocation7 + $0x464] ss:$24 sps:$4 sm:$0xff]  }
 0x290   :  { %5178 = vmatprep.subr.bf16.mxu0 %v6970_v35  ;;  %v6898_v19 = vld [vmem:[#allocation7 + $0x374] ss:$24 sps:$4 sm:$0xff]   ;;  %v6911_v35 = vld [vmem:[#allocation7 + $0x460] ss:$24 sps:$4 sm:$0xff]  }
 0x292   :  { %4353 = vmatpush1.bf16.msra.mxu1 %v6845_v20  ;;  %v7016_v20 = vld [vmem:[#allocation10 + $0xa0] ss:$8 sps:$4 sm:$0xff]  }
 0x293   :  { %4354 = vmatprep.subr.bf16.mxu1 %v6850_v21  ;;  %5179 = vmatpush1.bf16.msra.mxu0 %v6968_v37  ;;  %v7021_v21 = vld [vmem:[#allocation10 + $0xb4] ss:$8 sps:$4 sm:$0xff]   ;;  %v6916_v37 = vld [vmem:[#allocation7 + $0x494] ss:$24 sps:$4 sm:$0xff]  }
 0x294   :  { %5180 = vmatprep.subr.bf16.mxu0 %v6976_v43  ;;  %v6914_v43 = vld [vmem:[#allocation7 + $0x490] ss:$24 sps:$4 sm:$0xff]  }
 0x296   :  { %4355 = vmatpush1.bf16.msra.mxu1 %v6848_v22  ;;  %v6896_v22 = vld [vmem:[#allocation7 + $0x370] ss:$24 sps:$4 sm:$0xff]  }
 0x297   :  { %4356 = vmatprep.subr.bf16.mxu1 %v6853_v23  ;;  %5181 = vmatpush1.bf16.msra.mxu0 %v6974_v49  ;;  %v6901_v23 = vld [vmem:[#allocation7 + $0x3a4] ss:$24 sps:$4 sm:$0xff]   ;;  %v6917_v49 = vld [vmem:[#allocation7 + $0x4c0] ss:$24 sps:$4 sm:$0xff]  }
 0x298   :  { %5182 = vmatprep.subr.bf16.mxu0 %v6982_v51  ;;  %v6920_v51 = vld [vmem:[#allocation7 + $0x4f0] ss:$24 sps:$4 sm:$0xff]  }
 0x29a   :  { %4357 = vmatpush1.bf16.msra.mxu1 %v6851_v24  ;;  %v7024_v24 = vld [vmem:[#allocation10 + $0xc4] ss:$8 sps:$4 sm:$0xff]  }
 0x29b   :  { %4358 = vmatprep.subr.bf16.mxu1 %v6856_v25  ;;  %5183 = vmatpush1.bf16.msra.mxu0 %v6980_v53  ;;  %v6899_v25 = vld [vmem:[#allocation7 + $0x3a0] ss:$24 sps:$4 sm:$0xff]  }
 0x29c   :  { %5184 = vmatprep.subr.bf16.mxu0 %v6988_v55  ;;  %v6923_v53 = vld [vmem:[#allocation7 + $0x520] ss:$24 sps:$4 sm:$0xff]   ;;  %v6926_v55 = vld [vmem:[#allocation7 + $0x550] ss:$24 sps:$4 sm:$0xff]  }
 0x29e   :  { %4359 = vmatpush1.bf16.msra.mxu1 %v6854_v26  ;;  %v7022_v26 = vld [vmem:[#allocation10 + $0xc0] ss:$8 sps:$4 sm:$0xff]  }
 0x29f   :  { %4360 = vmatprep.subr.bf16.mxu1 %v6859_v4  ;;  %5185 = vmatpush1.bf16.msra.mxu0 %v6986_v57  ;;  %v7027_v4 = vld [vmem:[#allocation10 + $0xd4] ss:$8 sps:$4 sm:$0xff]  }
 0x2a0   :  { %5186 = vmatprep.subr.bf16.mxu0 %v6994_v59  ;;  %v6929_v57 = vld [vmem:[#allocation7 + $0x580] ss:$24 sps:$4 sm:$0xff]   ;;  %v6932_v59 = vld [vmem:[#allocation7 + $0x5b0] ss:$24 sps:$4 sm:$0xff]  }
 0x2a2   :  { %4361 = vmatpush1.bf16.msra.mxu1 %v6857_v11  ;;  %v6902_v11 = vld [vmem:[#allocation7 + $0x3d0] ss:$24 sps:$4 sm:$0xff]  }
 0x2a3   :  { %4362 = vmatprep.subr.bf16.mxu1 %v6862_v7  ;;  %5187 = vmatpush1.bf16.msra.mxu0 %v6992_v61  ;;  %v6907_v7 = vld [vmem:[#allocation7 + $0x404] ss:$24 sps:$4 sm:$0xff]   ;;  %v6935_v61 = vld [vmem:[#allocation7 + $0x5e0] ss:$24 sps:$4 sm:$0xff]  }
 0x2a4   :  { %5188 = vmatprep.subr.bf16.mxu0 %v7000_v63  ;;  %v6938_v63 = vld [vmem:[#allocation7 + $0x610] ss:$24 sps:$4 sm:$0xff]  }
 0x2a6   :  { %4363 = vmatpush1.bf16.msra.mxu1 %v6860_v8  ;;  %v7025_v8 = vld [vmem:[#allocation10 + $0xd0] ss:$8 sps:$4 sm:$0xff]  }
 0x2a7   :  { %4364 = vmatprep.subr.bf16.mxu1 %v6865_v27  ;;  %5189 = vmatpush1.bf16.msra.mxu0 %v6998_v1  ;;  %v6905_v27 = vld [vmem:[#allocation7 + $0x400] ss:$24 sps:$4 sm:$0xff]  }
 0x2a8   :  { %5190 = vmatprep.subr.bf16.mxu0 %v7006_v2  ;;  %v6941_v1 = vld [vmem:[#allocation7 + $0x640] ss:$24 sps:$4 sm:$0xff]   ;;  %v6944_v2 = vld [vmem:[#allocation7 + $0x670] ss:$24 sps:$4 sm:$0xff]  }
 0x2aa   :  { %4365 = vmatpush1.bf16.msra.mxu1 %v6863_v50  ;;  %v6910_v50 = vld [vmem:[#allocation7 + $0x434] ss:$24 sps:$4 sm:$0xff]  }
 0x2ab   :  { %4366 = vmatprep.subr.bf16.mxu1 %v6868_v34  ;;  %5191 = vmatpush1.bf16.msra.mxu0 %v7004_v40  ;;  %v7030_v34 = vld [vmem:[#allocation10 + $0xe4] ss:$8 sps:$4 sm:$0xff]   ;;  %v6947_v40 = vld [vmem:[#allocation7 + $0x6a0] ss:$24 sps:$4 sm:$0xff]  }
 0x2ac   :  { %5192 = vmatprep.subr.bf16.mxu0 %v7012_v6  ;;  %v6950_v6 = vld [vmem:[#allocation7 + $0x6d0] ss:$24 sps:$4 sm:$0xff]  }
 0x2ae   :  { %4367 = vmatpush1.bf16.msra.mxu1 %v6866_v31  ;;  %v7028_v31 = vld [vmem:[#allocation10 + $0xe0] ss:$8 sps:$4 sm:$0xff]  }
 0x2af   :  { %4368 = vmatprep.subr.bf16.mxu1 %v6871_v33  ;;  %5193 = vmatpush1.bf16.msra.mxu0 %v7010_v10  ;;  %v7033_v33 = vld [vmem:[#allocation10 + $0xf4] ss:$8 sps:$4 sm:$0xff]   ;;  %v6958_v10 = vld [vmem:[#allocation7 + $0x734] ss:$24 sps:$4 sm:$0xff]  }
 0x2b0   :  { %5194 = vmatprep.subr.bf16.mxu0 %v7015_v14  ;;  %v6967_v14 = vld [vmem:[#allocation7 + $0x794] ss:$24 sps:$4 sm:$0xff]  }
 0x2b2   :  { %4369 = vmatpush1.bf16.msra.mxu1 %v6869_v36  ;;  %v7031_v36 = vld [vmem:[#allocation10 + $0xf0] ss:$8 sps:$4 sm:$0xff]  }
 0x2b3   :  { %4370 = vmatprep.subr.bf16.mxu1 %v6874_v38  ;;  %5195 = vmatpush1.bf16.msra.mxu0 %v7013_v13  ;;  %v7036_v38 = vld [vmem:[#allocation10 + $0x104] ss:$8 sps:$4 sm:$0xff]   ;;  %v6959_v13 = vld [vmem:[#allocation7 + $0x760] ss:$24 sps:$4 sm:$0xff]  }
 0x2b4   :  { %5196 = vmatprep.subr.bf16.mxu0 %v7018_v17  ;;  %v6973_v17 = vld [vmem:[#allocation7 + $0x7c4] ss:$24 sps:$4 sm:$0xff]  }
 0x2b6   :  { %4371 = vmatpush1.bf16.msra.mxu1 %v6872_v46  ;;  %v6919_v46 = vld [vmem:[#allocation7 + $0x4c4] ss:$24 sps:$4 sm:$0xff]  }
 0x2b7   :  { %4372 = vmatprep.subr.bf16.mxu1 %v6877_v47  ;;  %5197 = vmatpush1.bf16.msra.mxu0 %v7016_v20  ;;  %v6922_v47 = vld [vmem:[#allocation7 + $0x4f4] ss:$24 sps:$4 sm:$0xff]  }
 0x2b8   :  { %5198 = vmatprep.subr.bf16.mxu0 %v7021_v21  ;;  %v6979_v20 = vld [vmem:[#allocation7 + $0x7f4] ss:$24 sps:$4 sm:$0xff]   ;;  %v6977_v21 = vld [vmem:[#allocation7 + $0x7f0] ss:$24 sps:$4 sm:$0xff]  }
 0x2ba   :  { %4373 = vmatpush1.bf16.msra.mxu1 %v6875_v52  ;;  %v6925_v52 = vld [vmem:[#allocation7 + $0x524] ss:$24 sps:$4 sm:$0xff]  }
 0x2bb   :  { %4374 = vmatprep.subr.bf16.mxu1 %v6880_v42  ;;  %v6928_v42 = vld [vmem:[#allocation7 + $0x554] ss:$24 sps:$4 sm:$0xff]  }
 0x2be   :  { %4375 = vmatpush1.bf16.msra.mxu1 %v6878_v56  ;;  %v6931_v56 = vld [vmem:[#allocation7 + $0x584] ss:$24 sps:$4 sm:$0xff]  }
 0x2bf   :  { %4376 = vmatprep.subr.bf16.mxu1 %v6883_v58  ;;  %v6934_v58 = vld [vmem:[#allocation7 + $0x5b4] ss:$24 sps:$4 sm:$0xff]  }
 0x2c2   :  { %4377 = vmatpush1.bf16.msra.mxu1 %v6881_v60  ;;  %v6937_v60 = vld [vmem:[#allocation7 + $0x5e4] ss:$24 sps:$4 sm:$0xff]  }
 0x2c3   :  { %4378 = vmatprep.subr.bf16.mxu1 %v6886_v62  ;;  %v6940_v62 = vld [vmem:[#allocation7 + $0x614] ss:$24 sps:$4 sm:$0xff]  }
 0x2c6   :  { %4379 = vmatpush1.bf16.msra.mxu1 %v6884_v0  ;;  %v6943_v0 = vld [vmem:[#allocation7 + $0x644] ss:$24 sps:$4 sm:$0xff]  }
 0x2c7   :  { %4380 = vmatprep.subr.bf16.mxu1 %v6889_v39  ;;  %v6946_v39 = vld [vmem:[#allocation7 + $0x674] ss:$24 sps:$4 sm:$0xff]  }
 0x2ca   :  { %4381 = vmatpush1.bf16.msra.mxu1 %v6887_v3  ;;  %v6949_v3 = vld [vmem:[#allocation7 + $0x6a4] ss:$24 sps:$4 sm:$0xff]  }
 0x2cb   :  { %4393 = vmatprep.subr.bf16.mxu1 %v6892_v5  ;;  %v6952_v5 = vld [vmem:[#allocation7 + $0x6d4] ss:$24 sps:$4 sm:$0xff]  }
 0x2cd   :  { %4383 = vmatmul.mubr.bf16.vlgmr.msra.gmra.mrb[12].mxu1 %v7534_v44  ;;  %v7019_v44 = vld [vmem:[#allocation10 + $0xb0] ss:$8 sps:$4 sm:$0xff]  }
 0x2ce   :  { %4394 = vmatpush1.bf16.msra.mxu1 %v6890_v9  ;;  %4425 = vmatprep.mubr.bf16.mxu1 %v7547_v54  ;;  %v6904_v54 = vld [vmem:[#allocation7 + $0x3d4] ss:$24 sps:$4 sm:$0xff]   ;;  %v6955_v9 = vld [vmem:[#allocation7 + $0x704] ss:$24 sps:$4 sm:$0xff]  }
 0x2cf   :  { %4395 = vmatprep.subr.bf16.mxu1 %v6895_v12  ;;  %5199 = vmatpush1.bf16.msra.mxu0 %v7019_v44  ;;  %v6961_v12 = vld [vmem:[#allocation7 + $0x764] ss:$24 sps:$4 sm:$0xff]   ;;  %v6991_v44 = vld [vmem:[#allocation7 + $0x854] ss:$24 sps:$4 sm:$0xff]  }
 0x2d0   :  { %5200 = vmatprep.subr.bf16.mxu0 %v7024_v24  ;;  %v6989_v24 = vld [vmem:[#allocation7 + $0x850] ss:$24 sps:$4 sm:$0xff]  }
 0x2d2   :  { %4396 = vmatpush1.bf16.msra.mxu1 %v6893_v15  ;;  %v6965_v15 = vld [vmem:[#allocation7 + $0x790] ss:$24 sps:$4 sm:$0xff]  }
 0x2d3   :  { %4397 = vmatprep.subr.bf16.mxu1 %v6898_v19  ;;  %5201 = vmatpush1.bf16.msra.mxu0 %v7022_v26  ;;  %v6971_v19 = vld [vmem:[#allocation7 + $0x7c0] ss:$24 sps:$4 sm:$0xff]   ;;  %v7003_v26 = vld [vmem:[#allocation7 + $0x8b4] ss:$24 sps:$4 sm:$0xff]  }
 0x2d4   :  { %5202 = vmatprep.subr.bf16.mxu0 %v7027_v4  ;;  %v7001_v4 = vld [vmem:[#allocation7 + $0x8b0] ss:$24 sps:$4 sm:$0xff]  }
 0x2d6   :  { %4398 = vmatpush1.bf16.msra.mxu1 %v6896_v22  ;;  %v6985_v22 = vld [vmem:[#allocation7 + $0x824] ss:$24 sps:$4 sm:$0xff]  }
 0x2d7   :  { %4399 = vmatprep.subr.bf16.mxu1 %v6901_v23  ;;  %5203 = vmatpush1.bf16.msra.mxu0 %v7025_v8  ;;  %v6983_v23 = vld [vmem:[#allocation7 + $0x820] ss:$24 sps:$4 sm:$0xff]  }
 0x2d8   :  { %5204 = vmatprep.subr.bf16.mxu0 %v7030_v34  ;;  %v7578_v8 = vld [vmem:[#allocation8] sm:$0x3f] }
 0x2da   :  { %4400 = vmatpush1.bf16.msra.mxu1 %v6899_v25  ;;  %v6997_v25 = vld [vmem:[#allocation7 + $0x884] ss:$24 sps:$4 sm:$0xff]  }
 0x2db   :  { %4401 = vmatprep.subr.bf16.mxu1 %v6904_v54  ;;  %5205 = vmatpush1.bf16.msra.mxu0 %v7028_v31  ;;  %v6995_v54 = vld [vmem:[#allocation7 + $0x880] ss:$24 sps:$4 sm:$0xff]  }
 0x2dc   :  { %5206 = vmatprep.subr.bf16.mxu0 %v7033_v33 }
 0x2de   :  { %4402 = vmatpush1.bf16.msra.mxu1 %v6902_v11  ;;  %v7009_v11 = vld [vmem:[#allocation7 + $0x8e4] ss:$24 sps:$4 sm:$0xff]  }
 0x2df   :  { %4403 = vmatprep.subr.bf16.mxu1 %v6907_v7  ;;  %5207 = vmatpush1.bf16.msra.mxu0 %v7031_v36  ;;  %v7007_v7 = vld [vmem:[#allocation7 + $0x8e0] ss:$24 sps:$4 sm:$0xff]  }
 0x2e0   :  { %5219 = vmatprep.subr.bf16.mxu0 %v7036_v38 }
 0x2e2   :  { %4404 = vmatpush1.bf16.msra.mxu1 %v6905_v27  ;;  %v4494_v27 = vrot.slane %v7578_v8, %v7507_v30 }
 0x2e3   :  { %4405 = vmatprep.subr.bf16.mxu1 %v6910_v50 }
 0x2e4   :  { %v4502_v50 = vcombine.high %v4494_v27, %v4494_v27  ;;  %v7585_v31 = vrot.slane %v4494_v27, %v7507_v30  ;;  %v7076_v27 = vld [vmem:[#allocation10 + $0x1e0] ss:$8 sps:$4 sm:$0xff]  }
 0x2e6   :  { %4406 = vmatpush1.bf16.msra.mxu1 %v6908_v29  ;;  %v4524_v34 = vrot.slane %v4502_v50, %v7507_v30 }
 0x2e7   :  { %4407 = vmatprep.subr.bf16.mxu1 %v6913_v32  ;;  %v4535_v32 = vpack.i.b16 %v7585_v31, %v7585_v31 }
 0x2e8   :  { %v4533_v29 = vcombine.high %v4524_v34, %v4524_v34  ;;  %v4542_v33 = vpack.i.b16 %v4524_v34, %v4524_v34  ;;  %v7081_v34 = vld [vmem:[#allocation10 + $0x1f4] ss:$8 sps:$4 sm:$0xff]  }
 0x2ea   :  { %4408 = vmatpush1.bf16.msra.mxu1 %v6911_v35  ;;  %v4556_v35 = vpack.i.b16 %v4533_v29, %v4533_v29  ;;  %v7079_v29 = vld [vmem:[#allocation10 + $0x1f0] ss:$8 sps:$4 sm:$0xff]  }
 0x2eb   :  { %4409 = vmatprep.subr.bf16.mxu1 %v6916_v37 }
 0x2ee   :  { %4410 = vmatpush1.bf16.msra.mxu1 %v6914_v43  ;;  %v4540_v43 = vrot.slane %v4535_v32, %v7520_v48 }
 0x2ef   :  { %4411 = vmatprep.subr.bf16.mxu1 %v6919_v46 }
 0x2f2   :  { %4412 = vmatpush1.bf16.msra.mxu1 %v6917_v49 }
 0x2f3   :  { %4413 = vmatprep.subr.bf16.mxu1 %v6922_v47  ;;  %v4547_v47 = vrot.slane %v4542_v33, %v7520_v48  ;;  %v7082_v33 = vld [vmem:[#allocation10 + $0x200] ss:$8 sps:$4 sm:$0xff]  }
 0x2f6   :  { %4414 = vmatpush1.bf16.msra.mxu1 %v6920_v51  ;;  %v4561_v51 = vrot.slane %v4556_v35, %v7520_v48 }
 0x2f7   :  { %4415 = vmatprep.subr.bf16.mxu1 %v6925_v52 }
 0x2fa   :  { %4416 = vmatpush1.bf16.msra.mxu1 %v6923_v53 }
 0x2fb   :  { %4417 = vmatprep.subr.bf16.mxu1 %v6928_v42 }
 0x2fe   :  { %4418 = vmatpush1.bf16.msra.mxu1 %v6926_v55 }
 0x2ff   :  { %4419 = vmatprep.subr.bf16.mxu1 %v6931_v56 }
 0x302   :  { %4420 = vmatpush1.bf16.msra.mxu1 %v6929_v57 }
 0x303   :  { %4421 = vmatprep.subr.bf16.mxu1 %v6934_v58 }
 0x306   :  { %4422 = vmatpush1.bf16.msra.mxu1 %v6932_v59 }
 0x307   :  { %4423 = vmatprep.subr.bf16.mxu1 %v6937_v60 }
 0x30a   :  { %4424 = vmatpush1.bf16.msra.mxu1 %v6935_v61 }
 0x30b   :  { %4436 = vmatprep.subr.bf16.mxu1 %v6940_v62  ;;  %v7034_v62 = vld [vmem:[#allocation10 + $0x100] ss:$8 sps:$4 sm:$0xff]  }
 0x30d   :  { %4426 = vmatmul.mubr.bf16.vlgmr.msra.gmra.mrb[12].mxu1 %v7550_v45  ;;  %v6953_v45 = vld [vmem:[#allocation7 + $0x700] ss:$24 sps:$4 sm:$0xff]  }
 0x30e   :  { %4437 = vmatpush1.bf16.msra.mxu1 %v6938_v63  ;;  %4468 = vmatprep.mubr.bf16.mxu1 %v7564_v16  ;;  %v6956_v16 = vld [vmem:[#allocation7 + $0x730] ss:$24 sps:$4 sm:$0xff]  }
 0x30f   :  { %4438 = vmatprep.subr.bf16.mxu1 %v6943_v0  ;;  %v7039_v0 = vld [vmem:[#allocation10 + $0x114] ss:$8 sps:$4 sm:$0xff]  }
 0x312   :  { %4439 = vmatpush1.bf16.msra.mxu1 %v6941_v1 }
 0x313   :  { %4440 = vmatprep.subr.bf16.mxu1 %v6946_v39  ;;  %v7037_v39 = vld [vmem:[#allocation10 + $0x110] ss:$8 sps:$4 sm:$0xff]  }
 0x316   :  { %4441 = vmatpush1.bf16.msra.mxu1 %v6944_v2  ;;  %v7042_v2 = vld [vmem:[#allocation10 + $0x124] ss:$8 sps:$4 sm:$0xff]  }
 0x317   :  { %4442 = vmatprep.subr.bf16.mxu1 %v6949_v3  ;;  %v7040_v3 = vld [vmem:[#allocation10 + $0x120] ss:$8 sps:$4 sm:$0xff]  }
 0x31a   :  { %4443 = vmatpush1.bf16.msra.mxu1 %v6947_v40  ;;  %v7045_v40 = vld [vmem:[#allocation10 + $0x134] ss:$8 sps:$4 sm:$0xff]  }
 0x31b   :  { %4444 = vmatprep.subr.bf16.mxu1 %v6952_v5  ;;  %v7043_v5 = vld [vmem:[#allocation10 + $0x130] ss:$8 sps:$4 sm:$0xff]  }
 0x31e   :  { %4445 = vmatpush1.bf16.msra.mxu1 %v6950_v6  ;;  %v7048_v6 = vld [vmem:[#allocation10 + $0x144] ss:$8 sps:$4 sm:$0xff]  }
 0x31f   :  { %4446 = vmatprep.subr.bf16.mxu1 %v6955_v9  ;;  %v7046_v9 = vld [vmem:[#allocation10 + $0x140] ss:$8 sps:$4 sm:$0xff]  }
 0x322   :  { %4447 = vmatpush1.bf16.msra.mxu1 %v6953_v45  ;;  %v7051_v45 = vld [vmem:[#allocation10 + $0x154] ss:$8 sps:$4 sm:$0xff]  }
 0x323   :  { %4448 = vmatprep.subr.bf16.mxu1 %v6958_v10  ;;  %v7049_v10 = vld [vmem:[#allocation10 + $0x150] ss:$8 sps:$4 sm:$0xff]  }
 0x326   :  { %4449 = vmatpush1.bf16.msra.mxu1 %v6956_v16  ;;  %v7054_v16 = vld [vmem:[#allocation10 + $0x164] ss:$8 sps:$4 sm:$0xff]  }
 0x327   :  { %4450 = vmatprep.subr.bf16.mxu1 %v6961_v12  ;;  %v7052_v12 = vld [vmem:[#allocation10 + $0x160] ss:$8 sps:$4 sm:$0xff]  }
 0x32a   :  { %4451 = vmatpush1.bf16.msra.mxu1 %v6959_v13  ;;  %v7057_v13 = vld [vmem:[#allocation10 + $0x174] ss:$8 sps:$4 sm:$0xff]  }
 0x32b   :  { %4452 = vmatprep.subr.bf16.mxu1 %v6967_v14  ;;  %v7055_v14 = vld [vmem:[#allocation10 + $0x170] ss:$8 sps:$4 sm:$0xff]  }
 0x32e   :  { %4453 = vmatpush1.bf16.msra.mxu1 %v6965_v15  ;;  %v7060_v15 = vld [vmem:[#allocation10 + $0x184] ss:$8 sps:$4 sm:$0xff]  }
 0x32f   :  { %4454 = vmatprep.subr.bf16.mxu1 %v6973_v17  ;;  %v7058_v17 = vld [vmem:[#allocation10 + $0x180] ss:$8 sps:$4 sm:$0xff]  }
 0x332   :  { %4455 = vmatpush1.bf16.msra.mxu1 %v6971_v19  ;;  %v7063_v19 = vld [vmem:[#allocation10 + $0x194] ss:$8 sps:$4 sm:$0xff]  }
 0x333   :  { %4456 = vmatprep.subr.bf16.mxu1 %v6979_v20  ;;  %v7061_v20 = vld [vmem:[#allocation10 + $0x190] ss:$8 sps:$4 sm:$0xff]  }
 0x336   :  { %4457 = vmatpush1.bf16.msra.mxu1 %v6977_v21  ;;  %v7066_v21 = vld [vmem:[#allocation10 + $0x1a4] ss:$8 sps:$4 sm:$0xff]  }
 0x337   :  { %4458 = vmatprep.subr.bf16.mxu1 %v6985_v22  ;;  %v7064_v22 = vld [vmem:[#allocation10 + $0x1a0] ss:$8 sps:$4 sm:$0xff]  }
 0x33a   :  { %4459 = vmatpush1.bf16.msra.mxu1 %v6983_v23  ;;  %v7069_v23 = vld [vmem:[#allocation10 + $0x1b4] ss:$8 sps:$4 sm:$0xff]  }
 0x33b   :  { %4460 = vmatprep.subr.bf16.mxu1 %v6991_v44  ;;  %v7067_v44 = vld [vmem:[#allocation10 + $0x1b0] ss:$8 sps:$4 sm:$0xff]  }
 0x33e   :  { %4461 = vmatpush1.bf16.msra.mxu1 %v6989_v24  ;;  %v7072_v24 = vld [vmem:[#allocation10 + $0x1c4] ss:$8 sps:$4 sm:$0xff]  }
 0x33f   :  { %4462 = vmatprep.subr.bf16.mxu1 %v6997_v25  ;;  %v7070_v25 = vld [vmem:[#allocation10 + $0x1c0] ss:$8 sps:$4 sm:$0xff]  }
 0x342   :  { %4463 = vmatpush1.bf16.msra.mxu1 %v6995_v54  ;;  %v4532_v54 = vcombine.high %v7585_v31, %v7585_v31  ;;  %v7084_v31 = vld [vmem:[#allocation10 + $0x204] ss:$8 sps:$4 sm:$0xff]  }
 0x343   :  { %4464 = vmatprep.subr.bf16.mxu1 %v7003_v26  ;;  %v7075_v26 = vld [vmem:[#allocation10 + $0x1d4] ss:$8 sps:$4 sm:$0xff]  }
 0x346   :  { %4465 = vmatpush1.bf16.msra.mxu1 %v7001_v4  ;;  %v7073_v4 = vld [vmem:[#allocation10 + $0x1d0] ss:$8 sps:$4 sm:$0xff]  }
 0x347   :  { %4466 = vmatprep.subr.bf16.mxu1 %v7009_v11  ;;  %v4549_v11 = vpack.i.b16 %v4532_v54, %v4532_v54 }
 0x349   :  { %v4554_v50 = vrot.slane %v4549_v11, %v7520_v48 }
 0x34a   :  { %4467 = vmatpush1.bf16.msra.mxu1 %v7007_v7  ;;  %v7078_v7 = vld [vmem:[#allocation10 + $0x1e4] ss:$8 sps:$4 sm:$0xff]  }
 0x34d   :  { %4469 = vmatmul.mubr.bf16.vlgmr.msra.gmra.mrb[12].mxu1 %v7567_v18 }
 0x360   :  { %v4212_v36 = vpop.f32.mrb[8].mxu1  ;;  %v7589_v37 = vpop.f32.mrb[8].mxu0 }
 0x361   :  { %v4214_v38 = vpop.f32.mrb[9].mxu1  ;;  %v4343_v18 = vpop.f32.mrb[9].mxu0 }
 0x362   :  { %v4216_v46 = vpop.f32.mrb[10].mxu1  ;;  %v7592_v49 = vpop.f32.mrb[10].mxu0 }
 0x363   :  { %v4479_v52 = vpack.c.bf16 %v4216_v46, %v4212_v36  ;;  %v4481_v53 = vpack.c.bf16 %v7592_v49, %v7589_v37  ;;  %v4218_v42 = vpop.f32.mrb[11].mxu1  ;;  %v4347_v55 = vpop.f32.mrb[11].mxu0  ;;  %v7087_v36 = vld [vmem:[#allocation10 + $0x214] ss:$8 sps:$4 sm:$0xff]   ;;  %v7091_v37 = vld [vmem:[#allocation10 + $0x230] ss:$8 sps:$4 sm:$0xff]  }
 0x364   :  { %v4480_v56 = vpack.c.bf16 %v4218_v42, %v4214_v38  ;;  %v4482_v57 = vpack.c.bf16 %v4347_v55, %v4343_v18  ;;  %v7085_v38 = vld [vmem:[#allocation10 + $0x210] ss:$8 sps:$4 sm:$0xff]   ;;  %v7090_v18 = vld [vmem:[#allocation10 + $0x224] ss:$8 sps:$4 sm:$0xff]   ;;  %v7093_v46 = vld [vmem:[#allocation10 + $0x234] ss:$8 sps:$4 sm:$0xff]  }
 0x365   :  { %v4576_v58 = vadd.bf16 %v4540_v43, %v4479_v52  ;;  %v4578_v32 = vadd.bf16 %v4554_v50, %v4481_v53  ;;  %v7088_v43 = vld [vmem:[#allocation10 + $0x220] ss:$8 sps:$4 sm:$0xff]   ;;  %v7096_v49 = vld [vmem:[#allocation10 + $0x244] ss:$8 sps:$4 sm:$0xff]   ;;  %v7097_v52 = vld [vmem:[#allocation10 + $0x250] ss:$8 sps:$4 sm:$0xff]  }
 0x366   :  { %v4577_v59 = vadd.bf16 %v4547_v47, %v4480_v56  ;;  %v4579_v60 = vadd.bf16 %v4561_v51, %v4482_v57  ;;  %v7094_v47 = vld [vmem:[#allocation10 + $0x240] ss:$8 sps:$4 sm:$0xff]   ;;  %v7099_v51 = vld [vmem:[#allocation10 + $0x254] ss:$8 sps:$4 sm:$0xff]   ;;  %v7102_v53 = vld [vmem:[#allocation10 + $0x264] ss:$8 sps:$4 sm:$0xff]  }
 0x367   :  { %v4582_v63 = vmax.bf16 %v7322_v41, %v4576_v58  ;;  %v4584_v35 = vmax.bf16 %v7322_v41, %v4578_v32  ;;  %v7100_v42 = vld [vmem:[#allocation10 + $0x260] ss:$8 sps:$4 sm:$0xff]   ;;  %v7105_v55 = vld [vmem:[#allocation10 + $0x274] ss:$8 sps:$4 sm:$0xff]   ;;  %v7103_v56 = vld [vmem:[#allocation10 + $0x270] ss:$8 sps:$4 sm:$0xff]  }
 0x368   :  { %v4583_v61 = vmax.bf16 %v7322_v41, %v4577_v59  ;;  %v4585_v1 = vmax.bf16 %v7322_v41, %v4579_v60  ;;  %v7108_v57 = vld [vmem:[#allocation10 + $0x284] ss:$8 sps:$4 sm:$0xff]   ;;  %v7106_v58 = vld [vmem:[#allocation10 + $0x280] ss:$8 sps:$4 sm:$0xff]   ;;  %v7111_v59 = vld [vmem:[#allocation10 + $0x294] ss:$8 sps:$4 sm:$0xff]  }
 0x369   :  { %v7109_v60 = vld [vmem:[#allocation10 + $0x290] ss:$8 sps:$4 sm:$0xff]  }
 0x36a   :  { %5208 = vmatprep.mubr.bf16.mxu0 %v4583_v61  ;;  %v7114_v61 = vld [vmem:[#allocation10 + $0x2a4] ss:$8 sps:$4 sm:$0xff]  }
 0x36b   :  { %5209 = vmatmul.mubr.bf16.vlgmr.msra.gmra.mrb[12].mxu0 %v4582_v63  ;;  %v7117_v63 = vld [vmem:[#allocation10 + $0x2b4] ss:$8 sps:$4 sm:$0xff]  }
 0x36c   :  { %5220 = vmatpush1.bf16.msra.mxu0 %v7034_v62  ;;  %5251 = vmatprep.mubr.bf16.mxu0 %v4585_v1  ;;  %v7112_v62 = vld [vmem:[#allocation10 + $0x2a0] ss:$8 sps:$4 sm:$0xff]   ;;  %v7120_v1 = vld [vmem:[#allocation10 + $0x2c4] ss:$8 sps:$4 sm:$0xff]  }
 0x36d   :  { %5221 = vmatprep.subr.bf16.mxu0 %v7039_v0  ;;  %v7115_v0 = vld [vmem:[#allocation10 + $0x2b0] ss:$8 sps:$4 sm:$0xff]  }
 0x370   :  { %5222 = vmatpush1.bf16.msra.mxu0 %v7037_v39  ;;  %v7118_v39 = vld [vmem:[#allocation10 + $0x2c0] ss:$8 sps:$4 sm:$0xff]  }
 0x371   :  { %5223 = vmatprep.subr.bf16.mxu0 %v7042_v2  ;;  %v7123_v2 = vld [vmem:[#allocation10 + $0x2d4] ss:$8 sps:$4 sm:$0xff]  }
 0x374   :  { %5224 = vmatpush1.bf16.msra.mxu0 %v7040_v3  ;;  %v7121_v3 = vld [vmem:[#allocation10 + $0x2d0] ss:$8 sps:$4 sm:$0xff]  }
 0x375   :  { %5225 = vmatprep.subr.bf16.mxu0 %v7045_v40  ;;  %v7127_v40 = vld [vmem:[#allocation10 + $0x2e4] ss:$8 sps:$4 sm:$0xff]  }
 0x378   :  { %5226 = vmatpush1.bf16.msra.mxu0 %v7043_v5  ;;  %v7125_v5 = vld [vmem:[#allocation10 + $0x2e0] ss:$8 sps:$4 sm:$0xff]  }
 0x379   :  { %5227 = vmatprep.subr.bf16.mxu0 %v7048_v6  ;;  %v7130_v6 = vld [vmem:[#allocation10 + $0x2f4] ss:$8 sps:$4 sm:$0xff]  }
 0x37c   :  { %5228 = vmatpush1.bf16.msra.mxu0 %v7046_v9  ;;  %v7128_v9 = vld [vmem:[#allocation10 + $0x2f0] ss:$8 sps:$4 sm:$0xff]  }
 0x37d   :  { %5229 = vmatprep.subr.bf16.mxu0 %v7051_v45  ;;  %v4487_v45 = vcombine.high %v7578_v8, %v7578_v8 }
 0x380   :  { %5230 = vmatpush1.bf16.msra.mxu0 %v7049_v10  ;;  %v4501_v10 = vrot.slane %v4487_v45, %v7507_v30 }
 0x381   :  { %5231 = vmatprep.subr.bf16.mxu0 %v7054_v16 }
 0x382   :  { %v4503_v16 = vcombine.high %v4501_v10, %v4501_v10 }
 0x384   :  { %5232 = vmatpush1.bf16.msra.mxu0 %v7052_v12  ;;  %v4517_v12 = vrot.slane %v4501_v10, %v7507_v30 }
 0x385   :  { %5233 = vmatprep.subr.bf16.mxu0 %v7057_v13  ;;  %v4531_v13 = vrot.slane %v4503_v16, %v7507_v30  ;;  %v4684_v30 = vld [vmem:[#allocation11] sm:$0x3] }
 0x386   :  { %v4689_v11 = vrot.slane %v4684_v30, %v7520_v48 }
 0x388   :  { %5234 = vmatpush1.bf16.msra.mxu0 %v7055_v14  ;;  %v4563_v14 = vpack.i.b16 %v4517_v12, %v4517_v12 }
 0x389   :  { %5235 = vmatprep.subr.bf16.mxu0 %v7060_v15  ;;  %v4570_v15 = vpack.i.b16 %v4531_v13, %v4531_v13 }
 0x38c   :  { %5236 = vmatpush1.bf16.msra.mxu0 %v7058_v17 }
 0x38d   :  { %5237 = vmatprep.subr.bf16.mxu0 %v7063_v19 }
 0x390   :  { %5238 = vmatpush1.bf16.msra.mxu0 %v7061_v20  ;;  %v4568_v20 = vrot.slane %v4563_v14, %v7520_v48 }
 0x391   :  { %5239 = vmatprep.subr.bf16.mxu0 %v7066_v21 }
 0x394   :  { %5240 = vmatpush1.bf16.msra.mxu0 %v7064_v22  ;;  %v4575_v22 = vrot.slane %v4570_v15, %v7520_v48 }
 0x395   :  { %5241 = vmatprep.subr.bf16.mxu0 %v7069_v23 }
 0x398   :  { %5242 = vmatpush1.bf16.msra.mxu0 %v7067_v44 }
 0x399   :  { %5243 = vmatprep.subr.bf16.mxu0 %v7072_v24 }
 0x39c   :  { %5244 = vmatpush1.bf16.msra.mxu0 %v7070_v25 }
 0x39d   :  { %5245 = vmatprep.subr.bf16.mxu0 %v7075_v26 }
 0x3a0   :  { %5246 = vmatpush1.bf16.msra.mxu0 %v7073_v4  ;;  %v4692_v4 = vsub.s32 1, %v7499_v28 }
 0x3a1   :  { %5247 = vmatprep.subr.bf16.mxu0 %v7078_v7 }
 0x3a2   :  { %v4693_v7 = vrot.slane %v4684_v30, %v4692_v4 }
 0x3a4   :  { %5248 = vmatpush1.bf16.msra.mxu0 %v7076_v27 }
 0x3a5   :  { %5249 = vmatprep.subr.bf16.mxu0 %v7081_v34 }
 0x3a8   :  { %5250 = vmatpush1.bf16.msra.mxu0 %v7079_v29 }
 0x3a9   :  { %5262 = vmatprep.subr.bf16.mxu0 %v7084_v31 }
 0x3ab   :  { %5252 = vmatmul.mubr.bf16.vlgmr.msra.gmra.mrb[12].mxu0 %v4584_v35 }
 0x3ac   :  { %5263 = vmatpush1.bf16.msra.mxu0 %v7082_v33 }
 0x3ad   :  { %5264 = vmatprep.subr.bf16.mxu0 %v7087_v36 }
 0x3b0   :  { %5265 = vmatpush1.bf16.msra.mxu0 %v7085_v38 }
 0x3b1   :  { %5266 = vmatprep.subr.bf16.mxu0 %v7090_v18 }
 0x3b4   :  { %5267 = vmatpush1.bf16.msra.mxu0 %v7088_v43 }
 0x3b5   :  { %5268 = vmatprep.subr.bf16.mxu0 %v7093_v46 }
 0x3b8   :  { %5269 = vmatpush1.bf16.msra.mxu0 %v7091_v37 }
 0x3b9   :  { %5270 = vmatprep.subr.bf16.mxu0 %v7096_v49 }
 0x3bc   :  { %5271 = vmatpush1.bf16.msra.mxu0 %v7094_v47 }
 0x3bd   :  { %5272 = vmatprep.subr.bf16.mxu0 %v7099_v51 }
 0x3c0   :  { %5273 = vmatpush1.bf16.msra.mxu0 %v7097_v52 }
 0x3c1   :  { %5274 = vmatprep.subr.bf16.mxu0 %v7102_v53 }
 0x3c4   :  { %5275 = vmatpush1.bf16.msra.mxu0 %v7100_v42 }
 0x3c5   :  { %5276 = vmatprep.subr.bf16.mxu0 %v7105_v55 }
 0x3c8   :  { %5277 = vmatpush1.bf16.msra.mxu0 %v7103_v56 }
 0x3c9   :  { %5278 = vmatprep.subr.bf16.mxu0 %v7108_v57 }
 0x3cc   :  { %5279 = vmatpush1.bf16.msra.mxu0 %v7106_v58 }
 0x3cd   :  { %5280 = vmatprep.subr.bf16.mxu0 %v7111_v59 }
 0x3d0   :  { %5281 = vmatpush1.bf16.msra.mxu0 %v7109_v60 }
 0x3d1   :  { %5282 = vmatprep.subr.bf16.mxu0 %v7114_v61 }
 0x3d4   :  { %5283 = vmatpush1.bf16.msra.mxu0 %v7112_v62 }
 0x3d5   :  { %5284 = vmatprep.subr.bf16.mxu0 %v7117_v63 }
 0x3d8   :  { %5285 = vmatpush1.bf16.msra.mxu0 %v7115_v0 }
 0x3d9   :  { %5286 = vmatprep.subr.bf16.mxu0 %v7120_v1 }
 0x3dc   :  { %5287 = vmatpush1.bf16.msra.mxu0 %v7118_v39 }
 0x3dd   :  { %5288 = vmatprep.subr.bf16.mxu0 %v7123_v2 }
 0x3e0   :  { %5289 = vmatpush1.bf16.msra.mxu0 %v7121_v3 }
 0x3e1   :  { %5290 = vmatprep.subr.bf16.mxu0 %v7127_v40 }
 0x3e4   :  { %5291 = vmatpush1.bf16.msra.mxu0 %v7125_v5 }
 0x3e5   :  { %5292 = vmatprep.subr.bf16.mxu0 %v7130_v6 }
 0x3e8   :  { %5293 = vmatpush1.bf16.msra.mxu0 %v7128_v9 }
 0x420   :  { %v4470_v17 = vpop.f32.mrb[12].mxu1 }
 0x421   :  { %v4472_v19 = vpop.f32.mrb[13].mxu1 }
 0x422   :  { %v4474_v21 = vpop.f32.mrb[14].mxu1 }
 0x423   :  { %v4483_v23 = vpack.c.bf16 %v4474_v21, %v4470_v17  ;;  %v4476_v44 = vpop.f32.mrb[15].mxu1 }
 0x424   :  { %v4484_v24 = vpack.c.bf16 %v4476_v44, %v4472_v19 }
 0x425   :  { %v4580_v8 = vadd.bf16 %v4568_v20, %v4483_v23 }
 0x426   :  { %v4581_v25 = vadd.bf16 %v4575_v22, %v4484_v24 }
 0x427   :  { %v4586_v26 = vmax.bf16 %v7322_v41, %v4580_v8 }
 0x428   :  { %v4587_v54 = vmax.bf16 %v7322_v41, %v4581_v25 }
 0x42a   :  { %5294 = vmatprep.mubr.bf16.mxu0 %v4587_v54 }
 0x42b   :  { %5295 = vmatmul.mubr.bf16.vlgmr.msra.gmra.mrb[12].mxu0 %v4586_v26 }
 0x4fe   :  { %v5296_v27 = vpop.f32.mrb[12].mxu0 }
 0x4ff   :  { %v6041_v50 = vadd.f32 %v5296_v27, %v4689_v11  ;;  %v5298_v34 = vpop.f32.mrb[13].mxu0 }
 0x500   :  { %v6042_v29 = vadd.f32 %v5298_v34, %v4693_v7  ;;  %v5300_v32 = vpop.f32.mrb[14].mxu0 }
 0x501   :  { %v5302_v31 = vpop.f32.mrb[15].mxu0  ;;  %v6043_v33 = vadd.f32 %v5300_v32, %v4689_v11 }
 0x502   :  { %v6044_v35 = vadd.f32 %v5302_v31, %v4693_v7  ;;  %v5305_v36 = vmax.f32 %v6041_v50, %v6042_v29 }
 0x504   :  { %5306 = vmax.xlane.f32.xlu0 %v5305_v36  ;;  %v5308_v38 = vmax.f32 %v6043_v33, %v6044_v35 }
 0x508   :  { %5309 = vmax.xlane.f32.xlu0 %v5308_v38 }
 0x591   :  { %v5307_v41 = vpop.xlane.xlu0 %5306 }
 0x592   :  { %v5311_v18 = vsub.f32 %v6041_v50, %v5307_v41  ;;  %v5312_v43 = vsub.f32 %v6042_v29, %v5307_v41 }
 0x594   :  { %v5315_v46 = vmul.f32 1.442695, %v5311_v18  ;;  %v5317_v28 = vmul.f32 1.442695, %v5312_v43 }
 0x595   :  { %v5310_v37 = vpop.xlane.xlu0 %5309 }
 0x596   :  { %7131 = vpow2.f32 %v5315_v46  ;;  %v5313_v48 = vsub.f32 %v6043_v33, %v5310_v37  ;;  %v5314_v49 = vsub.f32 %v6044_v35, %v5310_v37 }
 0x597   :  { %7133 = vpow2.f32 %v5317_v28 }
 0x598   :  { %v5319_v47 = vmul.f32 1.442695, %v5313_v48  ;;  %v5321_v51 = vmul.f32 1.442695, %v5314_v49 }
 0x59a   :  { %7135 = vpow2.f32 %v5319_v47 }
 0x59b   :  { %7137 = vpow2.f32 %v5321_v51 }
 0x5a0   :  { %v7132_v52 = vpop.eup %7131 }
 0x5a1   :  { %v7134_v53 = vpop.eup %7133 }
 0x5a2   :  { %v5323_v42 = vadd.f32 %v7134_v53, %v7132_v52 }
 0x5a4   :  { %v7136_v55 = vpop.eup %7135  ;;  %5324 = vadd.xlane.f32.xlu1 %v5323_v42 }
 0x5a5   :  { %v7138_v56 = vpop.eup %7137 }
 0x5a6   :  { %v5326_v57 = vadd.f32 %v7138_v56, %v7136_v55 }
 0x5a8   :  { %5327 = vadd.xlane.f32.xlu1 %v5326_v57 }
 0x631   :  { %v5325_v58 = vpop.xlane.xlu1 %5324 }
 0x632   :  { %7139 = vrcp.f32 %v5325_v58 }
 0x635   :  { %v5328_v59 = vpop.xlane.xlu1 %5327 }
 0x636   :  { %7141 = vrcp.f32 %v5328_v59 }
 0x63c   :  { %v7140_v60 = vpop.eup %7139 }
 0x63d   :  { %v5331_v61 = vmul.f32 %v7140_v60, %v7132_v52  ;;  %v5332_v62 = vmul.f32 %v7140_v60, %v7134_v53 }
 0x63f   :  { %5335 = vst [vmem:[#allocation13] sm:$0xff] %v5331_v61  ;;  %5336 = vst [vmem:[#allocation13 + $0x8] sm:$0xff] %v5332_v62 }
 0x640   :  { %v7142_v63 = vpop.eup %7141 }
 0x641   :  { %v5333_v0 = vmul.f32 %v7142_v63, %v7136_v55  ;;  %v5334_v1 = vmul.f32 %v7142_v63, %v7138_v56 }
 0x643   :  { %5337 = vst [vmem:[#allocation13 + $0x10] sm:$0xff] %v5333_v0  ;;  %5338 = vst [vmem:[#allocation13 + $0x18] sm:$0xff] %v5334_v1 }
 0x644   :  { %7290 = shalt.err (!%p7287_p10)
}
 0x645   :  { %s7291_s21 = scalar_lea.hbm %s7638_s7, 512 }
 0x646   :  { %p7292_p11 = scmp.ne.s32.totalorder %s7638_s7, %s7291_s21  ;;  %p7295_p12 = scmp.lt.u32.totalorder %s7291_s21, %s7638_s7 }
 0x648   :  { %p7297_p13 = pnand %p7295_p12, %p7292_p11 }
 0x64a   :  { %7300 = shalt.err (!%p7297_p13)
}
 0x64b   :  { %s7324_s6 = smov 256   ;;  %s7325_s23 = smov 16  }
 0x64c   :  { %5350 = dma.vmem_to_hbm [thread:$0]  %s5345_s16, 512, %s7638_s7, [#allocation4], %s7324_s6, %s7324_s6, %s7325_s23  }
 0x64d   :  { %7309 = dma.done.wait [#allocation4], 512  }
 0x64e   :  { %7310 = vsyncadd [#allocation4], 4294966784 }
 0x64f   :  { %5354 = vsyncpa [#allocation3], 1 }
 0x650   :  { %5355 = vsyncpa [#allocation6], 1 }
 0x651   :  { %5356 = vsyncpa [#allocation9], 1 }
 0x652   :  { %5357 = vsyncpa [#allocation12], 1 }
 0x653   :  { %5358 = vsyncpa [#allocation4], 1 }

</bundles_post_ra>
